<compile_context>
chip_gen: v6e
topology: v6e:2x2x1
jax: 0.10.0
libtpu: 0.0.40
codegen_flags: <defaults>
</compile_context>

<pallas_src>
import functools

import jax
import jax.numpy as jnp
from jax.experimental import pallas as pl
from jax.experimental.pallas import tpu as pltpu


# ----------------------------------------------------------------------------
# extractROI:  rois * scale   (plain JAX — too small to justify a pallas_call)
# ----------------------------------------------------------------------------
def extract_roi(rois, scale):
    # NOTE: the reference torch code multiplies the WHOLE roi tensor (including
    # the batch-index column) by `scale`; we keep those exact semantics.
    return rois * jnp.asarray(scale, rois.dtype)


# ----------------------------------------------------------------------------
# AdaptiveMaxPool2d(output_size, return_indices=True) — Pallas TPU kernel
# ----------------------------------------------------------------------------
def _adaptive_max_pool_kernel(x_ref, out_ref, idx_ref, *, H, W, out_size):
    """x_ref: (1, H, W, Cb) NHWC block; out/idx_ref: (1, out_size, out_size, Cb)."""
    Cb = x_ref.shape[-1]
    sentinel = jnp.full((1, Cb), H * W, jnp.int32)   # > any valid flat index
    # Flat-index iota over the sublane (w) axis, broadcast across channel
    # lanes.  Hoisted once: JAX does not CSE broadcast_in_dim.
    w_iota = jax.lax.broadcasted_iota(jnp.int32, (W, Cb), 0)

    for oh in range(out_size):
        h0 = (oh * H) // out_size
        h1 = -(-((oh + 1) * H) // out_size)

        # --- pass 1: reduce the adaptive h-window; every row load is a
        #     lane-dense (W, Cb) slab; flat index tracked directly.
        col_v = x_ref[0, h0]                          # (W, Cb)
        col_flat = w_iota + (h0 * W)                  # (W, Cb) int32
        for h in range(h0 + 1, h1):
            row = x_ref[0, h]
            take = row > col_v                        # strict >: first max wins
            col_v = jnp.where(take, row, col_v)
            col_flat = jnp.where(take, w_iota + (h * W), col_flat)

        # --- pass 2: reduce each adaptive w-window with cross-sublane
        #     max/min (XLU path); channels stay dense on lanes.
        cells_v, cells_i = [], []
        for ow in range(out_size):
            w0 = (ow * W) // out_size
            w1 = -(-((ow + 1) * W) // out_size)
            win_v = col_v[w0:w1]                      # (w1-w0, Cb)
            win_f = col_flat[w0:w1]
            m = jnp.max(win_v, axis=0, keepdims=True)             # (1, Cb)
            cand = jnp.where(win_v == m, win_f, sentinel)
            flat = jnp.min(cand, axis=0, keepdims=True)           # (1, Cb)
            cells_v.append(m)
            cells_i.append(flat)

        # One lane-dense (out_size, Cb) store per output row (bounds the live
        # vreg set; no end-of-kernel 2x49xCb accumulation).
        out_ref[0, oh] = jnp.concatenate(cells_v, axis=0).astype(out_ref.dtype)
        idx_ref[0, oh] = jnp.concatenate(cells_i, axis=0)


def _round_up(x, m):
    return -(-x // m) * m


def _padded_nhwc_block_bytes(H, W, cb, itemsize):
    # Block (1, H, W, cb): last dim -> lanes (pad to 128),
    # second-last (W) -> sublanes (pad to 8).
    return H * _round_up(W, 8) * _round_up(cb, 128) * itemsize


def _vmem_capacity_bytes():
    # Generation-aware: 64 MiB on v7x, 128 MiB on v5e/v6e.
    try:
        return int(pltpu.get_tpu_info().vmem_capacity_bytes)
    except Exception:  # interpret mode / query unavailable -> conservative
        return 64 << 20


def _pick_channel_block(N, C, H, W, itemsize, vmem_cap):
    # The output block's last (lane) dim is cb, so cb must be a multiple of
    # 128 or equal the full channel dim C.
    if C % 128 != 0:
        # TODO(synk): a non-128-multiple channel dim cannot be sub-tiled on
        # the lane axis; very large C*H*W planes in this branch may exceed
        # VMEM (not the case for typical ROI feature maps).
        return C
    budget = vmem_cap // 4     # double-buffered input block <= vmem_cap / 2
    cb = 128
    while (C % (cb * 2) == 0
           and _padded_nhwc_block_bytes(H, W, cb * 2, itemsize) <= budget):
        cb *= 2
    # Megacore (v7x has 2 TensorCores): ensure >= 2 parallel grid steps when
    # the channel dim allows it.
    while N * (C // cb) < 2 and (cb // 2) % 128 == 0:
        cb //= 2
    return cb


def adaptive_max_pool_2d(x_nchw, out_size=7):
    N, C, H, W = x_nchw.shape
    itemsize = x_nchw.dtype.itemsize
    vmem_cap = _vmem_capacity_bytes()
    cb = _pick_channel_block(N, C, H, W, itemsize, vmem_cap)
    c_grid = C // cb

    # One wrapper-side NCHW->NHWC transpose so channels land on vreg lanes
    # inside the kernel (lane-dense compute, ~9x smaller VMEM input block,
    # contiguous DMA runs).
    x_nhwc = jnp.transpose(x_nchw, (0, 2, 3, 1))

    # Padded-size-aware VMEM accounting: double-buffered input block plus two
    # double-buffered (7, 7, cb) outputs, small headroom, capped below the
    # chip's physical VMEM.
    in_blk = _padded_nhwc_block_bytes(H, W, cb, itemsize)
    out_blk = out_size * _round_up(out_size, 8) * _round_up(cb, 128) * 4
    vmem_limit = int(min(max(2 * (in_blk + 2 * out_blk) + (2 << 20), 16 << 20),
                         vmem_cap - (8 << 20)))

    # Purely HBM-bandwidth bound (no MXU work): advertise that to XLA.
    cost = pl.CostEstimate(
        flops=N * C * H * W,
        transcendentals=0,
        bytes_accessed=N * C * H * W * itemsize
        + 2 * N * C * out_size * out_size * 4,
    )

    kernel = functools.partial(_adaptive_max_pool_kernel,
                               H=H, W=W, out_size=out_size)
    out_nhwc, idx_nhwc = pl.pallas_call(
        kernel,
        out_shape=(
            jax.ShapeDtypeStruct((N, out_size, out_size, C), x_nchw.dtype),
            jax.ShapeDtypeStruct((N, out_size, out_size, C), jnp.int32),
        ),
        grid=(N, c_grid),
        in_specs=[pl.BlockSpec((1, H, W, cb), lambda n, c: (n, 0, 0, c))],
        out_specs=(
            pl.BlockSpec((1, out_size, out_size, cb), lambda n, c: (n, 0, 0, c)),
            pl.BlockSpec((1, out_size, out_size, cb), lambda n, c: (n, 0, 0, c)),
        ),
        compiler_params=pltpu.CompilerParams(
            dimension_semantics=("parallel", "parallel"),
            vmem_limit_bytes=vmem_limit,
        ),
        cost_estimate=cost,
    )(x_nhwc)

    # Tiny output-side layout fix back to PyTorch's NCHW (N, C, 7, 7).
    return (jnp.transpose(out_nhwc, (0, 3, 1, 2)),
            jnp.transpose(idx_nhwc, (0, 3, 1, 2)))


# ----------------------------------------------------------------------------
# ROI_PROCESS equivalent
# ----------------------------------------------------------------------------
class ROIProcess:
    def __init__(self, scale, output_size=7):
        self.scale = scale
        self.output_size = output_size

    def __call__(self, features, rois):
        # TODO(synk): original torch forward is incomplete (calls
        # self.extractROI() with no args and returns None); we run the intended
        # pipeline: scale the rois, then adaptive-max-pool the feature map.
        scaled = extract_roi(rois, self.scale)
        pooled, indices = adaptive_max_pool_2d(features, self.output_size)
        return scaled, pooled, indices


# ----------------------------------------------------------------------------
# Pure-JAX reference (sanity check only)
# ----------------------------------------------------------------------------
def _ref_adaptive_max_pool(x, out_size):
    N, C, H, W = x.shape
    out, idx = [], []
    for oh in range(out_size):
        h0, h1 = (oh * H) // out_size, -(-((oh + 1) * H) // out_size)
        row_o, row_i = [], []
        for ow in range(out_size):
            w0, w1 = (ow * W) // out_size, -(-((ow + 1) * W) // out_size)
            win = x[:, :, h0:h1, w0:w1].reshape(N, C, -1)
            hh = jnp.arange(h0, h1)[:, None]
            ww = jnp.arange(w0, w1)[None, :]
            flat = (hh * W + ww).reshape(-1)
            a = jnp.argmax(win, axis=-1)
            row_o.append(jnp.max(win, axis=-1))
            row_i.append(flat[a])
        out.append(jnp.stack(row_o, axis=-1))
        idx.append(jnp.stack(row_i, axis=-1))
    return jnp.stack(out, axis=-2), jnp.stack(idx, axis=-2)


if __name__ == "__main__":
    key = jax.random.PRNGKey(0)
    kf, kr, kf2 = jax.random.split(key, 3)

    # small shapes consistent with the module's intent
    features = jax.random.normal(kf, (2, 4, 16, 16), dtype=jnp.float32)  # NCHW
    rois = jax.random.uniform(kr, (8, 5), dtype=jnp.float32) * 16.0      # (idx,x1,y1,x2,y2)

    module = ROIProcess(scale=0.0625, output_size=7)
    scaled_rois, pooled, indices = module(features, rois)
    jax.block_until_ready((scaled_rois, pooled, indices))

    ref_rois = rois * 0.0625
    ref_pool, ref_idx = _ref_adaptive_max_pool(features, 7)
    assert jnp.allclose(scaled_rois, ref_rois, atol=1e-6)
    assert jnp.allclose(pooled, ref_pool, atol=1e-6)
    assert jnp.array_equal(indices, ref_idx)
    assert pooled.shape == (2, 4, 7, 7) and indices.dtype == jnp.int32

    # second check exercising the 128-channel, lane-dense / channel-grid path
    features2 = jax.random.normal(kf2, (1, 128, 14, 14), dtype=jnp.float32)
    pooled2, indices2 = adaptive_max_pool_2d(features2, 7)
    jax.block_until_ready((pooled2, indices2))
    ref_pool2, ref_idx2 = _ref_adaptive_max_pool(features2, 7)
    assert jnp.allclose(pooled2, ref_pool2, atol=1e-6)
    assert jnp.array_equal(indices2, ref_idx2)
    assert pooled2.shape == (1, 128, 7, 7)

    print("KERNEL_OK")
</pallas_src>

<mosaic_0001>
module attributes {stable_mosaic.version = 11 : i64} {
  func.func @_adaptive_max_pool_kernel(%arg0: i32, %arg1: i32, %arg2: memref<1x16x16x4xf32, #tpu.memory_space<vmem>>, %arg3: memref<1x7x7x4xf32, #tpu.memory_space<vmem>>, %arg4: memref<1x7x7x4xi32, #tpu.memory_space<vmem>>) attributes {dimension_semantics = [#tpu.dimension_semantics<parallel>, #tpu.dimension_semantics<parallel>], iteration_bounds = array<i64: 2, 1>, scalar_prefetch = 0 : i64, scratch_operands = 0 : i64, tpu.core_type = #tpu.core_type<tc>, window_params = [{transform_indices = @transform_0, window_bounds = array<i64: 1, 16, 16, 4>}, {transform_indices = @transform_1, window_bounds = array<i64: 1, 7, 7, 4>}, {transform_indices = @transform_2, window_bounds = array<i64: 1, 7, 7, 4>}]} {
    %c256_i32 = arith.constant 256 : i32
    %0 = vector.broadcast %c256_i32 : i32 to vector<1x4xi32>
    %1 = tpu.iota {dimensions = array<i32: 0>} : vector<16x4xi32>
    %c0 = arith.constant 0 : index
    %c0_0 = arith.constant 0 : index
    %c0_1 = arith.constant 0 : index
    %c0_2 = arith.constant 0 : index
    %2 = vector.load %arg2[%c0, %c0_0, %c0_1, %c0_2] : memref<1x16x16x4xf32, #tpu.memory_space<vmem>>, vector<1x1x16x4xf32>
    %3 = vector.shape_cast %2 : vector<1x1x16x4xf32> to vector<16x4xf32>
    %c0_i32 = arith.constant 0 : i32
    %4 = vector.broadcast %c0_i32 : i32 to vector<16x4xi32>
    %5 = arith.addi %1, %4 : vector<16x4xi32>
    %c0_3 = arith.constant 0 : index
    %c1 = arith.constant 1 : index
    %c0_4 = arith.constant 0 : index
    %c0_5 = arith.constant 0 : index
    %6 = vector.load %arg2[%c0_3, %c1, %c0_4, %c0_5] : memref<1x16x16x4xf32, #tpu.memory_space<vmem>>, vector<1x1x16x4xf32>
    %7 = vector.shape_cast %6 : vector<1x1x16x4xf32> to vector<16x4xf32>
    %8 = arith.cmpf ogt, %7, %3 : vector<16x4xf32>
    %9 = arith.select %8, %7, %3 : vector<16x4xi1>, vector<16x4xf32>
    %c16_i32 = arith.constant 16 : i32
    %10 = vector.broadcast %c16_i32 : i32 to vector<16x4xi32>
    %11 = arith.addi %1, %10 : vector<16x4xi32>
    %12 = arith.select %8, %11, %5 : vector<16x4xi1>, vector<16x4xi32>
    %c0_6 = arith.constant 0 : index
    %c2 = arith.constant 2 : index
    %c0_7 = arith.constant 0 : index
    %c0_8 = arith.constant 0 : index
    %13 = vector.load %arg2[%c0_6, %c2, %c0_7, %c0_8] : memref<1x16x16x4xf32, #tpu.memory_space<vmem>>, vector<1x1x16x4xf32>
    %14 = vector.shape_cast %13 : vector<1x1x16x4xf32> to vector<16x4xf32>
    %15 = arith.cmpf ogt, %14, %9 : vector<16x4xf32>
    %16 = arith.select %15, %14, %9 : vector<16x4xi1>, vector<16x4xf32>
    %c32_i32 = arith.constant 32 : i32
    %17 = vector.broadcast %c32_i32 : i32 to vector<16x4xi32>
    %18 = arith.addi %1, %17 : vector<16x4xi32>
    %19 = arith.select %15, %18, %12 : vector<16x4xi1>, vector<16x4xi32>
    %20 = vector.extract_strided_slice %16 {offsets = [0, 0], sizes = [3, 4], strides = [1, 1]} : vector<16x4xf32> to vector<3x4xf32>
    %21 = vector.extract_strided_slice %19 {offsets = [0, 0], sizes = [3, 4], strides = [1, 1]} : vector<16x4xi32> to vector<3x4xi32>
    %cst = arith.constant dense<0xFF800000> : vector<4xf32>
    %22 = vector.multi_reduction <maximumf>, %20, %cst [0] : vector<3x4xf32> to vector<4xf32>
    %23 = vector.shape_cast %22 : vector<4xf32> to vector<1x4xf32>
    %24 = vector.broadcast %23 : vector<1x4xf32> to vector<3x4xf32>
    %25 = arith.cmpf oeq, %20, %24 : vector<3x4xf32>
    %26 = vector.shape_cast %0 : vector<1x4xi32> to vector<1x4xi32>
    %27 = vector.broadcast %26 : vector<1x4xi32> to vector<3x4xi32>
    %28 = arith.select %25, %21, %27 : vector<3x4xi1>, vector<3x4xi32>
    %cst_9 = arith.constant dense<2147483647> : vector<4xi32>
    %29 = vector.multi_reduction <minsi>, %28, %cst_9 [0] : vector<3x4xi32> to vector<4xi32>
    %30 = vector.shape_cast %29 : vector<4xi32> to vector<1x4xi32>
    %31 = vector.extract_strided_slice %16 {offsets = [2, 0], sizes = [3, 4], strides = [1, 1]} : vector<16x4xf32> to vector<3x4xf32>
    %32 = vector.extract_strided_slice %19 {offsets = [2, 0], sizes = [3, 4], strides = [1, 1]} : vector<16x4xi32> to vector<3x4xi32>
    %cst_10 = arith.constant dense<0xFF800000> : vector<4xf32>
    %33 = vector.multi_reduction <maximumf>, %31, %cst_10 [0] : vector<3x4xf32> to vector<4xf32>
    %34 = vector.shape_cast %33 : vector<4xf32> to vector<1x4xf32>
    %35 = vector.broadcast %34 : vector<1x4xf32> to vector<3x4xf32>
    %36 = arith.cmpf oeq, %31, %35 : vector<3x4xf32>
    %37 = vector.shape_cast %0 : vector<1x4xi32> to vector<1x4xi32>
    %38 = vector.broadcast %37 : vector<1x4xi32> to vector<3x4xi32>
    %39 = arith.select %36, %32, %38 : vector<3x4xi1>, vector<3x4xi32>
    %cst_11 = arith.constant dense<2147483647> : vector<4xi32>
    %40 = vector.multi_reduction <minsi>, %39, %cst_11 [0] : vector<3x4xi32> to vector<4xi32>
    %41 = vector.shape_cast %40 : vector<4xi32> to vector<1x4xi32>
    %42 = vector.extract_strided_slice %16 {offsets = [4, 0], sizes = [3, 4], strides = [1, 1]} : vector<16x4xf32> to vector<3x4xf32>
    %43 = vector.extract_strided_slice %19 {offsets = [4, 0], sizes = [3, 4], strides = [1, 1]} : vector<16x4xi32> to vector<3x4xi32>
    %cst_12 = arith.constant dense<0xFF800000> : vector<4xf32>
    %44 = vector.multi_reduction <maximumf>, %42, %cst_12 [0] : vector<3x4xf32> to vector<4xf32>
    %45 = vector.shape_cast %44 : vector<4xf32> to vector<1x4xf32>
    %46 = vector.broadcast %45 : vector<1x4xf32> to vector<3x4xf32>
    %47 = arith.cmpf oeq, %42, %46 : vector<3x4xf32>
    %48 = vector.shape_cast %0 : vector<1x4xi32> to vector<1x4xi32>
    %49 = vector.broadcast %48 : vector<1x4xi32> to vector<3x4xi32>
    %50 = arith.select %47, %43, %49 : vector<3x4xi1>, vector<3x4xi32>
    %cst_13 = arith.constant dense<2147483647> : vector<4xi32>
    %51 = vector.multi_reduction <minsi>, %50, %cst_13 [0] : vector<3x4xi32> to vector<4xi32>
    %52 = vector.shape_cast %51 : vector<4xi32> to vector<1x4xi32>
    %53 = vector.extract_strided_slice %16 {offsets = [6, 0], sizes = [4, 4], strides = [1, 1]} : vector<16x4xf32> to vector<4x4xf32>
    %54 = vector.extract_strided_slice %19 {offsets = [6, 0], sizes = [4, 4], strides = [1, 1]} : vector<16x4xi32> to vector<4x4xi32>
    %cst_14 = arith.constant dense<0xFF800000> : vector<4xf32>
    %55 = vector.multi_reduction <maximumf>, %53, %cst_14 [0] : vector<4x4xf32> to vector<4xf32>
    %56 = vector.shape_cast %55 : vector<4xf32> to vector<1x4xf32>
    %57 = vector.broadcast %56 : vector<1x4xf32> to vector<4x4xf32>
    %58 = arith.cmpf oeq, %53, %57 : vector<4x4xf32>
    %59 = vector.shape_cast %0 : vector<1x4xi32> to vector<1x4xi32>
    %60 = vector.broadcast %59 : vector<1x4xi32> to vector<4x4xi32>
    %61 = arith.select %58, %54, %60 : vector<4x4xi1>, vector<4x4xi32>
    %cst_15 = arith.constant dense<2147483647> : vector<4xi32>
    %62 = vector.multi_reduction <minsi>, %61, %cst_15 [0] : vector<4x4xi32> to vector<4xi32>
    %63 = vector.shape_cast %62 : vector<4xi32> to vector<1x4xi32>
    %64 = vector.extract_strided_slice %16 {offsets = [9, 0], sizes = [3, 4], strides = [1, 1]} : vector<16x4xf32> to vector<3x4xf32>
    %65 = vector.extract_strided_slice %19 {offsets = [9, 0], sizes = [3, 4], strides = [1, 1]} : vector<16x4xi32> to vector<3x4xi32>
    %cst_16 = arith.constant dense<0xFF800000> : vector<4xf32>
    %66 = vector.multi_reduction <maximumf>, %64, %cst_16 [0] : vector<3x4xf32> to vector<4xf32>
    %67 = vector.shape_cast %66 : vector<4xf32> to vector<1x4xf32>
    %68 = vector.broadcast %67 : vector<1x4xf32> to vector<3x4xf32>
    %69 = arith.cmpf oeq, %64, %68 : vector<3x4xf32>
    %70 = vector.shape_cast %0 : vector<1x4xi32> to vector<1x4xi32>
    %71 = vector.broadcast %70 : vector<1x4xi32> to vector<3x4xi32>
    %72 = arith.select %69, %65, %71 : vector<3x4xi1>, vector<3x4xi32>
    %cst_17 = arith.constant dense<2147483647> : vector<4xi32>
    %73 = vector.multi_reduction <minsi>, %72, %cst_17 [0] : vector<3x4xi32> to vector<4xi32>
    %74 = vector.shape_cast %73 : vector<4xi32> to vector<1x4xi32>
    %75 = vector.extract_strided_slice %16 {offsets = [11, 0], sizes = [3, 4], strides = [1, 1]} : vector<16x4xf32> to vector<3x4xf32>
    %76 = vector.extract_strided_slice %19 {offsets = [11, 0], sizes = [3, 4], strides = [1, 1]} : vector<16x4xi32> to vector<3x4xi32>
    %cst_18 = arith.constant dense<0xFF800000> : vector<4xf32>
    %77 = vector.multi_reduction <maximumf>, %75, %cst_18 [0] : vector<3x4xf32> to vector<4xf32>
    %78 = vector.shape_cast %77 : vector<4xf32> to vector<1x4xf32>
    %79 = vector.broadcast %78 : vector<1x4xf32> to vector<3x4xf32>
    %80 = arith.cmpf oeq, %75, %79 : vector<3x4xf32>
    %81 = vector.shape_cast %0 : vector<1x4xi32> to vector<1x4xi32>
    %82 = vector.broadcast %81 : vector<1x4xi32> to vector<3x4xi32>
    %83 = arith.select %80, %76, %82 : vector<3x4xi1>, vector<3x4xi32>
    %cst_19 = arith.constant dense<2147483647> : vector<4xi32>
    %84 = vector.multi_reduction <minsi>, %83, %cst_19 [0] : vector<3x4xi32> to vector<4xi32>
    %85 = vector.shape_cast %84 : vector<4xi32> to vector<1x4xi32>
    %86 = vector.extract_strided_slice %16 {offsets = [13, 0], sizes = [3, 4], strides = [1, 1]} : vector<16x4xf32> to vector<3x4xf32>
    %87 = vector.extract_strided_slice %19 {offsets = [13, 0], sizes = [3, 4], strides = [1, 1]} : vector<16x4xi32> to vector<3x4xi32>
    %cst_20 = arith.constant dense<0xFF800000> : vector<4xf32>
    %88 = vector.multi_reduction <maximumf>, %86, %cst_20 [0] : vector<3x4xf32> to vector<4xf32>
    %89 = vector.shape_cast %88 : vector<4xf32> to vector<1x4xf32>
    %90 = vector.broadcast %89 : vector<1x4xf32> to vector<3x4xf32>
    %91 = arith.cmpf oeq, %86, %90 : vector<3x4xf32>
    %92 = vector.shape_cast %0 : vector<1x4xi32> to vector<1x4xi32>
    %93 = vector.broadcast %92 : vector<1x4xi32> to vector<3x4xi32>
    %94 = arith.select %91, %87, %93 : vector<3x4xi1>, vector<3x4xi32>
    %cst_21 = arith.constant dense<2147483647> : vector<4xi32>
    %95 = vector.multi_reduction <minsi>, %94, %cst_21 [0] : vector<3x4xi32> to vector<4xi32>
    %96 = vector.shape_cast %95 : vector<4xi32> to vector<1x4xi32>
    %97 = tpu.concatenate %23, %34, %45, %56, %67, %78, %89 in 0 : vector<1x4xf32>, vector<1x4xf32>, vector<1x4xf32>, vector<1x4xf32>, vector<1x4xf32>, vector<1x4xf32>, vector<1x4xf32> -> vector<7x4xf32>
    %c0_22 = arith.constant 0 : index
    %c0_23 = arith.constant 0 : index
    %c0_24 = arith.constant 0 : index
    %c0_25 = arith.constant 0 : index
    %98 = vector.load %arg3[%c0_22, %c0_23, %c0_24, %c0_25] : memref<1x7x7x4xf32, #tpu.memory_space<vmem>>, vector<1x1x7x4xf32>
    %99 = vector.shape_cast %98 : vector<1x1x7x4xf32> to vector<7x4xf32>
    %100 = vector.shape_cast %97 : vector<7x4xf32> to vector<1x1x7x4xf32>
    tpu.vector_store %arg3[%c0_22, %c0_23, %c0_24, %c0_25], %100 {strides = array<i32>} : memref<1x7x7x4xf32, #tpu.memory_space<vmem>>, vector<1x1x7x4xf32>,
    %101 = tpu.concatenate %30, %41, %52, %63, %74, %85, %96 in 0 : vector<1x4xi32>, vector<1x4xi32>, vector<1x4xi32>, vector<1x4xi32>, vector<1x4xi32>, vector<1x4xi32>, vector<1x4xi32> -> vector<7x4xi32>
    %c0_26 = arith.constant 0 : index
    %c0_27 = arith.constant 0 : index
    %c0_28 = arith.constant 0 : index
    %c0_29 = arith.constant 0 : index
    %102 = vector.load %arg4[%c0_26, %c0_27, %c0_28, %c0_29] : memref<1x7x7x4xi32, #tpu.memory_space<vmem>>, vector<1x1x7x4xi32>
    %103 = vector.shape_cast %102 : vector<1x1x7x4xi32> to vector<7x4xi32>
    %104 = vector.shape_cast %101 : vector<7x4xi32> to vector<1x1x7x4xi32>
    tpu.vector_store %arg4[%c0_26, %c0_27, %c0_28, %c0_29], %104 {strides = array<i32>} : memref<1x7x7x4xi32, #tpu.memory_space<vmem>>, vector<1x1x7x4xi32>,
    %c0_30 = arith.constant 0 : index
    %c2_31 = arith.constant 2 : index
    %c0_32 = arith.constant 0 : index
    %c0_33 = arith.constant 0 : index
    %105 = vector.load %arg2[%c0_30, %c2_31, %c0_32, %c0_33] : memref<1x16x16x4xf32, #tpu.memory_space<vmem>>, vector<1x1x16x4xf32>
    %106 = vector.shape_cast %105 : vector<1x1x16x4xf32> to vector<16x4xf32>
    %c32_i32_34 = arith.constant 32 : i32
    %107 = vector.broadcast %c32_i32_34 : i32 to vector<16x4xi32>
    %108 = arith.addi %1, %107 : vector<16x4xi32>
    %c0_35 = arith.constant 0 : index
    %c3 = arith.constant 3 : index
    %c0_36 = arith.constant 0 : index
    %c0_37 = arith.constant 0 : index
    %109 = vector.load %arg2[%c0_35, %c3, %c0_36, %c0_37] : memref<1x16x16x4xf32, #tpu.memory_space<vmem>>, vector<1x1x16x4xf32>
    %110 = vector.shape_cast %109 : vector<1x1x16x4xf32> to vector<16x4xf32>
    %111 = arith.cmpf ogt, %110, %106 : vector<16x4xf32>
    %112 = arith.select %111, %110, %106 : vector<16x4xi1>, vector<16x4xf32>
    %c48_i32 = arith.constant 48 : i32
    %113 = vector.broadcast %c48_i32 : i32 to vector<16x4xi32>
    %114 = arith.addi %1, %113 : vector<16x4xi32>
    %115 = arith.select %111, %114, %108 : vector<16x4xi1>, vector<16x4xi32>
    %c0_38 = arith.constant 0 : index
    %c4 = arith.constant 4 : index
    %c0_39 = arith.constant 0 : index
    %c0_40 = arith.constant 0 : index
    %116 = vector.load %arg2[%c0_38, %c4, %c0_39, %c0_40] : memref<1x16x16x4xf32, #tpu.memory_space<vmem>>, vector<1x1x16x4xf32>
    %117 = vector.shape_cast %116 : vector<1x1x16x4xf32> to vector<16x4xf32>
    %118 = arith.cmpf ogt, %117, %112 : vector<16x4xf32>
    %119 = arith.select %118, %117, %112 : vector<16x4xi1>, vector<16x4xf32>
    %c64_i32 = arith.constant 64 : i32
    %120 = vector.broadcast %c64_i32 : i32 to vector<16x4xi32>
    %121 = arith.addi %1, %120 : vector<16x4xi32>
    %122 = arith.select %118, %121, %115 : vector<16x4xi1>, vector<16x4xi32>
    %123 = vector.extract_strided_slice %119 {offsets = [0, 0], sizes = [3, 4], strides = [1, 1]} : vector<16x4xf32> to vector<3x4xf32>
    %124 = vector.extract_strided_slice %122 {offsets = [0, 0], sizes = [3, 4], strides = [1, 1]} : vector<16x4xi32> to vector<3x4xi32>
    %cst_41 = arith.constant dense<0xFF800000> : vector<4xf32>
    %125 = vector.multi_reduction <maximumf>, %123, %cst_41 [0] : vector<3x4xf32> to vector<4xf32>
    %126 = vector.shape_cast %125 : vector<4xf32> to vector<1x4xf32>
    %127 = vector.broadcast %126 : vector<1x4xf32> to vector<3x4xf32>
    %128 = arith.cmpf oeq, %123, %127 : vector<3x4xf32>
    %129 = vector.shape_cast %0 : vector<1x4xi32> to vector<1x4xi32>
    %130 = vector.broadcast %129 : vector<1x4xi32> to vector<3x4xi32>
    %131 = arith.select %128, %124, %130 : vector<3x4xi1>, vector<3x4xi32>
    %cst_42 = arith.constant dense<2147483647> : vector<4xi32>
    %132 = vector.multi_reduction <minsi>, %131, %cst_42 [0] : vector<3x4xi32> to vector<4xi32>
    %133 = vector.shape_cast %132 : vector<4xi32> to vector<1x4xi32>
    %134 = vector.extract_strided_slice %119 {offsets = [2, 0], sizes = [3, 4], strides = [1, 1]} : vector<16x4xf32> to vector<3x4xf32>
    %135 = vector.extract_strided_slice %122 {offsets = [2, 0], sizes = [3, 4], strides = [1, 1]} : vector<16x4xi32> to vector<3x4xi32>
    %cst_43 = arith.constant dense<0xFF800000> : vector<4xf32>
    %136 = vector.multi_reduction <maximumf>, %134, %cst_43 [0] : vector<3x4xf32> to vector<4xf32>
    %137 = vector.shape_cast %136 : vector<4xf32> to vector<1x4xf32>
    %138 = vector.broadcast %137 : vector<1x4xf32> to vector<3x4xf32>
    %139 = arith.cmpf oeq, %134, %138 : vector<3x4xf32>
    %140 = vector.shape_cast %0 : vector<1x4xi32> to vector<1x4xi32>
    %141 = vector.broadcast %140 : vector<1x4xi32> to vector<3x4xi32>
    %142 = arith.select %139, %135, %141 : vector<3x4xi1>, vector<3x4xi32>
    %cst_44 = arith.constant dense<2147483647> : vector<4xi32>
    %143 = vector.multi_reduction <minsi>, %142, %cst_44 [0] : vector<3x4xi32> to vector<4xi32>
    %144 = vector.shape_cast %143 : vector<4xi32> to vector<1x4xi32>
    %145 = vector.extract_strided_slice %119 {offsets = [4, 0], sizes = [3, 4], strides = [1, 1]} : vector<16x4xf32> to vector<3x4xf32>
    %146 = vector.extract_strided_slice %122 {offsets = [4, 0], sizes = [3, 4], strides = [1, 1]} : vector<16x4xi32> to vector<3x4xi32>
    %cst_45 = arith.constant dense<0xFF800000> : vector<4xf32>
    %147 = vector.multi_reduction <maximumf>, %145, %cst_45 [0] : vector<3x4xf32> to vector<4xf32>
    %148 = vector.shape_cast %147 : vector<4xf32> to vector<1x4xf32>
    %149 = vector.broadcast %148 : vector<1x4xf32> to vector<3x4xf32>
    %150 = arith.cmpf oeq, %145, %149 : vector<3x4xf32>
    %151 = vector.shape_cast %0 : vector<1x4xi32> to vector<1x4xi32>
    %152 = vector.broadcast %151 : vector<1x4xi32> to vector<3x4xi32>
    %153 = arith.select %150, %146, %152 : vector<3x4xi1>, vector<3x4xi32>
    %cst_46 = arith.constant dense<2147483647> : vector<4xi32>
    %154 = vector.multi_reduction <minsi>, %153, %cst_46 [0] : vector<3x4xi32> to vector<4xi32>
    %155 = vector.shape_cast %154 : vector<4xi32> to vector<1x4xi32>
    %156 = vector.extract_strided_slice %119 {offsets = [6, 0], sizes = [4, 4], strides = [1, 1]} : vector<16x4xf32> to vector<4x4xf32>
    %157 = vector.extract_strided_slice %122 {offsets = [6, 0], sizes = [4, 4], strides = [1, 1]} : vector<16x4xi32> to vector<4x4xi32>
    %cst_47 = arith.constant dense<0xFF800000> : vector<4xf32>
    %158 = vector.multi_reduction <maximumf>, %156, %cst_47 [0] : vector<4x4xf32> to vector<4xf32>
    %159 = vector.shape_cast %158 : vector<4xf32> to vector<1x4xf32>
    %160 = vector.broadcast %159 : vector<1x4xf32> to vector<4x4xf32>
    %161 = arith.cmpf oeq, %156, %160 : vector<4x4xf32>
    %162 = vector.shape_cast %0 : vector<1x4xi32> to vector<1x4xi32>
    %163 = vector.broadcast %162 : vector<1x4xi32> to vector<4x4xi32>
    %164 = arith.select %161, %157, %163 : vector<4x4xi1>, vector<4x4xi32>
    %cst_48 = arith.constant dense<2147483647> : vector<4xi32>
    %165 = vector.multi_reduction <minsi>, %164, %cst_48 [0] : vector<4x4xi32> to vector<4xi32>
    %166 = vector.shape_cast %165 : vector<4xi32> to vector<1x4xi32>
    %167 = vector.extract_strided_slice %119 {offsets = [9, 0], sizes = [3, 4], strides = [1, 1]} : vector<16x4xf32> to vector<3x4xf32>
    %168 = vector.extract_strided_slice %122 {offsets = [9, 0], sizes = [3, 4], strides = [1, 1]} : vector<16x4xi32> to vector<3x4xi32>
    %cst_49 = arith.constant dense<0xFF800000> : vector<4xf32>
    %169 = vector.multi_reduction <maximumf>, %167, %cst_49 [0] : vector<3x4xf32> to vector<4xf32>
    %170 = vector.shape_cast %169 : vector<4xf32> to vector<1x4xf32>
    %171 = vector.broadcast %170 : vector<1x4xf32> to vector<3x4xf32>
    %172 = arith.cmpf oeq, %167, %171 : vector<3x4xf32>
    %173 = vector.shape_cast %0 : vector<1x4xi32> to vector<1x4xi32>
    %174 = vector.broadcast %173 : vector<1x4xi32> to vector<3x4xi32>
    %175 = arith.select %172, %168, %174 : vector<3x4xi1>, vector<3x4xi32>
    %cst_50 = arith.constant dense<2147483647> : vector<4xi32>
    %176 = vector.multi_reduction <minsi>, %175, %cst_50 [0] : vector<3x4xi32> to vector<4xi32>
    %177 = vector.shape_cast %176 : vector<4xi32> to vector<1x4xi32>
    %178 = vector.extract_strided_slice %119 {offsets = [11, 0], sizes = [3, 4], strides = [1, 1]} : vector<16x4xf32> to vector<3x4xf32>
    %179 = vector.extract_strided_slice %122 {offsets = [11, 0], sizes = [3, 4], strides = [1, 1]} : vector<16x4xi32> to vector<3x4xi32>
    %cst_51 = arith.constant dense<0xFF800000> : vector<4xf32>
    %180 = vector.multi_reduction <maximumf>, %178, %cst_51 [0] : vector<3x4xf32> to vector<4xf32>
    %181 = vector.shape_cast %180 : vector<4xf32> to vector<1x4xf32>
    %182 = vector.broadcast %181 : vector<1x4xf32> to vector<3x4xf32>
    %183 = arith.cmpf oeq, %178, %182 : vector<3x4xf32>
    %184 = vector.shape_cast %0 : vector<1x4xi32> to vector<1x4xi32>
    %185 = vector.broadcast %184 : vector<1x4xi32> to vector<3x4xi32>
    %186 = arith.select %183, %179, %185 : vector<3x4xi1>, vector<3x4xi32>
    %cst_52 = arith.constant dense<2147483647> : vector<4xi32>
    %187 = vector.multi_reduction <minsi>, %186, %cst_52 [0] : vector<3x4xi32> to vector<4xi32>
    %188 = vector.shape_cast %187 : vector<4xi32> to vector<1x4xi32>
    %189 = vector.extract_strided_slice %119 {offsets = [13, 0], sizes = [3, 4], strides = [1, 1]} : vector<16x4xf32> to vector<3x4xf32>
    %190 = vector.extract_strided_slice %122 {offsets = [13, 0], sizes = [3, 4], strides = [1, 1]} : vector<16x4xi32> to vector<3x4xi32>
    %cst_53 = arith.constant dense<0xFF800000> : vector<4xf32>
    %191 = vector.multi_reduction <maximumf>, %189, %cst_53 [0] : vector<3x4xf32> to vector<4xf32>
    %192 = vector.shape_cast %191 : vector<4xf32> to vector<1x4xf32>
    %193 = vector.broadcast %192 : vector<1x4xf32> to vector<3x4xf32>
    %194 = arith.cmpf oeq, %189, %193 : vector<3x4xf32>
    %195 = vector.shape_cast %0 : vector<1x4xi32> to vector<1x4xi32>
    %196 = vector.broadcast %195 : vector<1x4xi32> to vector<3x4xi32>
    %197 = arith.select %194, %190, %196 : vector<3x4xi1>, vector<3x4xi32>
    %cst_54 = arith.constant dense<2147483647> : vector<4xi32>
    %198 = vector.multi_reduction <minsi>, %197, %cst_54 [0] : vector<3x4xi32> to vector<4xi32>
    %199 = vector.shape_cast %198 : vector<4xi32> to vector<1x4xi32>
    %200 = tpu.concatenate %126, %137, %148, %159, %170, %181, %192 in 0 : vector<1x4xf32>, vector<1x4xf32>, vector<1x4xf32>, vector<1x4xf32>, vector<1x4xf32>, vector<1x4xf32>, vector<1x4xf32> -> vector<7x4xf32>
    %c0_55 = arith.constant 0 : index
    %c1_56 = arith.constant 1 : index
    %c0_57 = arith.constant 0 : index
    %c0_58 = arith.constant 0 : index
    %201 = vector.load %arg3[%c0_55, %c1_56, %c0_57, %c0_58] : memref<1x7x7x4xf32, #tpu.memory_space<vmem>>, vector<1x1x7x4xf32>
    %202 = vector.shape_cast %201 : vector<1x1x7x4xf32> to vector<7x4xf32>
    %203 = vector.shape_cast %200 : vector<7x4xf32> to vector<1x1x7x4xf32>
    tpu.vector_store %arg3[%c0_55, %c1_56, %c0_57, %c0_58], %203 {strides = array<i32>} : memref<1x7x7x4xf32, #tpu.memory_space<vmem>>, vector<1x1x7x4xf32>,
    %204 = tpu.concatenate %133, %144, %155, %166, %177, %188, %199 in 0 : vector<1x4xi32>, vector<1x4xi32>, vector<1x4xi32>, vector<1x4xi32>, vector<1x4xi32>, vector<1x4xi32>, vector<1x4xi32> -> vector<7x4xi32>
    %c0_59 = arith.constant 0 : index
    %c1_60 = arith.constant 1 : index
    %c0_61 = arith.constant 0 : index
    %c0_62 = arith.constant 0 : index
    %205 = vector.load %arg4[%c0_59, %c1_60, %c0_61, %c0_62] : memref<1x7x7x4xi32, #tpu.memory_space<vmem>>, vector<1x1x7x4xi32>
    %206 = vector.shape_cast %205 : vector<1x1x7x4xi32> to vector<7x4xi32>
    %207 = vector.shape_cast %204 : vector<7x4xi32> to vector<1x1x7x4xi32>
    tpu.vector_store %arg4[%c0_59, %c1_60, %c0_61, %c0_62], %207 {strides = array<i32>} : memref<1x7x7x4xi32, #tpu.memory_space<vmem>>, vector<1x1x7x4xi32>,
    %c0_63 = arith.constant 0 : index
    %c4_64 = arith.constant 4 : index
    %c0_65 = arith.constant 0 : index
    %c0_66 = arith.constant 0 : index
    %208 = vector.load %arg2[%c0_63, %c4_64, %c0_65, %c0_66] : memref<1x16x16x4xf32, #tpu.memory_space<vmem>>, vector<1x1x16x4xf32>
    %209 = vector.shape_cast %208 : vector<1x1x16x4xf32> to vector<16x4xf32>
    %c64_i32_67 = arith.constant 64 : i32
    %210 = vector.broadcast %c64_i32_67 : i32 to vector<16x4xi32>
    %211 = arith.addi %1, %210 : vector<16x4xi32>
    %c0_68 = arith.constant 0 : index
    %c5 = arith.constant 5 : index
    %c0_69 = arith.constant 0 : index
    %c0_70 = arith.constant 0 : index
    %212 = vector.load %arg2[%c0_68, %c5, %c0_69, %c0_70] : memref<1x16x16x4xf32, #tpu.memory_space<vmem>>, vector<1x1x16x4xf32>
    %213 = vector.shape_cast %212 : vector<1x1x16x4xf32> to vector<16x4xf32>
    %214 = arith.cmpf ogt, %213, %209 : vector<16x4xf32>
    %215 = arith.select %214, %213, %209 : vector<16x4xi1>, vector<16x4xf32>
    %c80_i32 = arith.constant 80 : i32
    %216 = vector.broadcast %c80_i32 : i32 to vector<16x4xi32>
    %217 = arith.addi %1, %216 : vector<16x4xi32>
    %218 = arith.select %214, %217, %211 : vector<16x4xi1>, vector<16x4xi32>
    %c0_71 = arith.constant 0 : index
    %c6 = arith.constant 6 : index
    %c0_72 = arith.constant 0 : index
    %c0_73 = arith.constant 0 : index
    %219 = vector.load %arg2[%c0_71, %c6, %c0_72, %c0_73] : memref<1x16x16x4xf32, #tpu.memory_space<vmem>>, vector<1x1x16x4xf32>
    %220 = vector.shape_cast %219 : vector<1x1x16x4xf32> to vector<16x4xf32>
    %221 = arith.cmpf ogt, %220, %215 : vector<16x4xf32>
    %222 = arith.select %221, %220, %215 : vector<16x4xi1>, vector<16x4xf32>
    %c96_i32 = arith.constant 96 : i32
    %223 = vector.broadcast %c96_i32 : i32 to vector<16x4xi32>
    %224 = arith.addi %1, %223 : vector<16x4xi32>
    %225 = arith.select %221, %224, %218 : vector<16x4xi1>, vector<16x4xi32>
    %226 = vector.extract_strided_slice %222 {offsets = [0, 0], sizes = [3, 4], strides = [1, 1]} : vector<16x4xf32> to vector<3x4xf32>
    %227 = vector.extract_strided_slice %225 {offsets = [0, 0], sizes = [3, 4], strides = [1, 1]} : vector<16x4xi32> to vector<3x4xi32>
    %cst_74 = arith.constant dense<0xFF800000> : vector<4xf32>
    %228 = vector.multi_reduction <maximumf>, %226, %cst_74 [0] : vector<3x4xf32> to vector<4xf32>
    %229 = vector.shape_cast %228 : vector<4xf32> to vector<1x4xf32>
    %230 = vector.broadcast %229 : vector<1x4xf32> to vector<3x4xf32>
    %231 = arith.cmpf oeq, %226, %230 : vector<3x4xf32>
    %232 = vector.shape_cast %0 : vector<1x4xi32> to vector<1x4xi32>
    %233 = vector.broadcast %232 : vector<1x4xi32> to vector<3x4xi32>
    %234 = arith.select %231, %227, %233 : vector<3x4xi1>, vector<3x4xi32>
    %cst_75 = arith.constant dense<2147483647> : vector<4xi32>
    %235 = vector.multi_reduction <minsi>, %234, %cst_75 [0] : vector<3x4xi32> to vector<4xi32>
    %236 = vector.shape_cast %235 : vector<4xi32> to vector<1x4xi32>
    %237 = vector.extract_strided_slice %222 {offsets = [2, 0], sizes = [3, 4], strides = [1, 1]} : vector<16x4xf32> to vector<3x4xf32>
    %238 = vector.extract_strided_slice %225 {offsets = [2, 0], sizes = [3, 4], strides = [1, 1]} : vector<16x4xi32> to vector<3x4xi32>
    %cst_76 = arith.constant dense<0xFF800000> : vector<4xf32>
    %239 = vector.multi_reduction <maximumf>, %237, %cst_76 [0] : vector<3x4xf32> to vector<4xf32>
    %240 = vector.shape_cast %239 : vector<4xf32> to vector<1x4xf32>
    %241 = vector.broadcast %240 : vector<1x4xf32> to vector<3x4xf32>
    %242 = arith.cmpf oeq, %237, %241 : vector<3x4xf32>
    %243 = vector.shape_cast %0 : vector<1x4xi32> to vector<1x4xi32>
    %244 = vector.broadcast %243 : vector<1x4xi32> to vector<3x4xi32>
    %245 = arith.select %242, %238, %244 : vector<3x4xi1>, vector<3x4xi32>
    %cst_77 = arith.constant dense<2147483647> : vector<4xi32>
    %246 = vector.multi_reduction <minsi>, %245, %cst_77 [0] : vector<3x4xi32> to vector<4xi32>
    %247 = vector.shape_cast %246 : vector<4xi32> to vector<1x4xi32>
    %248 = vector.extract_strided_slice %222 {offsets = [4, 0], sizes = [3, 4], strides = [1, 1]} : vector<16x4xf32> to vector<3x4xf32>
    %249 = vector.extract_strided_slice %225 {offsets = [4, 0], sizes = [3, 4], strides = [1, 1]} : vector<16x4xi32> to vector<3x4xi32>
    %cst_78 = arith.constant dense<0xFF800000> : vector<4xf32>
    %250 = vector.multi_reduction <maximumf>, %248, %cst_78 [0] : vector<3x4xf32> to vector<4xf32>
    %251 = vector.shape_cast %250 : vector<4xf32> to vector<1x4xf32>
    %252 = vector.broadcast %251 : vector<1x4xf32> to vector<3x4xf32>
    %253 = arith.cmpf oeq, %248, %252 : vector<3x4xf32>
    %254 = vector.shape_cast %0 : vector<1x4xi32> to vector<1x4xi32>
    %255 = vector.broadcast %254 : vector<1x4xi32> to vector<3x4xi32>
    %256 = arith.select %253, %249, %255 : vector<3x4xi1>, vector<3x4xi32>
    %cst_79 = arith.constant dense<2147483647> : vector<4xi32>
    %257 = vector.multi_reduction <minsi>, %256, %cst_79 [0] : vector<3x4xi32> to vector<4xi32>
    %258 = vector.shape_cast %257 : vector<4xi32> to vector<1x4xi32>
    %259 = vector.extract_strided_slice %222 {offsets = [6, 0], sizes = [4, 4], strides = [1, 1]} : vector<16x4xf32> to vector<4x4xf32>
    %260 = vector.extract_strided_slice %225 {offsets = [6, 0], sizes = [4, 4], strides = [1, 1]} : vector<16x4xi32> to vector<4x4xi32>
    %cst_80 = arith.constant dense<0xFF800000> : vector<4xf32>
    %261 = vector.multi_reduction <maximumf>, %259, %cst_80 [0] : vector<4x4xf32> to vector<4xf32>
    %262 = vector.shape_cast %261 : vector<4xf32> to vector<1x4xf32>
    %263 = vector.broadcast %262 : vector<1x4xf32> to vector<4x4xf32>
    %264 = arith.cmpf oeq, %259, %263 : vector<4x4xf32>
    %265 = vector.shape_cast %0 : vector<1x4xi32> to vector<1x4xi32>
    %266 = vector.broadcast %265 : vector<1x4xi32> to vector<4x4xi32>
    %267 = arith.select %264, %260, %266 : vector<4x4xi1>, vector<4x4xi32>
    %cst_81 = arith.constant dense<2147483647> : vector<4xi32>
    %268 = vector.multi_reduction <minsi>, %267, %cst_81 [0] : vector<4x4xi32> to vector<4xi32>
    %269 = vector.shape_cast %268 : vector<4xi32> to vector<1x4xi32>
    %270 = vector.extract_strided_slice %222 {offsets = [9, 0], sizes = [3, 4], strides = [1, 1]} : vector<16x4xf32> to vector<3x4xf32>
    %271 = vector.extract_strided_slice %225 {offsets = [9, 0], sizes = [3, 4], strides = [1, 1]} : vector<16x4xi32> to vector<3x4xi32>
    %cst_82 = arith.constant dense<0xFF800000> : vector<4xf32>
    %272 = vector.multi_reduction <maximumf>, %270, %cst_82 [0] : vector<3x4xf32> to vector<4xf32>
    %273 = vector.shape_cast %272 : vector<4xf32> to vector<1x4xf32>
    %274 = vector.broadcast %273 : vector<1x4xf32> to vector<3x4xf32>
    %275 = arith.cmpf oeq, %270, %274 : vector<3x4xf32>
    %276 = vector.shape_cast %0 : vector<1x4xi32> to vector<1x4xi32>
    %277 = vector.broadcast %276 : vector<1x4xi32> to vector<3x4xi32>
    %278 = arith.select %275, %271, %277 : vector<3x4xi1>, vector<3x4xi32>
    %cst_83 = arith.constant dense<2147483647> : vector<4xi32>
    %279 = vector.multi_reduction <minsi>, %278, %cst_83 [0] : vector<3x4xi32> to vector<4xi32>
    %280 = vector.shape_cast %279 : vector<4xi32> to vector<1x4xi32>
    %281 = vector.extract_strided_slice %222 {offsets = [11, 0], sizes = [3, 4], strides = [1, 1]} : vector<16x4xf32> to vector<3x4xf32>
    %282 = vector.extract_strided_slice %225 {offsets = [11, 0], sizes = [3, 4], strides = [1, 1]} : vector<16x4xi32> to vector<3x4xi32>
    %cst_84 = arith.constant dense<0xFF800000> : vector<4xf32>
    %283 = vector.multi_reduction <maximumf>, %281, %cst_84 [0] : vector<3x4xf32> to vector<4xf32>
    %284 = vector.shape_cast %283 : vector<4xf32> to vector<1x4xf32>
    %285 = vector.broadcast %284 : vector<1x4xf32> to vector<3x4xf32>
    %286 = arith.cmpf oeq, %281, %285 : vector<3x4xf32>
    %287 = vector.shape_cast %0 : vector<1x4xi32> to vector<1x4xi32>
    %288 = vector.broadcast %287 : vector<1x4xi32> to vector<3x4xi32>
    %289 = arith.select %286, %282, %288 : vector<3x4xi1>, vector<3x4xi32>
    %cst_85 = arith.constant dense<2147483647> : vector<4xi32>
    %290 = vector.multi_reduction <minsi>, %289, %cst_85 [0] : vector<3x4xi32> to vector<4xi32>
    %291 = vector.shape_cast %290 : vector<4xi32> to vector<1x4xi32>
    %292 = vector.extract_strided_slice %222 {offsets = [13, 0], sizes = [3, 4], strides = [1, 1]} : vector<16x4xf32> to vector<3x4xf32>
    %293 = vector.extract_strided_slice %225 {offsets = [13, 0], sizes = [3, 4], strides = [1, 1]} : vector<16x4xi32> to vector<3x4xi32>
    %cst_86 = arith.constant dense<0xFF800000> : vector<4xf32>
    %294 = vector.multi_reduction <maximumf>, %292, %cst_86 [0] : vector<3x4xf32> to vector<4xf32>
    %295 = vector.shape_cast %294 : vector<4xf32> to vector<1x4xf32>
    %296 = vector.broadcast %295 : vector<1x4xf32> to vector<3x4xf32>
    %297 = arith.cmpf oeq, %292, %296 : vector<3x4xf32>
    %298 = vector.shape_cast %0 : vector<1x4xi32> to vector<1x4xi32>
    %299 = vector.broadcast %298 : vector<1x4xi32> to vector<3x4xi32>
    %300 = arith.select %297, %293, %299 : vector<3x4xi1>, vector<3x4xi32>
    %cst_87 = arith.constant dense<2147483647> : vector<4xi32>
    %301 = vector.multi_reduction <minsi>, %300, %cst_87 [0] : vector<3x4xi32> to vector<4xi32>
    %302 = vector.shape_cast %301 : vector<4xi32> to vector<1x4xi32>
    %303 = tpu.concatenate %229, %240, %251, %262, %273, %284, %295 in 0 : vector<1x4xf32>, vector<1x4xf32>, vector<1x4xf32>, vector<1x4xf32>, vector<1x4xf32>, vector<1x4xf32>, vector<1x4xf32> -> vector<7x4xf32>
    %c0_88 = arith.constant 0 : index
    %c2_89 = arith.constant 2 : index
    %c0_90 = arith.constant 0 : index
    %c0_91 = arith.constant 0 : index
    %304 = vector.load %arg3[%c0_88, %c2_89, %c0_90, %c0_91] : memref<1x7x7x4xf32, #tpu.memory_space<vmem>>, vector<1x1x7x4xf32>
    %305 = vector.shape_cast %304 : vector<1x1x7x4xf32> to vector<7x4xf32>
    %306 = vector.shape_cast %303 : vector<7x4xf32> to vector<1x1x7x4xf32>
    tpu.vector_store %arg3[%c0_88, %c2_89, %c0_90, %c0_91], %306 {strides = array<i32>} : memref<1x7x7x4xf32, #tpu.memory_space<vmem>>, vector<1x1x7x4xf32>,
    %307 = tpu.concatenate %236, %247, %258, %269, %280, %291, %302 in 0 : vector<1x4xi32>, vector<1x4xi32>, vector<1x4xi32>, vector<1x4xi32>, vector<1x4xi32>, vector<1x4xi32>, vector<1x4xi32> -> vector<7x4xi32>
    %c0_92 = arith.constant 0 : index
    %c2_93 = arith.constant 2 : index
    %c0_94 = arith.constant 0 : index
    %c0_95 = arith.constant 0 : index
    %308 = vector.load %arg4[%c0_92, %c2_93, %c0_94, %c0_95] : memref<1x7x7x4xi32, #tpu.memory_space<vmem>>, vector<1x1x7x4xi32>
    %309 = vector.shape_cast %308 : vector<1x1x7x4xi32> to vector<7x4xi32>
    %310 = vector.shape_cast %307 : vector<7x4xi32> to vector<1x1x7x4xi32>
    tpu.vector_store %arg4[%c0_92, %c2_93, %c0_94, %c0_95], %310 {strides = array<i32>} : memref<1x7x7x4xi32, #tpu.memory_space<vmem>>, vector<1x1x7x4xi32>,
    %c0_96 = arith.constant 0 : index
    %c6_97 = arith.constant 6 : index
    %c0_98 = arith.constant 0 : index
    %c0_99 = arith.constant 0 : index
    %311 = vector.load %arg2[%c0_96, %c6_97, %c0_98, %c0_99] : memref<1x16x16x4xf32, #tpu.memory_space<vmem>>, vector<1x1x16x4xf32>
    %312 = vector.shape_cast %311 : vector<1x1x16x4xf32> to vector<16x4xf32>
    %c96_i32_100 = arith.constant 96 : i32
    %313 = vector.broadcast %c96_i32_100 : i32 to vector<16x4xi32>
    %314 = arith.addi %1, %313 : vector<16x4xi32>
    %c0_101 = arith.constant 0 : index
    %c7 = arith.constant 7 : index
    %c0_102 = arith.constant 0 : index
    %c0_103 = arith.constant 0 : index
    %315 = vector.load %arg2[%c0_101, %c7, %c0_102, %c0_103] : memref<1x16x16x4xf32, #tpu.memory_space<vmem>>, vector<1x1x16x4xf32>
    %316 = vector.shape_cast %315 : vector<1x1x16x4xf32> to vector<16x4xf32>
    %317 = arith.cmpf ogt, %316, %312 : vector<16x4xf32>
    %318 = arith.select %317, %316, %312 : vector<16x4xi1>, vector<16x4xf32>
    %c112_i32 = arith.constant 112 : i32
    %319 = vector.broadcast %c112_i32 : i32 to vector<16x4xi32>
    %320 = arith.addi %1, %319 : vector<16x4xi32>
    %321 = arith.select %317, %320, %314 : vector<16x4xi1>, vector<16x4xi32>
    %c0_104 = arith.constant 0 : index
    %c8 = arith.constant 8 : index
    %c0_105 = arith.constant 0 : index
    %c0_106 = arith.constant 0 : index
    %322 = vector.load %arg2[%c0_104, %c8, %c0_105, %c0_106] : memref<1x16x16x4xf32, #tpu.memory_space<vmem>>, vector<1x1x16x4xf32>
    %323 = vector.shape_cast %322 : vector<1x1x16x4xf32> to vector<16x4xf32>
    %324 = arith.cmpf ogt, %323, %318 : vector<16x4xf32>
    %325 = arith.select %324, %323, %318 : vector<16x4xi1>, vector<16x4xf32>
    %c128_i32 = arith.constant 128 : i32
    %326 = vector.broadcast %c128_i32 : i32 to vector<16x4xi32>
    %327 = arith.addi %1, %326 : vector<16x4xi32>
    %328 = arith.select %324, %327, %321 : vector<16x4xi1>, vector<16x4xi32>
    %c0_107 = arith.constant 0 : index
    %c9 = arith.constant 9 : index
    %c0_108 = arith.constant 0 : index
    %c0_109 = arith.constant 0 : index
    %329 = vector.load %arg2[%c0_107, %c9, %c0_108, %c0_109] : memref<1x16x16x4xf32, #tpu.memory_space<vmem>>, vector<1x1x16x4xf32>
    %330 = vector.shape_cast %329 : vector<1x1x16x4xf32> to vector<16x4xf32>
    %331 = arith.cmpf ogt, %330, %325 : vector<16x4xf32>
    %332 = arith.select %331, %330, %325 : vector<16x4xi1>, vector<16x4xf32>
    %c144_i32 = arith.constant 144 : i32
    %333 = vector.broadcast %c144_i32 : i32 to vector<16x4xi32>
    %334 = arith.addi %1, %333 : vector<16x4xi32>
    %335 = arith.select %331, %334, %328 : vector<16x4xi1>, vector<16x4xi32>
    %336 = vector.extract_strided_slice %332 {offsets = [0, 0], sizes = [3, 4], strides = [1, 1]} : vector<16x4xf32> to vector<3x4xf32>
    %337 = vector.extract_strided_slice %335 {offsets = [0, 0], sizes = [3, 4], strides = [1, 1]} : vector<16x4xi32> to vector<3x4xi32>
    %cst_110 = arith.constant dense<0xFF800000> : vector<4xf32>
    %338 = vector.multi_reduction <maximumf>, %336, %cst_110 [0] : vector<3x4xf32> to vector<4xf32>
    %339 = vector.shape_cast %338 : vector<4xf32> to vector<1x4xf32>
    %340 = vector.broadcast %339 : vector<1x4xf32> to vector<3x4xf32>
    %341 = arith.cmpf oeq, %336, %340 : vector<3x4xf32>
    %342 = vector.shape_cast %0 : vector<1x4xi32> to vector<1x4xi32>
    %343 = vector.broadcast %342 : vector<1x4xi32> to vector<3x4xi32>
    %344 = arith.select %341, %337, %343 : vector<3x4xi1>, vector<3x4xi32>
    %cst_111 = arith.constant dense<2147483647> : vector<4xi32>
    %345 = vector.multi_reduction <minsi>, %344, %cst_111 [0] : vector<3x4xi32> to vector<4xi32>
    %346 = vector.shape_cast %345 : vector<4xi32> to vector<1x4xi32>
    %347 = vector.extract_strided_slice %332 {offsets = [2, 0], sizes = [3, 4], strides = [1, 1]} : vector<16x4xf32> to vector<3x4xf32>
    %348 = vector.extract_strided_slice %335 {offsets = [2, 0], sizes = [3, 4], strides = [1, 1]} : vector<16x4xi32> to vector<3x4xi32>
    %cst_112 = arith.constant dense<0xFF800000> : vector<4xf32>
    %349 = vector.multi_reduction <maximumf>, %347, %cst_112 [0] : vector<3x4xf32> to vector<4xf32>
    %350 = vector.shape_cast %349 : vector<4xf32> to vector<1x4xf32>
    %351 = vector.broadcast %350 : vector<1x4xf32> to vector<3x4xf32>
    %352 = arith.cmpf oeq, %347, %351 : vector<3x4xf32>
    %353 = vector.shape_cast %0 : vector<1x4xi32> to vector<1x4xi32>
    %354 = vector.broadcast %353 : vector<1x4xi32> to vector<3x4xi32>
    %355 = arith.select %352, %348, %354 : vector<3x4xi1>, vector<3x4xi32>
    %cst_113 = arith.constant dense<2147483647> : vector<4xi32>
    %356 = vector.multi_reduction <minsi>, %355, %cst_113 [0] : vector<3x4xi32> to vector<4xi32>
    %357 = vector.shape_cast %356 : vector<4xi32> to vector<1x4xi32>
    %358 = vector.extract_strided_slice %332 {offsets = [4, 0], sizes = [3, 4], strides = [1, 1]} : vector<16x4xf32> to vector<3x4xf32>
    %359 = vector.extract_strided_slice %335 {offsets = [4, 0], sizes = [3, 4], strides = [1, 1]} : vector<16x4xi32> to vector<3x4xi32>
    %cst_114 = arith.constant dense<0xFF800000> : vector<4xf32>
    %360 = vector.multi_reduction <maximumf>, %358, %cst_114 [0] : vector<3x4xf32> to vector<4xf32>
    %361 = vector.shape_cast %360 : vector<4xf32> to vector<1x4xf32>
    %362 = vector.broadcast %361 : vector<1x4xf32> to vector<3x4xf32>
    %363 = arith.cmpf oeq, %358, %362 : vector<3x4xf32>
    %364 = vector.shape_cast %0 : vector<1x4xi32> to vector<1x4xi32>
    %365 = vector.broadcast %364 : vector<1x4xi32> to vector<3x4xi32>
    %366 = arith.select %363, %359, %365 : vector<3x4xi1>, vector<3x4xi32>
    %cst_115 = arith.constant dense<2147483647> : vector<4xi32>
    %367 = vector.multi_reduction <minsi>, %366, %cst_115 [0] : vector<3x4xi32> to vector<4xi32>
    %368 = vector.shape_cast %367 : vector<4xi32> to vector<1x4xi32>
    %369 = vector.extract_strided_slice %332 {offsets = [6, 0], sizes = [4, 4], strides = [1, 1]} : vector<16x4xf32> to vector<4x4xf32>
    %370 = vector.extract_strided_slice %335 {offsets = [6, 0], sizes = [4, 4], strides = [1, 1]} : vector<16x4xi32> to vector<4x4xi32>
    %cst_116 = arith.constant dense<0xFF800000> : vector<4xf32>
    %371 = vector.multi_reduction <maximumf>, %369, %cst_116 [0] : vector<4x4xf32> to vector<4xf32>
    %372 = vector.shape_cast %371 : vector<4xf32> to vector<1x4xf32>
    %373 = vector.broadcast %372 : vector<1x4xf32> to vector<4x4xf32>
    %374 = arith.cmpf oeq, %369, %373 : vector<4x4xf32>
    %375 = vector.shape_cast %0 : vector<1x4xi32> to vector<1x4xi32>
    %376 = vector.broadcast %375 : vector<1x4xi32> to vector<4x4xi32>
    %377 = arith.select %374, %370, %376 : vector<4x4xi1>, vector<4x4xi32>
    %cst_117 = arith.constant dense<2147483647> : vector<4xi32>
    %378 = vector.multi_reduction <minsi>, %377, %cst_117 [0] : vector<4x4xi32> to vector<4xi32>
    %379 = vector.shape_cast %378 : vector<4xi32> to vector<1x4xi32>
    %380 = vector.extract_strided_slice %332 {offsets = [9, 0], sizes = [3, 4], strides = [1, 1]} : vector<16x4xf32> to vector<3x4xf32>
    %381 = vector.extract_strided_slice %335 {offsets = [9, 0], sizes = [3, 4], strides = [1, 1]} : vector<16x4xi32> to vector<3x4xi32>
    %cst_118 = arith.constant dense<0xFF800000> : vector<4xf32>
    %382 = vector.multi_reduction <maximumf>, %380, %cst_118 [0] : vector<3x4xf32> to vector<4xf32>
    %383 = vector.shape_cast %382 : vector<4xf32> to vector<1x4xf32>
    %384 = vector.broadcast %383 : vector<1x4xf32> to vector<3x4xf32>
    %385 = arith.cmpf oeq, %380, %384 : vector<3x4xf32>
    %386 = vector.shape_cast %0 : vector<1x4xi32> to vector<1x4xi32>
    %387 = vector.broadcast %386 : vector<1x4xi32> to vector<3x4xi32>
    %388 = arith.select %385, %381, %387 : vector<3x4xi1>, vector<3x4xi32>
    %cst_119 = arith.constant dense<2147483647> : vector<4xi32>
    %389 = vector.multi_reduction <minsi>, %388, %cst_119 [0] : vector<3x4xi32> to vector<4xi32>
    %390 = vector.shape_cast %389 : vector<4xi32> to vector<1x4xi32>
    %391 = vector.extract_strided_slice %332 {offsets = [11, 0], sizes = [3, 4], strides = [1, 1]} : vector<16x4xf32> to vector<3x4xf32>
    %392 = vector.extract_strided_slice %335 {offsets = [11, 0], sizes = [3, 4], strides = [1, 1]} : vector<16x4xi32> to vector<3x4xi32>
    %cst_120 = arith.constant dense<0xFF800000> : vector<4xf32>
    %393 = vector.multi_reduction <maximumf>, %391, %cst_120 [0] : vector<3x4xf32> to vector<4xf32>
    %394 = vector.shape_cast %393 : vector<4xf32> to vector<1x4xf32>
    %395 = vector.broadcast %394 : vector<1x4xf32> to vector<3x4xf32>
    %396 = arith.cmpf oeq, %391, %395 : vector<3x4xf32>
    %397 = vector.shape_cast %0 : vector<1x4xi32> to vector<1x4xi32>
    %398 = vector.broadcast %397 : vector<1x4xi32> to vector<3x4xi32>
    %399 = arith.select %396, %392, %398 : vector<3x4xi1>, vector<3x4xi32>
    %cst_121 = arith.constant dense<2147483647> : vector<4xi32>
    %400 = vector.multi_reduction <minsi>, %399, %cst_121 [0] : vector<3x4xi32> to vector<4xi32>
    %401 = vector.shape_cast %400 : vector<4xi32> to vector<1x4xi32>
    %402 = vector.extract_strided_slice %332 {offsets = [13, 0], sizes = [3, 4], strides = [1, 1]} : vector<16x4xf32> to vector<3x4xf32>
    %403 = vector.extract_strided_slice %335 {offsets = [13, 0], sizes = [3, 4], strides = [1, 1]} : vector<16x4xi32> to vector<3x4xi32>
    %cst_122 = arith.constant dense<0xFF800000> : vector<4xf32>
    %404 = vector.multi_reduction <maximumf>, %402, %cst_122 [0] : vector<3x4xf32> to vector<4xf32>
    %405 = vector.shape_cast %404 : vector<4xf32> to vector<1x4xf32>
    %406 = vector.broadcast %405 : vector<1x4xf32> to vector<3x4xf32>
    %407 = arith.cmpf oeq, %402, %406 : vector<3x4xf32>
    %408 = vector.shape_cast %0 : vector<1x4xi32> to vector<1x4xi32>
    %409 = vector.broadcast %408 : vector<1x4xi32> to vector<3x4xi32>
    %410 = arith.select %407, %403, %409 : vector<3x4xi1>, vector<3x4xi32>
    %cst_123 = arith.constant dense<2147483647> : vector<4xi32>
    %411 = vector.multi_reduction <minsi>, %410, %cst_123 [0] : vector<3x4xi32> to vector<4xi32>
    %412 = vector.shape_cast %411 : vector<4xi32> to vector<1x4xi32>
    %413 = tpu.concatenate %339, %350, %361, %372, %383, %394, %405 in 0 : vector<1x4xf32>, vector<1x4xf32>, vector<1x4xf32>, vector<1x4xf32>, vector<1x4xf32>, vector<1x4xf32>, vector<1x4xf32> -> vector<7x4xf32>
    %c0_124 = arith.constant 0 : index
    %c3_125 = arith.constant 3 : index
    %c0_126 = arith.constant 0 : index
    %c0_127 = arith.constant 0 : index
    %414 = vector.load %arg3[%c0_124, %c3_125, %c0_126, %c0_127] : memref<1x7x7x4xf32, #tpu.memory_space<vmem>>, vector<1x1x7x4xf32>
    %415 = vector.shape_cast %414 : vector<1x1x7x4xf32> to vector<7x4xf32>
    %416 = vector.shape_cast %413 : vector<7x4xf32> to vector<1x1x7x4xf32>
    tpu.vector_store %arg3[%c0_124, %c3_125, %c0_126, %c0_127], %416 {strides = array<i32>} : memref<1x7x7x4xf32, #tpu.memory_space<vmem>>, vector<1x1x7x4xf32>,
    %417 = tpu.concatenate %346, %357, %368, %379, %390, %401, %412 in 0 : vector<1x4xi32>, vector<1x4xi32>, vector<1x4xi32>, vector<1x4xi32>, vector<1x4xi32>, vector<1x4xi32>, vector<1x4xi32> -> vector<7x4xi32>
    %c0_128 = arith.constant 0 : index
    %c3_129 = arith.constant 3 : index
    %c0_130 = arith.constant 0 : index
    %c0_131 = arith.constant 0 : index
    %418 = vector.load %arg4[%c0_128, %c3_129, %c0_130, %c0_131] : memref<1x7x7x4xi32, #tpu.memory_space<vmem>>, vector<1x1x7x4xi32>
    %419 = vector.shape_cast %418 : vector<1x1x7x4xi32> to vector<7x4xi32>
    %420 = vector.shape_cast %417 : vector<7x4xi32> to vector<1x1x7x4xi32>
    tpu.vector_store %arg4[%c0_128, %c3_129, %c0_130, %c0_131], %420 {strides = array<i32>} : memref<1x7x7x4xi32, #tpu.memory_space<vmem>>, vector<1x1x7x4xi32>,
    %c0_132 = arith.constant 0 : index
    %c9_133 = arith.constant 9 : index
    %c0_134 = arith.constant 0 : index
    %c0_135 = arith.constant 0 : index
    %421 = vector.load %arg2[%c0_132, %c9_133, %c0_134, %c0_135] : memref<1x16x16x4xf32, #tpu.memory_space<vmem>>, vector<1x1x16x4xf32>
    %422 = vector.shape_cast %421 : vector<1x1x16x4xf32> to vector<16x4xf32>
    %c144_i32_136 = arith.constant 144 : i32
    %423 = vector.broadcast %c144_i32_136 : i32 to vector<16x4xi32>
    %424 = arith.addi %1, %423 : vector<16x4xi32>
    %c0_137 = arith.constant 0 : index
    %c10 = arith.constant 10 : index
    %c0_138 = arith.constant 0 : index
    %c0_139 = arith.constant 0 : index
    %425 = vector.load %arg2[%c0_137, %c10, %c0_138, %c0_139] : memref<1x16x16x4xf32, #tpu.memory_space<vmem>>, vector<1x1x16x4xf32>
    %426 = vector.shape_cast %425 : vector<1x1x16x4xf32> to vector<16x4xf32>
    %427 = arith.cmpf ogt, %426, %422 : vector<16x4xf32>
    %428 = arith.select %427, %426, %422 : vector<16x4xi1>, vector<16x4xf32>
    %c160_i32 = arith.constant 160 : i32
    %429 = vector.broadcast %c160_i32 : i32 to vector<16x4xi32>
    %430 = arith.addi %1, %429 : vector<16x4xi32>
    %431 = arith.select %427, %430, %424 : vector<16x4xi1>, vector<16x4xi32>
    %c0_140 = arith.constant 0 : index
    %c11 = arith.constant 11 : index
    %c0_141 = arith.constant 0 : index
    %c0_142 = arith.constant 0 : index
    %432 = vector.load %arg2[%c0_140, %c11, %c0_141, %c0_142] : memref<1x16x16x4xf32, #tpu.memory_space<vmem>>, vector<1x1x16x4xf32>
    %433 = vector.shape_cast %432 : vector<1x1x16x4xf32> to vector<16x4xf32>
    %434 = arith.cmpf ogt, %433, %428 : vector<16x4xf32>
    %435 = arith.select %434, %433, %428 : vector<16x4xi1>, vector<16x4xf32>
    %c176_i32 = arith.constant 176 : i32
    %436 = vector.broadcast %c176_i32 : i32 to vector<16x4xi32>
    %437 = arith.addi %1, %436 : vector<16x4xi32>
    %438 = arith.select %434, %437, %431 : vector<16x4xi1>, vector<16x4xi32>
    %439 = vector.extract_strided_slice %435 {offsets = [0, 0], sizes = [3, 4], strides = [1, 1]} : vector<16x4xf32> to vector<3x4xf32>
    %440 = vector.extract_strided_slice %438 {offsets = [0, 0], sizes = [3, 4], strides = [1, 1]} : vector<16x4xi32> to vector<3x4xi32>
    %cst_143 = arith.constant dense<0xFF800000> : vector<4xf32>
    %441 = vector.multi_reduction <maximumf>, %439, %cst_143 [0] : vector<3x4xf32> to vector<4xf32>
    %442 = vector.shape_cast %441 : vector<4xf32> to vector<1x4xf32>
    %443 = vector.broadcast %442 : vector<1x4xf32> to vector<3x4xf32>
    %444 = arith.cmpf oeq, %439, %443 : vector<3x4xf32>
    %445 = vector.shape_cast %0 : vector<1x4xi32> to vector<1x4xi32>
    %446 = vector.broadcast %445 : vector<1x4xi32> to vector<3x4xi32>
    %447 = arith.select %444, %440, %446 : vector<3x4xi1>, vector<3x4xi32>
    %cst_144 = arith.constant dense<2147483647> : vector<4xi32>
    %448 = vector.multi_reduction <minsi>, %447, %cst_144 [0] : vector<3x4xi32> to vector<4xi32>
    %449 = vector.shape_cast %448 : vector<4xi32> to vector<1x4xi32>
    %450 = vector.extract_strided_slice %435 {offsets = [2, 0], sizes = [3, 4], strides = [1, 1]} : vector<16x4xf32> to vector<3x4xf32>
    %451 = vector.extract_strided_slice %438 {offsets = [2, 0], sizes = [3, 4], strides = [1, 1]} : vector<16x4xi32> to vector<3x4xi32>
    %cst_145 = arith.constant dense<0xFF800000> : vector<4xf32>
    %452 = vector.multi_reduction <maximumf>, %450, %cst_145 [0] : vector<3x4xf32> to vector<4xf32>
    %453 = vector.shape_cast %452 : vector<4xf32> to vector<1x4xf32>
    %454 = vector.broadcast %453 : vector<1x4xf32> to vector<3x4xf32>
    %455 = arith.cmpf oeq, %450, %454 : vector<3x4xf32>
    %456 = vector.shape_cast %0 : vector<1x4xi32> to vector<1x4xi32>
    %457 = vector.broadcast %456 : vector<1x4xi32> to vector<3x4xi32>
    %458 = arith.select %455, %451, %457 : vector<3x4xi1>, vector<3x4xi32>
    %cst_146 = arith.constant dense<2147483647> : vector<4xi32>
    %459 = vector.multi_reduction <minsi>, %458, %cst_146 [0] : vector<3x4xi32> to vector<4xi32>
    %460 = vector.shape_cast %459 : vector<4xi32> to vector<1x4xi32>
    %461 = vector.extract_strided_slice %435 {offsets = [4, 0], sizes = [3, 4], strides = [1, 1]} : vector<16x4xf32> to vector<3x4xf32>
    %462 = vector.extract_strided_slice %438 {offsets = [4, 0], sizes = [3, 4], strides = [1, 1]} : vector<16x4xi32> to vector<3x4xi32>
    %cst_147 = arith.constant dense<0xFF800000> : vector<4xf32>
    %463 = vector.multi_reduction <maximumf>, %461, %cst_147 [0] : vector<3x4xf32> to vector<4xf32>
    %464 = vector.shape_cast %463 : vector<4xf32> to vector<1x4xf32>
    %465 = vector.broadcast %464 : vector<1x4xf32> to vector<3x4xf32>
    %466 = arith.cmpf oeq, %461, %465 : vector<3x4xf32>
    %467 = vector.shape_cast %0 : vector<1x4xi32> to vector<1x4xi32>
    %468 = vector.broadcast %467 : vector<1x4xi32> to vector<3x4xi32>
    %469 = arith.select %466, %462, %468 : vector<3x4xi1>, vector<3x4xi32>
    %cst_148 = arith.constant dense<2147483647> : vector<4xi32>
    %470 = vector.multi_reduction <minsi>, %469, %cst_148 [0] : vector<3x4xi32> to vector<4xi32>
    %471 = vector.shape_cast %470 : vector<4xi32> to vector<1x4xi32>
    %472 = vector.extract_strided_slice %435 {offsets = [6, 0], sizes = [4, 4], strides = [1, 1]} : vector<16x4xf32> to vector<4x4xf32>
    %473 = vector.extract_strided_slice %438 {offsets = [6, 0], sizes = [4, 4], strides = [1, 1]} : vector<16x4xi32> to vector<4x4xi32>
    %cst_149 = arith.constant dense<0xFF800000> : vector<4xf32>
    %474 = vector.multi_reduction <maximumf>, %472, %cst_149 [0] : vector<4x4xf32> to vector<4xf32>
    %475 = vector.shape_cast %474 : vector<4xf32> to vector<1x4xf32>
    %476 = vector.broadcast %475 : vector<1x4xf32> to vector<4x4xf32>
    %477 = arith.cmpf oeq, %472, %476 : vector<4x4xf32>
    %478 = vector.shape_cast %0 : vector<1x4xi32> to vector<1x4xi32>
    %479 = vector.broadcast %478 : vector<1x4xi32> to vector<4x4xi32>
    %480 = arith.select %477, %473, %479 : vector<4x4xi1>, vector<4x4xi32>
    %cst_150 = arith.constant dense<2147483647> : vector<4xi32>
    %481 = vector.multi_reduction <minsi>, %480, %cst_150 [0] : vector<4x4xi32> to vector<4xi32>
    %482 = vector.shape_cast %481 : vector<4xi32> to vector<1x4xi32>
    %483 = vector.extract_strided_slice %435 {offsets = [9, 0], sizes = [3, 4], strides = [1, 1]} : vector<16x4xf32> to vector<3x4xf32>
    %484 = vector.extract_strided_slice %438 {offsets = [9, 0], sizes = [3, 4], strides = [1, 1]} : vector<16x4xi32> to vector<3x4xi32>
    %cst_151 = arith.constant dense<0xFF800000> : vector<4xf32>
    %485 = vector.multi_reduction <maximumf>, %483, %cst_151 [0] : vector<3x4xf32> to vector<4xf32>
    %486 = vector.shape_cast %485 : vector<4xf32> to vector<1x4xf32>
    %487 = vector.broadcast %486 : vector<1x4xf32> to vector<3x4xf32>
    %488 = arith.cmpf oeq, %483, %487 : vector<3x4xf32>
    %489 = vector.shape_cast %0 : vector<1x4xi32> to vector<1x4xi32>
    %490 = vector.broadcast %489 : vector<1x4xi32> to vector<3x4xi32>
    %491 = arith.select %488, %484, %490 : vector<3x4xi1>, vector<3x4xi32>
    %cst_152 = arith.constant dense<2147483647> : vector<4xi32>
    %492 = vector.multi_reduction <minsi>, %491, %cst_152 [0] : vector<3x4xi32> to vector<4xi32>
    %493 = vector.shape_cast %492 : vector<4xi32> to vector<1x4xi32>
    %494 = vector.extract_strided_slice %435 {offsets = [11, 0], sizes = [3, 4], strides = [1, 1]} : vector<16x4xf32> to vector<3x4xf32>
    %495 = vector.extract_strided_slice %438 {offsets = [11, 0], sizes = [3, 4], strides = [1, 1]} : vector<16x4xi32> to vector<3x4xi32>
    %cst_153 = arith.constant dense<0xFF800000> : vector<4xf32>
    %496 = vector.multi_reduction <maximumf>, %494, %cst_153 [0] : vector<3x4xf32> to vector<4xf32>
    %497 = vector.shape_cast %496 : vector<4xf32> to vector<1x4xf32>
    %498 = vector.broadcast %497 : vector<1x4xf32> to vector<3x4xf32>
    %499 = arith.cmpf oeq, %494, %498 : vector<3x4xf32>
    %500 = vector.shape_cast %0 : vector<1x4xi32> to vector<1x4xi32>
    %501 = vector.broadcast %500 : vector<1x4xi32> to vector<3x4xi32>
    %502 = arith.select %499, %495, %501 : vector<3x4xi1>, vector<3x4xi32>
    %cst_154 = arith.constant dense<2147483647> : vector<4xi32>
    %503 = vector.multi_reduction <minsi>, %502, %cst_154 [0] : vector<3x4xi32> to vector<4xi32>
    %504 = vector.shape_cast %503 : vector<4xi32> to vector<1x4xi32>
    %505 = vector.extract_strided_slice %435 {offsets = [13, 0], sizes = [3, 4], strides = [1, 1]} : vector<16x4xf32> to vector<3x4xf32>
    %506 = vector.extract_strided_slice %438 {offsets = [13, 0], sizes = [3, 4], strides = [1, 1]} : vector<16x4xi32> to vector<3x4xi32>
    %cst_155 = arith.constant dense<0xFF800000> : vector<4xf32>
    %507 = vector.multi_reduction <maximumf>, %505, %cst_155 [0] : vector<3x4xf32> to vector<4xf32>
    %508 = vector.shape_cast %507 : vector<4xf32> to vector<1x4xf32>
    %509 = vector.broadcast %508 : vector<1x4xf32> to vector<3x4xf32>
    %510 = arith.cmpf oeq, %505, %509 : vector<3x4xf32>
    %511 = vector.shape_cast %0 : vector<1x4xi32> to vector<1x4xi32>
    %512 = vector.broadcast %511 : vector<1x4xi32> to vector<3x4xi32>
    %513 = arith.select %510, %506, %512 : vector<3x4xi1>, vector<3x4xi32>
    %cst_156 = arith.constant dense<2147483647> : vector<4xi32>
    %514 = vector.multi_reduction <minsi>, %513, %cst_156 [0] : vector<3x4xi32> to vector<4xi32>
    %515 = vector.shape_cast %514 : vector<4xi32> to vector<1x4xi32>
    %516 = tpu.concatenate %442, %453, %464, %475, %486, %497, %508 in 0 : vector<1x4xf32>, vector<1x4xf32>, vector<1x4xf32>, vector<1x4xf32>, vector<1x4xf32>, vector<1x4xf32>, vector<1x4xf32> -> vector<7x4xf32>
    %c0_157 = arith.constant 0 : index
    %c4_158 = arith.constant 4 : index
    %c0_159 = arith.constant 0 : index
    %c0_160 = arith.constant 0 : index
    %517 = vector.load %arg3[%c0_157, %c4_158, %c0_159, %c0_160] : memref<1x7x7x4xf32, #tpu.memory_space<vmem>>, vector<1x1x7x4xf32>
    %518 = vector.shape_cast %517 : vector<1x1x7x4xf32> to vector<7x4xf32>
    %519 = vector.shape_cast %516 : vector<7x4xf32> to vector<1x1x7x4xf32>
    tpu.vector_store %arg3[%c0_157, %c4_158, %c0_159, %c0_160], %519 {strides = array<i32>} : memref<1x7x7x4xf32, #tpu.memory_space<vmem>>, vector<1x1x7x4xf32>,
    %520 = tpu.concatenate %449, %460, %471, %482, %493, %504, %515 in 0 : vector<1x4xi32>, vector<1x4xi32>, vector<1x4xi32>, vector<1x4xi32>, vector<1x4xi32>, vector<1x4xi32>, vector<1x4xi32> -> vector<7x4xi32>
    %c0_161 = arith.constant 0 : index
    %c4_162 = arith.constant 4 : index
    %c0_163 = arith.constant 0 : index
    %c0_164 = arith.constant 0 : index
    %521 = vector.load %arg4[%c0_161, %c4_162, %c0_163, %c0_164] : memref<1x7x7x4xi32, #tpu.memory_space<vmem>>, vector<1x1x7x4xi32>
    %522 = vector.shape_cast %521 : vector<1x1x7x4xi32> to vector<7x4xi32>
    %523 = vector.shape_cast %520 : vector<7x4xi32> to vector<1x1x7x4xi32>
    tpu.vector_store %arg4[%c0_161, %c4_162, %c0_163, %c0_164], %523 {strides = array<i32>} : memref<1x7x7x4xi32, #tpu.memory_space<vmem>>, vector<1x1x7x4xi32>,
    %c0_165 = arith.constant 0 : index
    %c11_166 = arith.constant 11 : index
    %c0_167 = arith.constant 0 : index
    %c0_168 = arith.constant 0 : index
    %524 = vector.load %arg2[%c0_165, %c11_166, %c0_167, %c0_168] : memref<1x16x16x4xf32, #tpu.memory_space<vmem>>, vector<1x1x16x4xf32>
    %525 = vector.shape_cast %524 : vector<1x1x16x4xf32> to vector<16x4xf32>
    %c176_i32_169 = arith.constant 176 : i32
    %526 = vector.broadcast %c176_i32_169 : i32 to vector<16x4xi32>
    %527 = arith.addi %1, %526 : vector<16x4xi32>
    %c0_170 = arith.constant 0 : index
    %c12 = arith.constant 12 : index
    %c0_171 = arith.constant 0 : index
    %c0_172 = arith.constant 0 : index
    %528 = vector.load %arg2[%c0_170, %c12, %c0_171, %c0_172] : memref<1x16x16x4xf32, #tpu.memory_space<vmem>>, vector<1x1x16x4xf32>
    %529 = vector.shape_cast %528 : vector<1x1x16x4xf32> to vector<16x4xf32>
    %530 = arith.cmpf ogt, %529, %525 : vector<16x4xf32>
    %531 = arith.select %530, %529, %525 : vector<16x4xi1>, vector<16x4xf32>
    %c192_i32 = arith.constant 192 : i32
    %532 = vector.broadcast %c192_i32 : i32 to vector<16x4xi32>
    %533 = arith.addi %1, %532 : vector<16x4xi32>
    %534 = arith.select %530, %533, %527 : vector<16x4xi1>, vector<16x4xi32>
    %c0_173 = arith.constant 0 : index
    %c13 = arith.constant 13 : index
    %c0_174 = arith.constant 0 : index
    %c0_175 = arith.constant 0 : index
    %535 = vector.load %arg2[%c0_173, %c13, %c0_174, %c0_175] : memref<1x16x16x4xf32, #tpu.memory_space<vmem>>, vector<1x1x16x4xf32>
    %536 = vector.shape_cast %535 : vector<1x1x16x4xf32> to vector<16x4xf32>
    %537 = arith.cmpf ogt, %536, %531 : vector<16x4xf32>
    %538 = arith.select %537, %536, %531 : vector<16x4xi1>, vector<16x4xf32>
    %c208_i32 = arith.constant 208 : i32
    %539 = vector.broadcast %c208_i32 : i32 to vector<16x4xi32>
    %540 = arith.addi %1, %539 : vector<16x4xi32>
    %541 = arith.select %537, %540, %534 : vector<16x4xi1>, vector<16x4xi32>
    %542 = vector.extract_strided_slice %538 {offsets = [0, 0], sizes = [3, 4], strides = [1, 1]} : vector<16x4xf32> to vector<3x4xf32>
    %543 = vector.extract_strided_slice %541 {offsets = [0, 0], sizes = [3, 4], strides = [1, 1]} : vector<16x4xi32> to vector<3x4xi32>
    %cst_176 = arith.constant dense<0xFF800000> : vector<4xf32>
    %544 = vector.multi_reduction <maximumf>, %542, %cst_176 [0] : vector<3x4xf32> to vector<4xf32>
    %545 = vector.shape_cast %544 : vector<4xf32> to vector<1x4xf32>
    %546 = vector.broadcast %545 : vector<1x4xf32> to vector<3x4xf32>
    %547 = arith.cmpf oeq, %542, %546 : vector<3x4xf32>
    %548 = vector.shape_cast %0 : vector<1x4xi32> to vector<1x4xi32>
    %549 = vector.broadcast %548 : vector<1x4xi32> to vector<3x4xi32>
    %550 = arith.select %547, %543, %549 : vector<3x4xi1>, vector<3x4xi32>
    %cst_177 = arith.constant dense<2147483647> : vector<4xi32>
    %551 = vector.multi_reduction <minsi>, %550, %cst_177 [0] : vector<3x4xi32> to vector<4xi32>
    %552 = vector.shape_cast %551 : vector<4xi32> to vector<1x4xi32>
    %553 = vector.extract_strided_slice %538 {offsets = [2, 0], sizes = [3, 4], strides = [1, 1]} : vector<16x4xf32> to vector<3x4xf32>
    %554 = vector.extract_strided_slice %541 {offsets = [2, 0], sizes = [3, 4], strides = [1, 1]} : vector<16x4xi32> to vector<3x4xi32>
    %cst_178 = arith.constant dense<0xFF800000> : vector<4xf32>
    %555 = vector.multi_reduction <maximumf>, %553, %cst_178 [0] : vector<3x4xf32> to vector<4xf32>
    %556 = vector.shape_cast %555 : vector<4xf32> to vector<1x4xf32>
    %557 = vector.broadcast %556 : vector<1x4xf32> to vector<3x4xf32>
    %558 = arith.cmpf oeq, %553, %557 : vector<3x4xf32>
    %559 = vector.shape_cast %0 : vector<1x4xi32> to vector<1x4xi32>
    %560 = vector.broadcast %559 : vector<1x4xi32> to vector<3x4xi32>
    %561 = arith.select %558, %554, %560 : vector<3x4xi1>, vector<3x4xi32>
    %cst_179 = arith.constant dense<2147483647> : vector<4xi32>
    %562 = vector.multi_reduction <minsi>, %561, %cst_179 [0] : vector<3x4xi32> to vector<4xi32>
    %563 = vector.shape_cast %562 : vector<4xi32> to vector<1x4xi32>
    %564 = vector.extract_strided_slice %538 {offsets = [4, 0], sizes = [3, 4], strides = [1, 1]} : vector<16x4xf32> to vector<3x4xf32>
    %565 = vector.extract_strided_slice %541 {offsets = [4, 0], sizes = [3, 4], strides = [1, 1]} : vector<16x4xi32> to vector<3x4xi32>
    %cst_180 = arith.constant dense<0xFF800000> : vector<4xf32>
    %566 = vector.multi_reduction <maximumf>, %564, %cst_180 [0] : vector<3x4xf32> to vector<4xf32>
    %567 = vector.shape_cast %566 : vector<4xf32> to vector<1x4xf32>
    %568 = vector.broadcast %567 : vector<1x4xf32> to vector<3x4xf32>
    %569 = arith.cmpf oeq, %564, %568 : vector<3x4xf32>
    %570 = vector.shape_cast %0 : vector<1x4xi32> to vector<1x4xi32>
    %571 = vector.broadcast %570 : vector<1x4xi32> to vector<3x4xi32>
    %572 = arith.select %569, %565, %571 : vector<3x4xi1>, vector<3x4xi32>
    %cst_181 = arith.constant dense<2147483647> : vector<4xi32>
    %573 = vector.multi_reduction <minsi>, %572, %cst_181 [0] : vector<3x4xi32> to vector<4xi32>
    %574 = vector.shape_cast %573 : vector<4xi32> to vector<1x4xi32>
    %575 = vector.extract_strided_slice %538 {offsets = [6, 0], sizes = [4, 4], strides = [1, 1]} : vector<16x4xf32> to vector<4x4xf32>
    %576 = vector.extract_strided_slice %541 {offsets = [6, 0], sizes = [4, 4], strides = [1, 1]} : vector<16x4xi32> to vector<4x4xi32>
    %cst_182 = arith.constant dense<0xFF800000> : vector<4xf32>
    %577 = vector.multi_reduction <maximumf>, %575, %cst_182 [0] : vector<4x4xf32> to vector<4xf32>
    %578 = vector.shape_cast %577 : vector<4xf32> to vector<1x4xf32>
    %579 = vector.broadcast %578 : vector<1x4xf32> to vector<4x4xf32>
    %580 = arith.cmpf oeq, %575, %579 : vector<4x4xf32>
    %581 = vector.shape_cast %0 : vector<1x4xi32> to vector<1x4xi32>
    %582 = vector.broadcast %581 : vector<1x4xi32> to vector<4x4xi32>
    %583 = arith.select %580, %576, %582 : vector<4x4xi1>, vector<4x4xi32>
    %cst_183 = arith.constant dense<2147483647> : vector<4xi32>
    %584 = vector.multi_reduction <minsi>, %583, %cst_183 [0] : vector<4x4xi32> to vector<4xi32>
    %585 = vector.shape_cast %584 : vector<4xi32> to vector<1x4xi32>
    %586 = vector.extract_strided_slice %538 {offsets = [9, 0], sizes = [3, 4], strides = [1, 1]} : vector<16x4xf32> to vector<3x4xf32>
    %587 = vector.extract_strided_slice %541 {offsets = [9, 0], sizes = [3, 4], strides = [1, 1]} : vector<16x4xi32> to vector<3x4xi32>
    %cst_184 = arith.constant dense<0xFF800000> : vector<4xf32>
    %588 = vector.multi_reduction <maximumf>, %586, %cst_184 [0] : vector<3x4xf32> to vector<4xf32>
    %589 = vector.shape_cast %588 : vector<4xf32> to vector<1x4xf32>
    %590 = vector.broadcast %589 : vector<1x4xf32> to vector<3x4xf32>
    %591 = arith.cmpf oeq, %586, %590 : vector<3x4xf32>
    %592 = vector.shape_cast %0 : vector<1x4xi32> to vector<1x4xi32>
    %593 = vector.broadcast %592 : vector<1x4xi32> to vector<3x4xi32>
    %594 = arith.select %591, %587, %593 : vector<3x4xi1>, vector<3x4xi32>
    %cst_185 = arith.constant dense<2147483647> : vector<4xi32>
    %595 = vector.multi_reduction <minsi>, %594, %cst_185 [0] : vector<3x4xi32> to vector<4xi32>
    %596 = vector.shape_cast %595 : vector<4xi32> to vector<1x4xi32>
    %597 = vector.extract_strided_slice %538 {offsets = [11, 0], sizes = [3, 4], strides = [1, 1]} : vector<16x4xf32> to vector<3x4xf32>
    %598 = vector.extract_strided_slice %541 {offsets = [11, 0], sizes = [3, 4], strides = [1, 1]} : vector<16x4xi32> to vector<3x4xi32>
    %cst_186 = arith.constant dense<0xFF800000> : vector<4xf32>
    %599 = vector.multi_reduction <maximumf>, %597, %cst_186 [0] : vector<3x4xf32> to vector<4xf32>
    %600 = vector.shape_cast %599 : vector<4xf32> to vector<1x4xf32>
    %601 = vector.broadcast %600 : vector<1x4xf32> to vector<3x4xf32>
    %602 = arith.cmpf oeq, %597, %601 : vector<3x4xf32>
    %603 = vector.shape_cast %0 : vector<1x4xi32> to vector<1x4xi32>
    %604 = vector.broadcast %603 : vector<1x4xi32> to vector<3x4xi32>
    %605 = arith.select %602, %598, %604 : vector<3x4xi1>, vector<3x4xi32>
    %cst_187 = arith.constant dense<2147483647> : vector<4xi32>
    %606 = vector.multi_reduction <minsi>, %605, %cst_187 [0] : vector<3x4xi32> to vector<4xi32>
    %607 = vector.shape_cast %606 : vector<4xi32> to vector<1x4xi32>
    %608 = vector.extract_strided_slice %538 {offsets = [13, 0], sizes = [3, 4], strides = [1, 1]} : vector<16x4xf32> to vector<3x4xf32>
    %609 = vector.extract_strided_slice %541 {offsets = [13, 0], sizes = [3, 4], strides = [1, 1]} : vector<16x4xi32> to vector<3x4xi32>
    %cst_188 = arith.constant dense<0xFF800000> : vector<4xf32>
    %610 = vector.multi_reduction <maximumf>, %608, %cst_188 [0] : vector<3x4xf32> to vector<4xf32>
    %611 = vector.shape_cast %610 : vector<4xf32> to vector<1x4xf32>
    %612 = vector.broadcast %611 : vector<1x4xf32> to vector<3x4xf32>
    %613 = arith.cmpf oeq, %608, %612 : vector<3x4xf32>
    %614 = vector.shape_cast %0 : vector<1x4xi32> to vector<1x4xi32>
    %615 = vector.broadcast %614 : vector<1x4xi32> to vector<3x4xi32>
    %616 = arith.select %613, %609, %615 : vector<3x4xi1>, vector<3x4xi32>
    %cst_189 = arith.constant dense<2147483647> : vector<4xi32>
    %617 = vector.multi_reduction <minsi>, %616, %cst_189 [0] : vector<3x4xi32> to vector<4xi32>
    %618 = vector.shape_cast %617 : vector<4xi32> to vector<1x4xi32>
    %619 = tpu.concatenate %545, %556, %567, %578, %589, %600, %611 in 0 : vector<1x4xf32>, vector<1x4xf32>, vector<1x4xf32>, vector<1x4xf32>, vector<1x4xf32>, vector<1x4xf32>, vector<1x4xf32> -> vector<7x4xf32>
    %c0_190 = arith.constant 0 : index
    %c5_191 = arith.constant 5 : index
    %c0_192 = arith.constant 0 : index
    %c0_193 = arith.constant 0 : index
    %620 = vector.load %arg3[%c0_190, %c5_191, %c0_192, %c0_193] : memref<1x7x7x4xf32, #tpu.memory_space<vmem>>, vector<1x1x7x4xf32>
    %621 = vector.shape_cast %620 : vector<1x1x7x4xf32> to vector<7x4xf32>
    %622 = vector.shape_cast %619 : vector<7x4xf32> to vector<1x1x7x4xf32>
    tpu.vector_store %arg3[%c0_190, %c5_191, %c0_192, %c0_193], %622 {strides = array<i32>} : memref<1x7x7x4xf32, #tpu.memory_space<vmem>>, vector<1x1x7x4xf32>,
    %623 = tpu.concatenate %552, %563, %574, %585, %596, %607, %618 in 0 : vector<1x4xi32>, vector<1x4xi32>, vector<1x4xi32>, vector<1x4xi32>, vector<1x4xi32>, vector<1x4xi32>, vector<1x4xi32> -> vector<7x4xi32>
    %c0_194 = arith.constant 0 : index
    %c5_195 = arith.constant 5 : index
    %c0_196 = arith.constant 0 : index
    %c0_197 = arith.constant 0 : index
    %624 = vector.load %arg4[%c0_194, %c5_195, %c0_196, %c0_197] : memref<1x7x7x4xi32, #tpu.memory_space<vmem>>, vector<1x1x7x4xi32>
    %625 = vector.shape_cast %624 : vector<1x1x7x4xi32> to vector<7x4xi32>
    %626 = vector.shape_cast %623 : vector<7x4xi32> to vector<1x1x7x4xi32>
    tpu.vector_store %arg4[%c0_194, %c5_195, %c0_196, %c0_197], %626 {strides = array<i32>} : memref<1x7x7x4xi32, #tpu.memory_space<vmem>>, vector<1x1x7x4xi32>,
    %c0_198 = arith.constant 0 : index
    %c13_199 = arith.constant 13 : index
    %c0_200 = arith.constant 0 : index
    %c0_201 = arith.constant 0 : index
    %627 = vector.load %arg2[%c0_198, %c13_199, %c0_200, %c0_201] : memref<1x16x16x4xf32, #tpu.memory_space<vmem>>, vector<1x1x16x4xf32>
    %628 = vector.shape_cast %627 : vector<1x1x16x4xf32> to vector<16x4xf32>
    %c208_i32_202 = arith.constant 208 : i32
    %629 = vector.broadcast %c208_i32_202 : i32 to vector<16x4xi32>
    %630 = arith.addi %1, %629 : vector<16x4xi32>
    %c0_203 = arith.constant 0 : index
    %c14 = arith.constant 14 : index
    %c0_204 = arith.constant 0 : index
    %c0_205 = arith.constant 0 : index
    %631 = vector.load %arg2[%c0_203, %c14, %c0_204, %c0_205] : memref<1x16x16x4xf32, #tpu.memory_space<vmem>>, vector<1x1x16x4xf32>
    %632 = vector.shape_cast %631 : vector<1x1x16x4xf32> to vector<16x4xf32>
    %633 = arith.cmpf ogt, %632, %628 : vector<16x4xf32>
    %634 = arith.select %633, %632, %628 : vector<16x4xi1>, vector<16x4xf32>
    %c224_i32 = arith.constant 224 : i32
    %635 = vector.broadcast %c224_i32 : i32 to vector<16x4xi32>
    %636 = arith.addi %1, %635 : vector<16x4xi32>
    %637 = arith.select %633, %636, %630 : vector<16x4xi1>, vector<16x4xi32>
    %c0_206 = arith.constant 0 : index
    %c15 = arith.constant 15 : index
    %c0_207 = arith.constant 0 : index
    %c0_208 = arith.constant 0 : index
    %638 = vector.load %arg2[%c0_206, %c15, %c0_207, %c0_208] : memref<1x16x16x4xf32, #tpu.memory_space<vmem>>, vector<1x1x16x4xf32>
    %639 = vector.shape_cast %638 : vector<1x1x16x4xf32> to vector<16x4xf32>
    %640 = arith.cmpf ogt, %639, %634 : vector<16x4xf32>
    %641 = arith.select %640, %639, %634 : vector<16x4xi1>, vector<16x4xf32>
    %c240_i32 = arith.constant 240 : i32
    %642 = vector.broadcast %c240_i32 : i32 to vector<16x4xi32>
    %643 = arith.addi %1, %642 : vector<16x4xi32>
    %644 = arith.select %640, %643, %637 : vector<16x4xi1>, vector<16x4xi32>
    %645 = vector.extract_strided_slice %641 {offsets = [0, 0], sizes = [3, 4], strides = [1, 1]} : vector<16x4xf32> to vector<3x4xf32>
    %646 = vector.extract_strided_slice %644 {offsets = [0, 0], sizes = [3, 4], strides = [1, 1]} : vector<16x4xi32> to vector<3x4xi32>
    %cst_209 = arith.constant dense<0xFF800000> : vector<4xf32>
    %647 = vector.multi_reduction <maximumf>, %645, %cst_209 [0] : vector<3x4xf32> to vector<4xf32>
    %648 = vector.shape_cast %647 : vector<4xf32> to vector<1x4xf32>
    %649 = vector.broadcast %648 : vector<1x4xf32> to vector<3x4xf32>
    %650 = arith.cmpf oeq, %645, %649 : vector<3x4xf32>
    %651 = vector.shape_cast %0 : vector<1x4xi32> to vector<1x4xi32>
    %652 = vector.broadcast %651 : vector<1x4xi32> to vector<3x4xi32>
    %653 = arith.select %650, %646, %652 : vector<3x4xi1>, vector<3x4xi32>
    %cst_210 = arith.constant dense<2147483647> : vector<4xi32>
    %654 = vector.multi_reduction <minsi>, %653, %cst_210 [0] : vector<3x4xi32> to vector<4xi32>
    %655 = vector.shape_cast %654 : vector<4xi32> to vector<1x4xi32>
    %656 = vector.extract_strided_slice %641 {offsets = [2, 0], sizes = [3, 4], strides = [1, 1]} : vector<16x4xf32> to vector<3x4xf32>
    %657 = vector.extract_strided_slice %644 {offsets = [2, 0], sizes = [3, 4], strides = [1, 1]} : vector<16x4xi32> to vector<3x4xi32>
    %cst_211 = arith.constant dense<0xFF800000> : vector<4xf32>
    %658 = vector.multi_reduction <maximumf>, %656, %cst_211 [0] : vector<3x4xf32> to vector<4xf32>
    %659 = vector.shape_cast %658 : vector<4xf32> to vector<1x4xf32>
    %660 = vector.broadcast %659 : vector<1x4xf32> to vector<3x4xf32>
    %661 = arith.cmpf oeq, %656, %660 : vector<3x4xf32>
    %662 = vector.shape_cast %0 : vector<1x4xi32> to vector<1x4xi32>
    %663 = vector.broadcast %662 : vector<1x4xi32> to vector<3x4xi32>
    %664 = arith.select %661, %657, %663 : vector<3x4xi1>, vector<3x4xi32>
    %cst_212 = arith.constant dense<2147483647> : vector<4xi32>
    %665 = vector.multi_reduction <minsi>, %664, %cst_212 [0] : vector<3x4xi32> to vector<4xi32>
    %666 = vector.shape_cast %665 : vector<4xi32> to vector<1x4xi32>
    %667 = vector.extract_strided_slice %641 {offsets = [4, 0], sizes = [3, 4], strides = [1, 1]} : vector<16x4xf32> to vector<3x4xf32>
    %668 = vector.extract_strided_slice %644 {offsets = [4, 0], sizes = [3, 4], strides = [1, 1]} : vector<16x4xi32> to vector<3x4xi32>
    %cst_213 = arith.constant dense<0xFF800000> : vector<4xf32>
    %669 = vector.multi_reduction <maximumf>, %667, %cst_213 [0] : vector<3x4xf32> to vector<4xf32>
    %670 = vector.shape_cast %669 : vector<4xf32> to vector<1x4xf32>
    %671 = vector.broadcast %670 : vector<1x4xf32> to vector<3x4xf32>
    %672 = arith.cmpf oeq, %667, %671 : vector<3x4xf32>
    %673 = vector.shape_cast %0 : vector<1x4xi32> to vector<1x4xi32>
    %674 = vector.broadcast %673 : vector<1x4xi32> to vector<3x4xi32>
    %675 = arith.select %672, %668, %674 : vector<3x4xi1>, vector<3x4xi32>
    %cst_214 = arith.constant dense<2147483647> : vector<4xi32>
    %676 = vector.multi_reduction <minsi>, %675, %cst_214 [0] : vector<3x4xi32> to vector<4xi32>
    %677 = vector.shape_cast %676 : vector<4xi32> to vector<1x4xi32>
    %678 = vector.extract_strided_slice %641 {offsets = [6, 0], sizes = [4, 4], strides = [1, 1]} : vector<16x4xf32> to vector<4x4xf32>
    %679 = vector.extract_strided_slice %644 {offsets = [6, 0], sizes = [4, 4], strides = [1, 1]} : vector<16x4xi32> to vector<4x4xi32>
    %cst_215 = arith.constant dense<0xFF800000> : vector<4xf32>
    %680 = vector.multi_reduction <maximumf>, %678, %cst_215 [0] : vector<4x4xf32> to vector<4xf32>
    %681 = vector.shape_cast %680 : vector<4xf32> to vector<1x4xf32>
    %682 = vector.broadcast %681 : vector<1x4xf32> to vector<4x4xf32>
    %683 = arith.cmpf oeq, %678, %682 : vector<4x4xf32>
    %684 = vector.shape_cast %0 : vector<1x4xi32> to vector<1x4xi32>
    %685 = vector.broadcast %684 : vector<1x4xi32> to vector<4x4xi32>
    %686 = arith.select %683, %679, %685 : vector<4x4xi1>, vector<4x4xi32>
    %cst_216 = arith.constant dense<2147483647> : vector<4xi32>
    %687 = vector.multi_reduction <minsi>, %686, %cst_216 [0] : vector<4x4xi32> to vector<4xi32>
    %688 = vector.shape_cast %687 : vector<4xi32> to vector<1x4xi32>
    %689 = vector.extract_strided_slice %641 {offsets = [9, 0], sizes = [3, 4], strides = [1, 1]} : vector<16x4xf32> to vector<3x4xf32>
    %690 = vector.extract_strided_slice %644 {offsets = [9, 0], sizes = [3, 4], strides = [1, 1]} : vector<16x4xi32> to vector<3x4xi32>
    %cst_217 = arith.constant dense<0xFF800000> : vector<4xf32>
    %691 = vector.multi_reduction <maximumf>, %689, %cst_217 [0] : vector<3x4xf32> to vector<4xf32>
    %692 = vector.shape_cast %691 : vector<4xf32> to vector<1x4xf32>
    %693 = vector.broadcast %692 : vector<1x4xf32> to vector<3x4xf32>
    %694 = arith.cmpf oeq, %689, %693 : vector<3x4xf32>
    %695 = vector.shape_cast %0 : vector<1x4xi32> to vector<1x4xi32>
    %696 = vector.broadcast %695 : vector<1x4xi32> to vector<3x4xi32>
    %697 = arith.select %694, %690, %696 : vector<3x4xi1>, vector<3x4xi32>
    %cst_218 = arith.constant dense<2147483647> : vector<4xi32>
    %698 = vector.multi_reduction <minsi>, %697, %cst_218 [0] : vector<3x4xi32> to vector<4xi32>
    %699 = vector.shape_cast %698 : vector<4xi32> to vector<1x4xi32>
    %700 = vector.extract_strided_slice %641 {offsets = [11, 0], sizes = [3, 4], strides = [1, 1]} : vector<16x4xf32> to vector<3x4xf32>
    %701 = vector.extract_strided_slice %644 {offsets = [11, 0], sizes = [3, 4], strides = [1, 1]} : vector<16x4xi32> to vector<3x4xi32>
    %cst_219 = arith.constant dense<0xFF800000> : vector<4xf32>
    %702 = vector.multi_reduction <maximumf>, %700, %cst_219 [0] : vector<3x4xf32> to vector<4xf32>
    %703 = vector.shape_cast %702 : vector<4xf32> to vector<1x4xf32>
    %704 = vector.broadcast %703 : vector<1x4xf32> to vector<3x4xf32>
    %705 = arith.cmpf oeq, %700, %704 : vector<3x4xf32>
    %706 = vector.shape_cast %0 : vector<1x4xi32> to vector<1x4xi32>
    %707 = vector.broadcast %706 : vector<1x4xi32> to vector<3x4xi32>
    %708 = arith.select %705, %701, %707 : vector<3x4xi1>, vector<3x4xi32>
    %cst_220 = arith.constant dense<2147483647> : vector<4xi32>
    %709 = vector.multi_reduction <minsi>, %708, %cst_220 [0] : vector<3x4xi32> to vector<4xi32>
    %710 = vector.shape_cast %709 : vector<4xi32> to vector<1x4xi32>
    %711 = vector.extract_strided_slice %641 {offsets = [13, 0], sizes = [3, 4], strides = [1, 1]} : vector<16x4xf32> to vector<3x4xf32>
    %712 = vector.extract_strided_slice %644 {offsets = [13, 0], sizes = [3, 4], strides = [1, 1]} : vector<16x4xi32> to vector<3x4xi32>
    %cst_221 = arith.constant dense<0xFF800000> : vector<4xf32>
    %713 = vector.multi_reduction <maximumf>, %711, %cst_221 [0] : vector<3x4xf32> to vector<4xf32>
    %714 = vector.shape_cast %713 : vector<4xf32> to vector<1x4xf32>
    %715 = vector.broadcast %714 : vector<1x4xf32> to vector<3x4xf32>
    %716 = arith.cmpf oeq, %711, %715 : vector<3x4xf32>
    %717 = vector.shape_cast %0 : vector<1x4xi32> to vector<1x4xi32>
    %718 = vector.broadcast %717 : vector<1x4xi32> to vector<3x4xi32>
    %719 = arith.select %716, %712, %718 : vector<3x4xi1>, vector<3x4xi32>
    %cst_222 = arith.constant dense<2147483647> : vector<4xi32>
    %720 = vector.multi_reduction <minsi>, %719, %cst_222 [0] : vector<3x4xi32> to vector<4xi32>
    %721 = vector.shape_cast %720 : vector<4xi32> to vector<1x4xi32>
    %722 = tpu.concatenate %648, %659, %670, %681, %692, %703, %714 in 0 : vector<1x4xf32>, vector<1x4xf32>, vector<1x4xf32>, vector<1x4xf32>, vector<1x4xf32>, vector<1x4xf32>, vector<1x4xf32> -> vector<7x4xf32>
    %c0_223 = arith.constant 0 : index
    %c6_224 = arith.constant 6 : index
    %c0_225 = arith.constant 0 : index
    %c0_226 = arith.constant 0 : index
    %723 = vector.load %arg3[%c0_223, %c6_224, %c0_225, %c0_226] : memref<1x7x7x4xf32, #tpu.memory_space<vmem>>, vector<1x1x7x4xf32>
    %724 = vector.shape_cast %723 : vector<1x1x7x4xf32> to vector<7x4xf32>
    %725 = vector.shape_cast %722 : vector<7x4xf32> to vector<1x1x7x4xf32>
    tpu.vector_store %arg3[%c0_223, %c6_224, %c0_225, %c0_226], %725 {strides = array<i32>} : memref<1x7x7x4xf32, #tpu.memory_space<vmem>>, vector<1x1x7x4xf32>,
    %726 = tpu.concatenate %655, %666, %677, %688, %699, %710, %721 in 0 : vector<1x4xi32>, vector<1x4xi32>, vector<1x4xi32>, vector<1x4xi32>, vector<1x4xi32>, vector<1x4xi32>, vector<1x4xi32> -> vector<7x4xi32>
    %c0_227 = arith.constant 0 : index
    %c6_228 = arith.constant 6 : index
    %c0_229 = arith.constant 0 : index
    %c0_230 = arith.constant 0 : index
    %727 = vector.load %arg4[%c0_227, %c6_228, %c0_229, %c0_230] : memref<1x7x7x4xi32, #tpu.memory_space<vmem>>, vector<1x1x7x4xi32>
    %728 = vector.shape_cast %727 : vector<1x1x7x4xi32> to vector<7x4xi32>
    %729 = vector.shape_cast %726 : vector<7x4xi32> to vector<1x1x7x4xi32>
    tpu.vector_store %arg4[%c0_227, %c6_228, %c0_229, %c0_230], %729 {strides = array<i32>} : memref<1x7x7x4xi32, #tpu.memory_space<vmem>>, vector<1x1x7x4xi32>,
    return
  }
  func.func @transform_0(%arg0: i32, %arg1: i32) -> (i32, i32, i32, i32) {
    %c0_i32 = arith.constant 0 : i32
    %c0_i32_0 = arith.constant 0 : i32
    %c0_i32_1 = arith.constant 0 : i32
    return %arg0, %c0_i32, %c0_i32_0, %arg1 : i32, i32, i32, i32
  }
  func.func @transform_1(%arg0: i32, %arg1: i32) -> (i32, i32, i32, i32) {
    %c0_i32 = arith.constant 0 : i32
    %c0_i32_0 = arith.constant 0 : i32
    %c0_i32_1 = arith.constant 0 : i32
    return %arg0, %c0_i32, %c0_i32_0, %arg1 : i32, i32, i32, i32
  }
  func.func @transform_2(%arg0: i32, %arg1: i32) -> (i32, i32, i32, i32) {
    %c0_i32 = arith.constant 0 : i32
    %c0_i32_0 = arith.constant 0 : i32
    %c0_i32_1 = arith.constant 0 : i32
    return %arg0, %c0_i32, %c0_i32_0, %arg1 : i32, i32, i32, i32
  }
}

</mosaic_0001>

<bundles_post_ra>
// kernel: tpu_custom_call.1
= control target key start
LH: loop header
LB: loop body
LE: loop exit
PB: predicated region body
PF: predicated region fallthrough
CT: control target
= control target key end

     0   :  { %s1743_s9 = smov 0   ;;  %s1745_s10 = smov 0   ;;  %s2816_s0 = inlined_call_operand.vmem [shape: f32[2,16,16,4], index: 0, kind: input, shape index: {}]   ;;  %s2817_s1 = inlined_call_operand.vmem [shape: f32[2,7,7,4], index: 1, kind: output, shape index: {0}]   ;;  %s2818_s2 = inlined_call_operand.vmem [shape: s32[2,7,7,4], index: 2, kind: output, shape index: {1}]  }
   0x1   :  { %s1747_s11 = smov 0  }
   0x2 LB: > { %s25_s12 = sadd.s32 1, %s1722_s10  ;;  %p1617_p0 = scmp.ge.s32.totalorder %s1726_s11, 1  ;;  %s1726_s11 = sphi %s1747_s11, %s13_s11   ;;  %s1722_s10 = sphi %s1745_s10, %s2945_s10   ;;  %s1718_s9 = sphi %s1743_s9, %s2944_s9  }
   0x3   : > { %p27_p1 = scmp.ge.s32.totalorder %s25_s12, 2  ;;  %p136_p2 = scmp.lt.s32.totalorder %s1726_s11, 3 }
   0x5   : > { %s2947_s12 = smov (%p27_p1, %s25_s12), 0  ;;  %p137_p3 = pnand %p1617_p0, %p136_p2 }
   0x6   : > { %p172_p4 = scmp.lt.s32.totalorder (!%p137_p3), %s1718_s9, 1 }
   0x7   : > { %140 = sbr.rel (%p137_p3) target bundleno = 349 (0x15d), region = 24 }
   0xc   : > { %v196_v0 = vlaneseq  ;;  %s2949_s9 = smov (!%p172_p4, %s1718_s9), 1  ;;  %vm2823_vm0 = vcmask 26624   ;;  %vm2820_vm1 = vcmask 28674   ;;  %vm2819_vm2 = vcmask 30724  }
   0xd   : > { %vm2821_vm3 = vcmask 31750   ;;  %s1678_s13 = sshll.u32 %s2949_s9, 8  ;;  %vm2822_vm4 = vcmask 25600   ;;  %vm2824_vm5 = vcmask 27649   ;;  %vm331_vm6 = vcmask 29699   ;;  %s1679_s17 = smul.u32 56, %s2949_s9 }
   0xe   : > { %v1763_v1 = vshrl.u32 %v196_v0, 7  ;;  %s1773_s16 = scalar_lea.vmem %s2816_s0, %s1678_s13  ;;  %vm2834_vm7 = vcmask 31749  }
   0xf   : > { %v199_v6 = vld [vmem:[%s1773_s16] sm:$0xff]  ;;  %v200_v7 = vld [vmem:[%s1773_s16 + $0x8] sm:$0xff]  ;;  %v1622_v8 = vld [vmem:[%s1773_s16 + $0x10] sm:$0xff]  ;;  %s1952_s20 = scalar_lea.vmem %s2817_s1, %s1679_s17  ;;  %s2017_s23 = scalar_lea.vmem %s2818_s2, %s1679_s17 }
  0x10   : > { %v1767_v2 = vadd.s32 8, %v1763_v1  ;;  %v208_v3 = vadd.s32 16, %v1763_v1  ;;  %v1776_v4 = vadd.s32 32, %v1763_v1  ;;  %v1779_v5 = vadd.s32 48, %v1763_v1  ;;  %v1623_v12 = vld [vmem:[%s1773_s16 + $0x18] sm:$0xff]  ;;  %v1793_v13 = vld [vmem:[%s1773_s16 + $0x20] sm:$0xff] }
  0x11   : > { %v1786_v10 = vadd.s32 64, %v1763_v1  ;;  %v1789_v11 = vadd.s32 80, %v1763_v1  ;;  %vm204_vm8 = vcmp.gt.f32.partialorder %v1622_v8, %v199_v6  ;;  %v1802_v16 = vadd.s32 96, %v1763_v1  ;;  %v1806_v19 = vld [vmem:[%s1773_s16 + $0x30] sm:$0xff]  ;;  %v1812_v22 = vld [vmem:[%s1773_s16 + $0x28] sm:$0xff]  ;;  %v1845_v35 = vld [vmem:[%s1773_s16 + $0x38] sm:$0xff] }
  0x12   : > { %v209_v9 = vadd.s32 16, %v1767_v2  ;;  %v1796_v14 = vadd.s32 32, %v1767_v2  ;;  %v1799_v15 = vadd.s32 48, %v1767_v2  ;;  %vm205_vm9 = vcmp.gt.f32.partialorder %v1623_v12, %v200_v7 }
  0x13   : > { %v206_v17 = vsel %vm204_vm8, %v1622_v8, %v199_v6  ;;  %v210_v18 = vsel %vm204_vm8, %v208_v3, %v1763_v1  ;;  %v1809_v20 = vadd.s32 64, %v1767_v2  ;;  %v207_v21 = vsel %vm205_vm9, %v1623_v12, %v200_v7 }
  0x14   : > { %vm215_vm10 = vcmp.gt.f32.partialorder %v1793_v13, %v206_v17  ;;  %v1816_v23 = vadd.s32 80, %v1767_v2  ;;  %v1819_v24 = vadd.s32 96, %v1767_v2  ;;  %v211_v25 = vsel %vm205_vm9, %v209_v9, %v1767_v2 }
  0x15   : > { %vm216_vm11 = vcmp.gt.f32.partialorder %v1812_v22, %v207_v21  ;;  %v1824_v26 = vsel %vm215_vm10, %v1793_v13, %v206_v17  ;;  %vm397_vm12 = vcmp.gt.f32.partialorder %v1806_v19, %v1793_v13  ;;  %v1834_v28 = vsel %vm215_vm10, %v1776_v4, %v210_v18 }
  0x16   : > { %v1831_v27 = vsel %vm216_vm11, %v1812_v22, %v207_v21  ;;  %v224_v29 = vsel %vm2823_vm0, %v1824_v26, -inf  ;;  %v244_v30 = vsel %vm2820_vm1, %v1824_v26, -inf  ;;  %v264_v33 = vsel %vm2819_vm2, %v1824_v26, -inf }
  0x17   : > { %v225_v31 = vrot.slane %v224_v29, 4  ;;  %v245_v32 = vrot.slane %v244_v30, 4  ;;  %v284_v34 = vsel %vm2821_vm3, %v1824_v26, -inf  ;;  %v265_v36 = vrot.slane %v264_v33, 4 }
  0x18   : > { %v286_v37 = vsel %vm2822_vm4, %v1831_v27, -inf  ;;  %v312_v38 = vsel %vm2824_vm5, %v1831_v27, -inf  ;;  %v332_v39 = vsel %vm331_vm6, %v1831_v27, -inf  ;;  %v352_v46 = vsel %vm2834_vm7, %v1831_v27, -inf }
  0x19   : > { %v226_v40 = vmax.f32 %v224_v29, %v225_v31  ;;  %v246_v41 = vmax.f32 %v244_v30, %v245_v32  ;;  %v287_v42 = vmax.f32 %v284_v34, %v286_v37  ;;  %v313_v43 = vrot.slane %v312_v38, 4 }
  0x1a   : > { %v266_v44 = vmax.f32 %v264_v33, %v265_v36  ;;  %v333_v45 = vrot.slane %v332_v39, 4  ;;  %vm2825_vm13 = vcmp.gt.f32.partialorder %v1845_v35, %v1812_v22  ;;  %v1860_v51 = vsel %vm216_vm11, %v1796_v14, %v211_v25 }
  0x1b   : > { %v227_v47 = vrot.slane %v226_v40, 2  ;;  %v247_v48 = vrot.slane %v246_v41, 2  ;;  %v288_v49 = vrot.slane %v287_v42, 4  ;;  %v314_v50 = vmax.f32 %v312_v38, %v313_v43 }
  0x1c   : > { %v267_v52 = vrot.slane %v266_v44, 2  ;;  %v334_v53 = vmax.f32 %v332_v39, %v333_v45  ;;  %v353_v54 = vrot.slane %v352_v46, 4  ;;  %v1867_v62 = vsel %vm397_vm12, %v1806_v19, %v1793_v13 }
  0x1d   : > { %v228_v55 = vmax.f32 %v226_v40, %v227_v47  ;;  %v248_v56 = vmax.f32 %v246_v41, %v247_v48  ;;  %v289_v57 = vmax.f32 %v287_v42, %v288_v49  ;;  %v315_v58 = vrot.slane %v314_v50, 2 }
  0x1e   : > { %v268_v59 = vmax.f32 %v266_v44, %v267_v52  ;;  %v335_v60 = vrot.slane %v334_v53, 2  ;;  %v354_v61 = vmax.f32 %v352_v46, %v353_v54  ;;  %v1874_v12 = vsel %vm2825_vm13, %v1845_v35, %v1812_v22 }
  0x1f   : > { %v229_v63 = vrot.slane %v228_v55, 1  ;;  %v249_v0 = vrot.slane %v248_v56, 1  ;;  %v290_v3 = vrot.slane %v289_v57, 2  ;;  %v316_v6 = vmax.f32 %v314_v50, %v315_v58 }
  0x20   : > { %v269_v7 = vrot.slane %v268_v59, 1  ;;  %v336_v8 = vmax.f32 %v334_v53, %v335_v60  ;;  %v355_v9 = vrot.slane %v354_v61, 2  ;;  %v1889_v32 = vsel %vm397_vm12, %v1779_v5, %v1776_v4 }
  0x21   : > { %v1876_v17 = vmax.f32 %v228_v55, %v229_v63  ;;  %v1878_v18 = vmax.f32 %v248_v56, %v249_v0  ;;  %v291_v21 = vmax.f32 %v289_v57, %v290_v3  ;;  %v317_v25 = vrot.slane %v316_v6, 1 }
  0x22   : > { %v1880_v29 = vmax.f32 %v268_v59, %v269_v7  ;;  %v337_v30 = vrot.slane %v336_v8, 1  ;;  %v1882_v31 = vmax.f32 %v354_v61, %v355_v9 }
  0x23   : > { %vm231_vm14 = vcmp.eq.f32.partialorder %v1824_v26, %v1876_v17  ;;  %vm251_vm15 = vcmp.eq.f32.partialorder %v1824_v26, %v1878_v18  ;;  %v292_v33 = vrot.slane %v291_v21, 1  ;;  %v1895_v34 = vmax.f32 %v316_v6, %v317_v25  ;;  %v1928_v6 = vld [vmem:[%s1773_s16 + $0x40] sm:$0xff] }
  0x24   : > { %v232_v36 = vsel %vm231_vm14, %v1834_v28, 256  ;;  %v252_v37 = vsel %vm251_vm15, %v1834_v28, 256  ;;  %vm271_vm8 = vcmp.eq.f32.partialorder %v1824_v26, %v1880_v29  ;;  %v1901_v38 = vmax.f32 %v336_v8, %v337_v30 }
  0x25   : > { %v233_v4 = vsel %vm2823_vm0, %v232_v36, 2147483647  ;;  %v253_v5 = vsel %vm2820_vm1, %v252_v37, 2147483647  ;;  %v272_v13 = vsel %vm271_vm8, %v1834_v28, 256  ;;  %v1906_v19 = vmax.f32 %v291_v21, %v292_v33 }
  0x26   : > { %v234_v39 = vrot.slane %v233_v4, 4  ;;  %v254_v40 = vrot.slane %v253_v5, 4  ;;  %v273_v41 = vsel %vm2819_vm2, %v272_v13, 2147483647  ;;  %vm319_vm9 = vcmp.eq.f32.partialorder %v1831_v27, %v1895_v34 }
  0x27   : > { %v274_v42 = vrot.slane %v273_v41, 4  ;;  %vm294_vm10 = vcmp.eq.f32.partialorder %v1824_v26, %v1906_v19  ;;  %vm295_vm11 = vcmp.eq.f32.partialorder %v1831_v27, %v1906_v19  ;;  %v320_v43 = vsel %vm319_vm9, %v1860_v51, 256 }
  0x28   : > { %vm235_vm12 = vcmp.lt.s32.totalorder %v233_v4, %v234_v39  ;;  %vm255_vm14 = vcmp.lt.s32.totalorder %v253_v5, %v254_v40  ;;  %v296_v44 = vsel %vm294_vm10, %v1834_v28, 256  ;;  %v297_v45 = vsel %vm295_vm11, %v1860_v51, 256 }
  0x29   : > { %vm371_vm15 = vcmask 1040384   ;;  %v236_v46 = vsel %vm235_vm12, %v233_v4, %v234_v39  ;;  %v256_v47 = vsel %vm255_vm14, %v253_v5, %v254_v40  ;;  %vm275_vm8 = vcmp.lt.s32.totalorder %v273_v41, %v274_v42 }
  0x2a   : > { %v298_v48 = vsel %vm2821_vm3, %v296_v44, 2147483647  ;;  %vm373_vm2 = vcmask 1041408   ;;  %v237_v49 = vrot.slane %v236_v46, 2  ;;  %v257_v26 = vrot.slane %v256_v47, 2 }
  0x2b   : > { %v276_v50 = vsel %vm275_vm8, %v273_v41, %v274_v42  ;;  %v299_v52 = vsel %vm2822_vm4, %v297_v45, 2147483647  ;;  %vm375_vm1 = vcmask 1042432   ;;  %v321_v54 = vsel %vm2824_vm5, %v320_v43, 2147483647 }
  0x2c   : > { %v277_v53 = vrot.slane %v276_v50, 2  ;;  %vm300_vm9 = vcmp.lt.s32.totalorder %v298_v48, %v299_v52  ;;  %vm339_vm10 = vcmp.eq.f32.partialorder %v1831_v27, %v1901_v38  ;;  %vm2826_vm11 = vcmask 1043456  }
  0x2d   : > { %vm238_vm12 = vcmp.lt.s32.totalorder %v236_v46, %v237_v49  ;;  %vm258_vm14 = vcmp.lt.s32.totalorder %v256_v47, %v257_v26  ;;  %v301_v28 = vsel %vm300_vm9, %v298_v48, %v299_v52  ;;  %v322_v55 = vrot.slane %v321_v54, 4 }
  0x2e   : > { %v239_v56 = vsel %vm238_vm12, %v236_v46, %v237_v49  ;;  %v259_v57 = vsel %vm258_vm14, %v256_v47, %v257_v26  ;;  %vm278_vm3 = vcmp.lt.s32.totalorder %v276_v50, %v277_v53  ;;  %v302_v58 = vrot.slane %v301_v28, 4  ;;  %v1962_v26 = vld [vmem:[%s1773_s16 + $0x48] sm:$0xff] }
  0x2f   : > { %vm379_vm8 = vcmask 1044480   ;;  %v240_v59 = vrot.slane %v239_v56, 1  ;;  %v260_v60 = vrot.slane %v259_v57, 1  ;;  %v279_v61 = vsel %vm278_vm3, %v276_v50, %v277_v53 }
  0x30   : > { %vm323_vm4 = vcmp.lt.s32.totalorder %v321_v54, %v322_v55  ;;  %vm2832_vm0 = vcmask 1045504   ;;  %v280_v63 = vrot.slane %v279_v61, 1  ;;  %vm303_vm5 = vcmp.lt.s32.totalorder %v301_v28, %v302_v58 }
  0x31   : > { %v324_v0 = vsel %vm323_vm4, %v321_v54, %v322_v55  ;;  %v340_v3 = vsel %vm339_vm10, %v1860_v51, 256  ;;  %vm2827_vm9 = vcmask 30720   ;;  %vm241_vm12 = vcmp.lt.s32.totalorder %v239_v56, %v240_v59 }
  0x32   : > { %vm261_vm14 = vcmp.lt.s32.totalorder %v259_v57, %v260_v60  ;;  %v304_v7 = vsel %vm303_vm5, %v301_v28, %v302_v58  ;;  %v325_v8 = vrot.slane %v324_v0, 2  ;;  %vm408_vm3 = vcmp.gt.f32.partialorder %v1928_v6, %v1867_v62 }
  0x33   : > { %v242_v9 = vsel %vm241_vm12, %v239_v56, %v240_v59  ;;  %v262_v21 = vsel %vm261_vm14, %v259_v57, %v260_v60  ;;  %vm281_vm13 = vcmp.lt.s32.totalorder %v279_v61, %v280_v63  ;;  %v305_v25 = vrot.slane %v304_v7, 2 }
  0x34   : > { %v282_v30 = vsel %vm281_vm13, %v279_v61, %v280_v63  ;;  %vm326_vm4 = vcmp.lt.s32.totalorder %v324_v0, %v325_v8  ;;  %v341_v33 = vsel %vm331_vm6, %v340_v3, 2147483647  ;;  %v357_v36 = vrot.slane %v1882_v31, 1 }
  0x35   : > { %vm306_vm10 = vcmp.lt.s32.totalorder %v304_v7, %v305_v25  ;;  %v327_v37 = vsel %vm326_vm4, %v324_v0, %v325_v8  ;;  %v342_v4 = vrot.slane %v341_v33, 4  ;;  %v372_v5 = vsel %vm371_vm15, %v1876_v17, %v1878_v18 }
  0x36   : > { %v307_v13 = vsel %vm306_vm10, %v304_v7, %v305_v25  ;;  %v328_v39 = vrot.slane %v327_v37, 1  ;;  %v358_v40 = vmax.f32 %v1882_v31, %v357_v36  ;;  %v374_v41 = vsel %vm373_vm2, %v372_v5, %v1880_v29 }
  0x37   : > { %v308_v42 = vrot.slane %v307_v13, 1  ;;  %vm343_vm5 = vcmp.lt.s32.totalorder %v341_v33, %v342_v4  ;;  %v376_v43 = vsel %vm375_vm1, %v374_v41, %v1906_v19  ;;  %v385_v44 = vsel %vm371_vm15, %v242_v9, %v262_v21 }
  0x38   : > { %vm329_vm13 = vcmp.lt.s32.totalorder %v327_v37, %v328_v39  ;;  %v344_v45 = vsel %vm343_vm5, %v341_v33, %v342_v4  ;;  %vm359_vm12 = vcmp.eq.f32.partialorder %v1831_v27, %v358_v40  ;;  %v378_v17 = vsel %vm2826_vm11, %v376_v43, %v1895_v34 }
  0x39   : > { %vm309_vm14 = vcmp.lt.s32.totalorder %v307_v13, %v308_v42  ;;  %v330_v18 = vsel %vm329_vm13, %v327_v37, %v328_v39  ;;  %v345_v29 = vrot.slane %v344_v45, 2  ;;  %v360_v31 = vsel %vm359_vm12, %v1860_v51, 256 }
  0x3a   : > { %v310_v19 = vsel %vm309_vm14, %v307_v13, %v308_v42  ;;  %v361_v46 = vsel %vm2834_vm7, %v360_v31, 2147483647  ;;  %v380_v27 = vsel %vm379_vm8, %v378_v17, %v1901_v38  ;;  %v386_v34 = vsel %vm373_vm2, %v385_v44, %v282_v30 }
  0x3b   : > { %vm346_vm4 = vcmp.lt.s32.totalorder %v344_v45, %v345_v29  ;;  %v362_v47 = vrot.slane %v361_v46, 4  ;;  %v382_v48 = vsel %vm2832_vm0, %v380_v27, %v358_v40  ;;  %v387_v49 = vsel %vm375_vm1, %v386_v34, %v310_v19 }
  0x3c   : > { %v347_v50 = vsel %vm346_vm4, %v344_v45, %v345_v29  ;;  %384 = vst.msk [vmem:[%s1952_s20] sm:$0x7f] %vm2827_vm9, %v382_v48  ;;  %v388_v51 = vsel %vm2826_vm11, %v387_v49, %v330_v18  ;;  %vm2835_vm10 = vcmp.gt.f32.partialorder %v1845_v35, %v1812_v22  ;;  %vm409_vm5 = vcmp.gt.f32.partialorder %v1962_v26, %v1874_v12 }
  0x3d   : > { %v404_v38 = vsel %vm2835_vm10, %v1799_v15, %v1796_v14  ;;  %v348_v52 = vrot.slane %v347_v50, 1  ;;  %vm363_vm13 = vcmp.lt.s32.totalorder %v361_v46, %v362_v47  ;;  %v1979_v53 = vsel %vm408_vm3, %v1928_v6, %v1867_v62 }
  0x3e   : > { %v1986_v54 = vsel %vm409_vm5, %v1962_v26, %v1874_v12  ;;  %v364_v14 = vsel %vm363_vm13, %v361_v46, %v362_v47  ;;  %v1993_v15 = vsel %vm408_vm3, %v1786_v10, %v1889_v32  ;;  %vm2836_vm12 = vcmask 26624  }
  0x3f   : > { %v416_v22 = vsel %vm2836_vm12, %v1979_v53, -inf  ;;  %vm2837_vm14 = vcmask 28674   ;;  %vm349_vm4 = vcmp.lt.s32.totalorder %v347_v50, %v348_v52  ;;  %v365_v28 = vrot.slane %v364_v14, 2 }
  0x40   : > { %v435_v35 = vsel %vm2837_vm14, %v1979_v53, -inf  ;;  %v417_v55 = vrot.slane %v416_v22, 4  ;;  %v350_v57 = vsel %vm349_vm4, %v347_v50, %v348_v52  ;;  %vm2838_vm10 = vcmask 30724  }
  0x41   : > { %v436_v56 = vrot.slane %v435_v35, 4  ;;  %v454_v58 = vsel %vm2838_vm10, %v1979_v53, -inf  ;;  %vm2839_vm13 = vcmask 31750   ;;  %vm2840_vm3 = vcmask 25600  }
  0x42   : > { %v473_v59 = vsel %vm2839_vm13, %v1979_v53, -inf  ;;  %v474_v62 = vsel %vm2840_vm3, %v1986_v54, -inf  ;;  %vm366_vm11 = vcmp.lt.s32.totalorder %v364_v14, %v365_v28  ;;  %v389_v32 = vsel %vm379_vm8, %v388_v51, %v350_v57 }
  0x43   : > { %v418_v60 = vmax.f32 %v416_v22, %v417_v55  ;;  %v437_v61 = vmax.f32 %v435_v35, %v436_v56  ;;  %v367_v63 = vsel %vm366_vm11, %v364_v14, %v365_v28  ;;  %v455_v0 = vrot.slane %v454_v58, 4 }
  0x44   : > { %v475_v3 = vmax.f32 %v473_v59, %v474_v62  ;;  %vm2841_vm12 = vcmask 27649   ;;  %v368_v8 = vrot.slane %v367_v63, 1  ;;  %v518_v36 = vsel %vm331_vm6, %v1986_v54, -inf }
  0x45   : > { %v499_v7 = vsel %vm2841_vm12, %v1986_v54, -inf  ;;  %v419_v9 = vrot.slane %v418_v60, 2  ;;  %v438_v21 = vrot.slane %v437_v61, 2  ;;  %v456_v30 = vmax.f32 %v454_v58, %v455_v0 }
  0x46   : > { %v500_v25 = vrot.slane %v499_v7, 4  ;;  %v476_v33 = vrot.slane %v475_v3, 4  ;;  %v537_v37 = vsel %vm2834_vm7, %v1986_v54, -inf  ;;  %vm369_vm11 = vcmp.lt.s32.totalorder %v367_v63, %v368_v8 }
  0x47   : > { %v420_v4 = vmax.f32 %v418_v60, %v419_v9  ;;  %v439_v5 = vmax.f32 %v437_v61, %v438_v21  ;;  %v370_v39 = vsel %vm369_vm11, %v367_v63, %v368_v8  ;;  %v457_v40 = vrot.slane %v456_v30, 2 }
  0x48   : > { %v501_v13 = vmax.f32 %v499_v7, %v500_v25  ;;  %v477_v41 = vmax.f32 %v475_v3, %v476_v33  ;;  %v519_v42 = vrot.slane %v518_v36, 4  ;;  %v390_v43 = vsel %vm2832_vm0, %v389_v32, %v370_v39 }
  0x49   : > { %v421_v44 = vrot.slane %v420_v4, 1  ;;  %v440_v45 = vrot.slane %v439_v5, 1  ;;  %391 = vst.msk [vmem:[%s2017_s23] sm:$0x7f] %vm2827_vm9, %v390_v43  ;;  %v458_v18 = vmax.f32 %v456_v30, %v457_v40  ;;  %v538_v19 = vrot.slane %v537_v37, 4 }
  0x4a   : > { %v502_v17 = vrot.slane %v501_v13, 2  ;;  %v478_v29 = vrot.slane %v477_v41, 2  ;;  %v520_v31 = vmax.f32 %v518_v36, %v519_v42  ;;  %v2026_v46 = vsel %vm409_vm5, %v1809_v20, %v404_v38 }
  0x4b   : > { %v422_v27 = vmax.f32 %v420_v4, %v421_v44  ;;  %v441_v34 = vmax.f32 %v439_v5, %v440_v45  ;;  %v459_v48 = vrot.slane %v458_v18, 1  ;;  %v539_v51 = vmax.f32 %v537_v37, %v538_v19 }
  0x4c   : > { %v503_v47 = vmax.f32 %v501_v13, %v502_v17  ;;  %v479_v49 = vmax.f32 %v477_v41, %v478_v29  ;;  %v521_v50 = vrot.slane %v520_v31, 2  ;;  %vm2842_vm5 = vcmask 26624   ;;  %v2062_v13 = vld [vmem:[%s1773_s16 + $0x50] sm:$0xff] }
  0x4d   : > { %vm423_vm14 = vcmp.eq.f32.partialorder %v1979_v53, %v422_v27  ;;  %vm442_vm4 = vcmp.eq.f32.partialorder %v1979_v53, %v441_v34  ;;  %v2031_v14 = vsel %vm371_vm15, %v422_v27, %v441_v34  ;;  %v2035_v38 = vmax.f32 %v458_v18, %v459_v48 }
  0x4e   : > { %v504_v52 = vrot.slane %v503_v47, 1  ;;  %v424_v22 = vsel %vm423_vm14, %v1993_v15, 256  ;;  %v443_v12 = vsel %vm442_vm4, %v1993_v15, 256  ;;  %v480_v35 = vrot.slane %v479_v49, 1 }
  0x4f   : > { %v425_v28 = vsel %vm2842_vm5, %v424_v22, 2147483647  ;;  %vm2843_vm10 = vcmask 28674   ;;  %v522_v57 = vmax.f32 %v520_v31, %v521_v50  ;;  %vm461_vm13 = vcmp.eq.f32.partialorder %v1979_v53, %v2035_v38 }
  0x50   : > { %v444_v55 = vsel %vm2843_vm10, %v443_v12, 2147483647  ;;  %v2039_v56 = vmax.f32 %v503_v47, %v504_v52  ;;  %v426_v58 = vrot.slane %v425_v28, 4  ;;  %v2043_v62 = vmax.f32 %v479_v49, %v480_v35 }
  0x51   : > { %v445_v59 = vrot.slane %v444_v55, 4  ;;  %v462_v32 = vsel %vm461_vm13, %v1993_v15, 256  ;;  %v523_v60 = vrot.slane %v522_v57, 1  ;;  %v540_v61 = vrot.slane %v539_v51, 2 }
  0x52   : > { %vm506_vm3 = vcmp.eq.f32.partialorder %v1986_v54, %v2039_v56  ;;  %vm427_vm12 = vcmp.lt.s32.totalorder %v425_v28, %v426_v58  ;;  %vm2844_vm14 = vcmask 30724   ;;  %vm482_vm4 = vcmp.eq.f32.partialorder %v1979_v53, %v2043_v62 }
  0x53   : > { %vm446_vm11 = vcmp.lt.s32.totalorder %v444_v55, %v445_v59  ;;  %v463_v63 = vsel %vm2844_vm14, %v462_v32, 2147483647  ;;  %v428_v0 = vsel %vm427_vm12, %v425_v28, %v426_v58  ;;  %vm483_vm5 = vcmp.eq.f32.partialorder %v1986_v54, %v2043_v62 }
  0x54   : > { %v447_v3 = vsel %vm446_vm11, %v444_v55, %v445_v59  ;;  %v464_v7 = vrot.slane %v463_v63, 4  ;;  %v429_v8 = vrot.slane %v428_v0, 2  ;;  %v484_v21 = vsel %vm482_vm4, %v1993_v15, 256  ;;  %v1637_v59 = vld [vmem:[%s1773_s16 + $0x58] sm:$0xff] }
  0x55   : > { %v448_v9 = vrot.slane %v447_v3, 2  ;;  %v485_v25 = vsel %vm483_vm5, %v2026_v46, 256  ;;  %vm2845_vm13 = vcmask 31750   ;;  %vm2846_vm14 = vcmask 25600  }
  0x56   : > { %vm465_vm10 = vcmp.lt.s32.totalorder %v463_v63, %v464_v7  ;;  %v486_v30 = vsel %vm2845_vm13, %v484_v21, 2147483647  ;;  %v487_v33 = vsel %vm2846_vm14, %v485_v25, 2147483647  ;;  %v507_v53 = vsel %vm506_vm3, %v2026_v46, 256 }
  0x57   : > { %vm430_vm12 = vcmp.lt.s32.totalorder %v428_v0, %v429_v8  ;;  %vm449_vm11 = vcmp.lt.s32.totalorder %v447_v3, %v448_v9  ;;  %v466_v36 = vsel %vm465_vm10, %v463_v63, %v464_v7  ;;  %vm488_vm9 = vcmp.lt.s32.totalorder %v486_v30, %v487_v33 }
  0x58   : > { %v431_v37 = vsel %vm430_vm12, %v428_v0, %v429_v8  ;;  %v450_v4 = vsel %vm449_vm11, %v447_v3, %v448_v9  ;;  %v467_v5 = vrot.slane %v466_v36, 2  ;;  %v489_v15 = vsel %vm488_vm9, %v486_v30, %v487_v33 }
  0x59   : > { %v432_v39 = vrot.slane %v431_v37, 1  ;;  %v451_v40 = vrot.slane %v450_v4, 1  ;;  %v490_v41 = vrot.slane %v489_v15, 4  ;;  %vm2847_vm4 = vcmask 27649  }
  0x5a   : > { %v508_v42 = vsel %vm2847_vm4, %v507_v53, 2147483647  ;;  %vm468_vm5 = vcmp.lt.s32.totalorder %v466_v36, %v467_v5  ;;  %v524_v44 = vmax.f32 %v522_v57, %v523_v60  ;;  %v541_v45 = vmax.f32 %v539_v51, %v540_v61 }
  0x5b   : > { %v509_v43 = vrot.slane %v508_v42, 4  ;;  %vm433_vm3 = vcmp.lt.s32.totalorder %v431_v37, %v432_v39  ;;  %vm452_vm13 = vcmp.lt.s32.totalorder %v450_v4, %v451_v40  ;;  %v469_v17 = vsel %vm468_vm5, %v466_v36, %v467_v5  ;;  %v2112_v5 = vld [vmem:[%s1773_s16 + $0x70] sm:$0xff] }
  0x5c   : > { %vm491_vm10 = vcmp.lt.s32.totalorder %v489_v15, %v490_v41  ;;  %vm577_vm14 = vcmp.gt.f32.partialorder %v2062_v13, %v1928_v6  ;;  %v434_v18 = vsel %vm433_vm3, %v431_v37, %v432_v39  ;;  %v453_v29 = vsel %vm452_vm13, %v450_v4, %v451_v40  ;;  %v2106_v37 = vld [vmem:[%s1773_s16 + $0x60] sm:$0xff]  ;;  %v2109_v4 = vld [vmem:[%s1773_s16 + $0x68] sm:$0xff] }
  0x5d   : > { %v470_v31 = vrot.slane %v469_v17, 1  ;;  %v492_v19 = vsel %vm491_vm10, %v489_v15, %v490_v41  ;;  %vm510_vm9 = vcmp.lt.s32.totalorder %v508_v42, %v509_v43  ;;  %vm525_vm12 = vcmp.eq.f32.partialorder %v1986_v54, %v524_v44 }
  0x5e   : > { %v493_v27 = vrot.slane %v492_v19, 2  ;;  %v542_v34 = vrot.slane %v541_v45, 1  ;;  %v511_v47 = vsel %vm510_vm9, %v508_v42, %v509_v43  ;;  %v526_v48 = vsel %vm525_vm12, %v2026_v46, 256 }
  0x5f   : > { %vm471_vm11 = vcmp.lt.s32.totalorder %v469_v17, %v470_v31  ;;  %v557_v49 = vsel %vm373_vm2, %v2031_v14, %v2035_v38  ;;  %v512_v51 = vrot.slane %v511_v47, 2  ;;  %v527_v52 = vsel %vm331_vm6, %v526_v48, 2147483647 }
  0x60   : > { %v472_v50 = vsel %vm471_vm11, %v469_v17, %v470_v31  ;;  %vm494_vm4 = vcmp.lt.s32.totalorder %v492_v19, %v493_v27  ;;  %v528_v12 = vrot.slane %v527_v52, 4  ;;  %v543_v35 = vmax.f32 %v541_v45, %v542_v34 }
  0x61   : > { %v495_v22 = vsel %vm494_vm4, %v492_v19, %v493_v27  ;;  %v558_v28 = vsel %vm375_vm1, %v557_v49, %v2043_v62  ;;  %vm513_vm5 = vcmp.lt.s32.totalorder %v511_v47, %v512_v51  ;;  %vm2848_vm3 = vcmask 1043456  }
  0x62   : > { %v496_v55 = vrot.slane %v495_v22, 1  ;;  %v559_v57 = vsel %vm2848_vm3, %v558_v28, %v2039_v56  ;;  %v564_v58 = vsel %vm371_vm15, %v434_v18, %v453_v29  ;;  %v514_v14 = vsel %vm513_vm5, %v511_v47, %v512_v51  ;;  %v2148_v28 = vld [vmem:[%s1773_s16 + $0x78] sm:$0xff] }
  0x63   : > { %vm529_vm13 = vcmp.lt.s32.totalorder %v527_v52, %v528_v12  ;;  %vm544_vm10 = vcmp.eq.f32.partialorder %v1986_v54, %v543_v35  ;;  %v560_v38 = vsel %vm379_vm8, %v559_v57, %v524_v44  ;;  %v515_v32 = vrot.slane %v514_v14, 1 }
  0x64   : > { %vm497_vm9 = vcmp.lt.s32.totalorder %v495_v22, %v496_v55  ;;  %v530_v60 = vsel %vm529_vm13, %v527_v52, %v528_v12  ;;  %v545_v62 = vsel %vm544_vm10, %v2026_v46, 256  ;;  %v561_v56 = vsel %vm2832_vm0, %v560_v38, %v543_v35 }
  0x65   : > { %v498_v61 = vsel %vm497_vm9, %v495_v22, %v496_v55  ;;  %v531_v63 = vrot.slane %v530_v60, 2  ;;  %v546_v0 = vsel %vm2834_vm7, %v545_v62, 2147483647  ;;  %vm516_vm12 = vcmp.lt.s32.totalorder %v514_v14, %v515_v32 }
  0x66   : > { %v547_v3 = vrot.slane %v546_v0, 4  ;;  %vm2849_vm11 = vcmask 30720   ;;  %v565_v54 = vsel %vm373_vm2, %v564_v58, %v472_v50  ;;  %vm578_vm4 = vcmp.gt.f32.partialorder %v1637_v59, %v1962_v26 }
  0x67   : > { %1632 = vst.msk [vmem:[%s1952_s20 + $0x8] sm:$0x7f] %vm2849_vm11, %v561_v56  ;;  %v517_v7 = vsel %vm516_vm12, %v514_v14, %v515_v32  ;;  %vm532_vm5 = vcmp.lt.s32.totalorder %v530_v60, %v531_v63  ;;  %v566_v46 = vsel %vm375_vm1, %v565_v54, %v498_v61  ;;  %v579_v8 = vsel %vm577_vm14, %v2062_v13, %v1928_v6 }
  0x68   : > { %v533_v9 = vsel %vm532_vm5, %v530_v60, %v531_v63  ;;  %vm548_vm3 = vcmp.lt.s32.totalorder %v546_v0, %v547_v3  ;;  %v580_v21 = vsel %vm578_vm4, %v1637_v59, %v1962_v26  ;;  %v2096_v25 = vadd.s32 112, %v1763_v1 }
  0x69   : > { %v534_v30 = vrot.slane %v533_v9, 1  ;;  %v549_v33 = vsel %vm548_vm3, %v546_v0, %v547_v3  ;;  %v583_v53 = vsel %vm577_vm14, %v1789_v11, %v1786_v10  ;;  %v584_v36 = vsel %vm578_vm4, %v1816_v23, %v1809_v20 }
  0x6a   : > { %v550_v26 = vrot.slane %v549_v33, 2  ;;  %vm2850_vm13 = vcmask 1043456   ;;  %vm588_vm10 = vcmp.gt.f32.partialorder %v2106_v37, %v579_v8  ;;  %vm589_vm9 = vcmp.gt.f32.partialorder %v2109_v4, %v580_v21 }
  0x6b   : > { %v567_v15 = vsel %vm2850_vm13, %v566_v46, %v517_v7  ;;  %vm535_vm12 = vcmp.lt.s32.totalorder %v533_v9, %v534_v30  ;;  %v2118_v6 = vsel %vm588_vm10, %v2106_v37, %v579_v8  ;;  %v2121_v10 = vsel %vm589_vm9, %v2109_v4, %v580_v21 }
  0x6c   : > { %v2124_v11 = vsel %vm588_vm10, %v1802_v16, %v583_v53  ;;  %v536_v20 = vsel %vm535_vm12, %v533_v9, %v534_v30  ;;  %vm551_vm14 = vcmp.lt.s32.totalorder %v549_v33, %v550_v26  ;;  %v2127_v23 = vsel %vm589_vm9, %v1819_v24, %v584_v36 }
  0x6d   : > { %vm2851_vm11 = vcmask 26624   ;;  %vm2829_vm4 = vcmp.gt.f32.partialorder %v2112_v5, %v2106_v37  ;;  %v552_v39 = vsel %vm551_vm14, %v549_v33, %v550_v26  ;;  %v568_v40 = vsel %vm379_vm8, %v567_v15, %v536_v20 }
  0x6e   : > { %v596_v13 = vsel %vm2851_vm11, %v2118_v6, -inf  ;;  %vm2852_vm5 = vcmask 28674   ;;  %v553_v43 = vrot.slane %v552_v39, 1  ;;  %vm2853_vm3 = vcmask 30724  }
  0x6f   : > { %v597_v41 = vrot.slane %v596_v13, 4  ;;  %v615_v42 = vsel %vm2852_vm5, %v2118_v6, -inf  ;;  %v634_v45 = vsel %vm2853_vm3, %v2118_v6, -inf  ;;  %vm2854_vm13 = vcmask 31750  }
  0x70   : > { %v616_v44 = vrot.slane %v615_v42, 4  ;;  %v653_v17 = vsel %vm2854_vm13, %v2118_v6, -inf  ;;  %v635_v29 = vrot.slane %v634_v45, 4  ;;  %vm2855_vm10 = vcmask 25600  }
  0x71   : > { %v598_v18 = vmax.f32 %v596_v13, %v597_v41  ;;  %v654_v31 = vsel %vm2855_vm10, %v2121_v10, -inf  ;;  %vm2856_vm9 = vcmask 27649   ;;  %vm554_vm12 = vcmp.lt.s32.totalorder %v552_v39, %v553_v43 }
  0x72   : > { %v679_v19 = vsel %vm2856_vm9, %v2121_v10, -inf  ;;  %v617_v27 = vmax.f32 %v615_v42, %v616_v44  ;;  %v655_v34 = vmax.f32 %v653_v17, %v654_v31  ;;  %v555_v48 = vsel %vm554_vm12, %v552_v39, %v553_v43 }
  0x73   : > { %v680_v47 = vrot.slane %v679_v19, 4  ;;  %v599_v49 = vrot.slane %v598_v18, 2  ;;  %v636_v50 = vmax.f32 %v634_v45, %v635_v29  ;;  %v698_v51 = vsel %vm331_vm6, %v2121_v10, -inf }
  0x74   : > { %v569_v52 = vsel %vm2832_vm0, %v568_v40, %v555_v48  ;;  %v618_v22 = vrot.slane %v617_v27, 2  ;;  %v656_v12 = vrot.slane %v655_v34, 4  ;;  %vm2857_vm14 = vcmask 30720  }
  0x75   : > { %v681_v35 = vmax.f32 %v679_v19, %v680_v47  ;;  %1633 = vst.msk [vmem:[%s2017_s23 + $0x8] sm:$0x7f] %vm2857_vm14, %v569_v52  ;;  %v600_v55 = vmax.f32 %v598_v18, %v599_v49  ;;  %v637_v57 = vrot.slane %v636_v50, 2  ;;  %v699_v58 = vrot.slane %v698_v51, 4 }
  0x76   : > { %v717_v14 = vsel %vm2834_vm7, %v2121_v10, -inf  ;;  %v619_v38 = vmax.f32 %v617_v27, %v618_v22  ;;  %v657_v59 = vmax.f32 %v655_v34, %v656_v12  ;;  %vm2828_vm11 = vcmp.gt.f32.partialorder %v2148_v28, %v2109_v4 }
  0x77   : > { %v682_v32 = vrot.slane %v681_v35, 2  ;;  %v718_v60 = vrot.slane %v717_v14, 4  ;;  %v601_v62 = vrot.slane %v600_v55, 1  ;;  %v638_v61 = vmax.f32 %v636_v50, %v637_v57 }
  0x78   : > { %v700_v63 = vmax.f32 %v698_v51, %v699_v58  ;;  %v620_v0 = vrot.slane %v619_v38, 1  ;;  %v658_v56 = vrot.slane %v657_v59, 2  ;;  %v2165_v9 = vsel %vm2829_vm4, %v2112_v5, %v2106_v37 }
  0x79   : > { %v683_v3 = vmax.f32 %v681_v35, %v682_v32  ;;  %v2156_v54 = vmax.f32 %v717_v14, %v718_v60  ;;  %v2158_v7 = vmax.f32 %v600_v55, %v601_v62  ;;  %v639_v46 = vrot.slane %v638_v61, 1 }
  0x7a   : > { %v701_v8 = vrot.slane %v700_v63, 2  ;;  %v2167_v21 = vmax.f32 %v619_v38, %v620_v0  ;;  %v659_v30 = vmax.f32 %v657_v59, %v658_v56  ;;  %v2179_v15 = vsel %vm2828_vm11, %v2148_v28, %v2109_v4 }
  0x7b   : > { %v684_v33 = vrot.slane %v683_v3, 1  ;;  %v720_v53 = vrot.slane %v2156_v54, 2  ;;  %vm603_vm5 = vcmp.eq.f32.partialorder %v2118_v6, %v2158_v7  ;;  %v2172_v36 = vmax.f32 %v638_v61, %v639_v46 }
  0x7c   : > { %v702_v26 = vmax.f32 %v700_v63, %v701_v8  ;;  %v604_v20 = vsel %vm603_vm5, %v2124_v11, 256  ;;  %vm622_vm3 = vcmp.eq.f32.partialorder %v2118_v6, %v2167_v21  ;;  %v660_v13 = vrot.slane %v659_v30, 1 }
  0x7d   : > { %v2184_v39 = vmax.f32 %v683_v3, %v684_v33  ;;  %vm2858_vm13 = vcmask 26624   ;;  %v623_v41 = vsel %vm622_vm3, %v2124_v11, 256  ;;  %vm641_vm10 = vcmp.eq.f32.partialorder %v2118_v6, %v2172_v36 }
  0x7e   : > { %v605_v40 = vsel %vm2858_vm13, %v604_v20, 2147483647  ;;  %v703_v42 = vrot.slane %v702_v26, 1  ;;  %vm2859_vm9 = vcmask 28674   ;;  %v642_v45 = vsel %vm641_vm10, %v2124_v11, 256 }
  0x7f   : > { %v606_v43 = vrot.slane %v605_v40, 4  ;;  %v624_v44 = vsel %vm2859_vm9, %v623_v41, 2147483647  ;;  %v2192_v17 = vmax.f32 %v659_v30, %v660_v13  ;;  %vm2860_vm12 = vcmask 30724  }
  0x80   : > { %v625_v18 = vrot.slane %v624_v44, 4  ;;  %v643_v29 = vsel %vm2860_vm12, %v642_v45, 2147483647  ;;  %vm686_vm14 = vcmp.eq.f32.partialorder %v2121_v10, %v2184_v39  ;;  %v2197_v31 = vmax.f32 %v702_v26, %v703_v42 }
  0x81   : > { %vm607_vm5 = vcmp.lt.s32.totalorder %v605_v40, %v606_v43  ;;  %v644_v19 = vrot.slane %v643_v29, 4  ;;  %vm662_vm3 = vcmp.eq.f32.partialorder %v2118_v6, %v2192_v17  ;;  %vm663_vm13 = vcmp.eq.f32.partialorder %v2121_v10, %v2192_v17 }
  0x82   : > { %v608_v27 = vsel %vm607_vm5, %v605_v40, %v606_v43  ;;  %vm626_vm10 = vcmp.lt.s32.totalorder %v624_v44, %v625_v18  ;;  %v664_v34 = vsel %vm662_vm3, %v2124_v11, 256  ;;  %v665_v47 = vsel %vm663_vm13, %v2127_v23, 256 }
  0x83   : > { %v609_v48 = vrot.slane %v608_v27, 2  ;;  %v627_v49 = vsel %vm626_vm10, %v624_v44, %v625_v18  ;;  %vm645_vm9 = vcmp.lt.s32.totalorder %v643_v29, %v644_v19  ;;  %vm2861_vm12 = vcmask 31750  }
  0x84   : > { %v666_v50 = vsel %vm2861_vm12, %v664_v34, 2147483647  ;;  %v628_v51 = vrot.slane %v627_v49, 2  ;;  %v646_v52 = vsel %vm645_vm9, %v643_v29, %v644_v19  ;;  %vm2862_vm11 = vcmask 25600   ;;  %v1646_v34 = vld [vmem:[%s1773_s16 + $0x80] sm:$0xff] }
  0x85   : > { %v667_v22 = vsel %vm2862_vm11, %v665_v47, 2147483647  ;;  %v687_v6 = vsel %vm686_vm14, %v2127_v23, 256  ;;  %vm610_vm5 = vcmp.lt.s32.totalorder %v608_v27, %v609_v48  ;;  %v647_v12 = vrot.slane %v646_v52, 2 }
  0x86   : > { %vm668_vm4 = vcmp.lt.s32.totalorder %v666_v50, %v667_v22  ;;  %vm2863_vm3 = vcmask 27649   ;;  %v611_v35 = vsel %vm610_vm5, %v608_v27, %v609_v48  ;;  %vm629_vm13 = vcmp.lt.s32.totalorder %v627_v49, %v628_v51 }
  0x87   : > { %v688_v11 = vsel %vm2863_vm3, %v687_v6, 2147483647  ;;  %v669_v55 = vsel %vm668_vm4, %v666_v50, %v667_v22  ;;  %v612_v58 = vrot.slane %v611_v35, 1  ;;  %v630_v14 = vsel %vm629_vm13, %v627_v49, %v628_v51  ;;  %v1647_v49 = vld [vmem:[%s1773_s16 + $0x88] sm:$0xff] }
  0x88   : > { %v689_v57 = vrot.slane %v688_v11, 4  ;;  %vm648_vm10 = vcmp.lt.s32.totalorder %v646_v52, %v647_v12  ;;  %v670_v38 = vrot.slane %v669_v55, 4  ;;  %v631_v59 = vrot.slane %v630_v14, 1 }
  0x89   : > { %v649_v32 = vsel %vm648_vm10, %v646_v52, %v647_v12  ;;  %vm705_vm9 = vcmp.eq.f32.partialorder %v2121_v10, %v2197_v31  ;;  %vm613_vm14 = vcmp.lt.s32.totalorder %v611_v35, %v612_v58  ;;  %v721_v33 = vmax.f32 %v2156_v54, %v720_v53 }
  0x8a   : > { %vm690_vm11 = vcmp.lt.s32.totalorder %v688_v11, %v689_v57  ;;  %v650_v60 = vrot.slane %v649_v32, 1  ;;  %vm671_vm12 = vcmp.lt.s32.totalorder %v669_v55, %v670_v38  ;;  %v614_v61 = vsel %vm613_vm14, %v611_v35, %v612_v58 }
  0x8b   : > { %v691_v62 = vsel %vm690_vm11, %v688_v11, %v689_v57  ;;  %vm632_vm3 = vcmp.lt.s32.totalorder %v630_v14, %v631_v59  ;;  %v672_v63 = vsel %vm671_vm12, %v669_v55, %v670_v38  ;;  %v706_v46 = vsel %vm705_vm9, %v2127_v23, 256 }
  0x8c   : > { %v692_v0 = vrot.slane %v691_v62, 2  ;;  %v633_v56 = vsel %vm632_vm3, %v630_v14, %v631_v59  ;;  %vm651_vm4 = vcmp.lt.s32.totalorder %v649_v32, %v650_v60  ;;  %v673_v3 = vrot.slane %v672_v63, 2 }
  0x8d   : > { %v652_v8 = vsel %vm651_vm4, %v649_v32, %v650_v60  ;;  %v707_v30 = vsel %vm331_vm6, %v706_v46, 2147483647  ;;  %v736_v13 = vsel %vm371_vm15, %v2158_v7, %v2167_v21  ;;  %v722_v42 = vrot.slane %v721_v33, 1 }
  0x8e   : > { %vm693_vm5 = vcmp.lt.s32.totalorder %v691_v62, %v692_v0  ;;  %vm674_vm13 = vcmp.lt.s32.totalorder %v672_v63, %v673_v3  ;;  %v708_v20 = vrot.slane %v707_v30, 4  ;;  %v737_v43 = vsel %vm373_vm2, %v736_v13, %v2172_v36 }
  0x8f   : > { %v694_v26 = vsel %vm693_vm5, %v691_v62, %v692_v0  ;;  %v675_v40 = vsel %vm674_vm13, %v672_v63, %v673_v3  ;;  %v738_v45 = vsel %vm375_vm1, %v737_v43, %v2192_v17  ;;  %v744_v54 = vsel %vm371_vm15, %v614_v61, %v633_v56 }
  0x90   : > { %v695_v41 = vrot.slane %v694_v26, 1  ;;  %v676_v44 = vrot.slane %v675_v40, 1  ;;  %vm709_vm10 = vcmp.lt.s32.totalorder %v707_v30, %v708_v20  ;;  %v723_v18 = vmax.f32 %v721_v33, %v722_v42 }
  0x91   : > { %v710_v53 = vsel %vm709_vm10, %v707_v30, %v708_v20  ;;  %vm2864_vm9 = vcmask 1043456   ;;  %v745_v27 = vsel %vm373_vm2, %v744_v54, %v652_v8  ;;  %vm2865_vm4 = vcmask 30720  }
  0x92   : > { %vm696_vm11 = vcmp.lt.s32.totalorder %v694_v26, %v695_v41  ;;  %v739_v7 = vsel %vm2864_vm9, %v738_v45, %v2184_v39  ;;  %vm677_vm14 = vcmp.lt.s32.totalorder %v675_v40, %v676_v44  ;;  %v711_v29 = vrot.slane %v710_v53, 2  ;;  %vm2866_vm5 = vmmov %vm2864_vm9 }
  0x93   : > { %v697_v21 = vsel %vm696_vm11, %v694_v26, %v695_v41  ;;  %v740_v36 = vsel %vm379_vm8, %v739_v7, %v2197_v31  ;;  %v678_v19 = vsel %vm677_vm14, %v675_v40, %v676_v44  ;;  %vm724_vm12 = vcmp.eq.f32.partialorder %v2121_v10, %v723_v18 }
  0x94   : > { %v741_v17 = vsel %vm2832_vm0, %v740_v36, %v723_v18  ;;  %vm712_vm3 = vcmp.lt.s32.totalorder %v710_v53, %v711_v29  ;;  %v725_v47 = vsel %vm724_vm12, %v2127_v23, 256  ;;  %v746_v39 = vsel %vm375_vm1, %v745_v27, %v678_v19 }
  0x95   : > { %1640 = vst.msk [vmem:[%s1952_s20 + $0x10] sm:$0x7f] %vm2865_vm4, %v741_v17  ;;  %v762_v48 = vadd.s32 112, %v1767_v2  ;;  %v713_v31 = vsel %vm712_vm3, %v710_v53, %v711_v29  ;;  %v726_v50 = vsel %vm2834_vm7, %v725_v47, 2147483647  ;;  %v747_v10 = vsel %vm2866_vm5, %v746_v39, %v697_v21 }
  0x96   : > { %vm2867_vm13 = vcmp.gt.f32.partialorder %v2112_v5, %v2106_v37  ;;  %v714_v23 = vrot.slane %v713_v31, 1  ;;  %v727_v52 = vrot.slane %v726_v50, 4  ;;  %vm2868_vm10 = vcmp.gt.f32.partialorder %v2148_v28, %v2109_v4  ;;  %v2258_v37 = vld [vmem:[%s1773_s16 + $0x90] sm:$0xff]  ;;  %v2265_v4 = vld [vmem:[%s1773_s16 + $0x98] sm:$0xff] }
  0x97   : > { %v763_v51 = vsel %vm2867_vm13, %v2096_v25, %v1802_v16  ;;  %v764_v22 = vsel %vm2868_vm10, %v762_v48, %v1819_v24  ;;  %vm768_vm11 = vcmp.gt.f32.partialorder %v1646_v34, %v2165_v9  ;;  %vm769_vm9 = vcmp.gt.f32.partialorder %v1647_v49, %v2179_v15 }
  0x98   : > { %v770_v6 = vsel %vm768_vm11, %v1646_v34, %v2165_v9  ;;  %v772_v12 = vadd.s32 128, %v1763_v1  ;;  %v773_v11 = vadd.s32 128, %v1767_v2  ;;  %vm715_vm14 = vcmp.lt.s32.totalorder %v713_v31, %v714_v23 }
  0x99   : > { %vm728_vm12 = vcmp.lt.s32.totalorder %v726_v50, %v727_v52  ;;  %v771_v16 = vsel %vm769_vm9, %v1647_v49, %v2179_v15  ;;  %vm779_vm3 = vcmp.gt.f32.partialorder %v2258_v37, %v770_v6  ;;  %v716_v24 = vsel %vm715_vm14, %v713_v31, %v714_v23 }
  0x9a   : > { %v729_v25 = vsel %vm728_vm12, %v726_v50, %v727_v52  ;;  %v774_v28 = vsel %vm768_vm11, %v772_v12, %v763_v51  ;;  %vm780_vm4 = vcmp.gt.f32.partialorder %v2265_v4, %v771_v16  ;;  %v2271_v9 = vsel %vm779_vm3, %v2258_v37, %v770_v6 }
  0x9b   : > { %v730_v5 = vrot.slane %v729_v25, 2  ;;  %v748_v35 = vsel %vm379_vm8, %v747_v10, %v716_v24  ;;  %v775_v55 = vsel %vm769_vm9, %v773_v11, %v764_v22  ;;  %v2279_v57 = vsel %vm780_vm4, %v2265_v4, %v771_v16 }
  0x9c   : > { %vm2869_vm5 = vcmask 26624   ;;  %vm2870_vm10 = vcmask 28674   ;;  %vm2871_vm11 = vcmask 30724   ;;  %v2288_v15 = vadd.s32 144, %v1763_v1 }
  0x9d   : > { %v787_v58 = vsel %vm2869_vm5, %v2271_v9, -inf  ;;  %vm731_vm13 = vcmp.lt.s32.totalorder %v729_v25, %v730_v5  ;;  %v806_v38 = vsel %vm2870_vm10, %v2271_v9, -inf  ;;  %v825_v59 = vsel %vm2871_vm11, %v2271_v9, -inf }
  0x9e   : > { %v788_v14 = vrot.slane %v787_v58, 4  ;;  %v732_v32 = vsel %vm731_vm13, %v729_v25, %v730_v5  ;;  %v2291_v60 = vadd.s32 144, %v1767_v2  ;;  %v807_v62 = vrot.slane %v806_v38, 4 }
  0x9f   : > { %v733_v61 = vrot.slane %v732_v32, 1  ;;  %v826_v0 = vrot.slane %v825_v59, 4  ;;  %vm2872_vm9 = vcmask 31750   ;;  %vm2873_vm14 = vcmask 25600  }
  0xa0   : > { %v789_v63 = vmax.f32 %v787_v58, %v788_v14  ;;  %v844_v56 = vsel %vm2872_vm9, %v2271_v9, -inf  ;;  %v808_v3 = vmax.f32 %v806_v38, %v807_v62  ;;  %v845_v46 = vsel %vm2873_vm14, %v2279_v57, -inf }
  0xa1   : > { %vm2874_vm12 = vcmask 27649   ;;  %v889_v30 = vsel %vm331_vm6, %v2279_v57, -inf  ;;  %vm734_vm5 = vcmp.lt.s32.totalorder %v732_v32, %v733_v61  ;;  %v827_v26 = vmax.f32 %v825_v59, %v826_v0 }
  0xa2   : > { %v870_v8 = vsel %vm2874_vm12, %v2279_v57, -inf  ;;  %v790_v33 = vrot.slane %v789_v63, 2  ;;  %v846_v20 = vmax.f32 %v844_v56, %v845_v46  ;;  %v735_v13 = vsel %vm734_vm5, %v732_v32, %v733_v61 }
  0xa3   : > { %v809_v40 = vrot.slane %v808_v3, 2  ;;  %v871_v41 = vrot.slane %v870_v8, 4  ;;  %v890_v42 = vrot.slane %v889_v30, 4  ;;  %v749_v43 = vsel %vm2832_vm0, %v748_v35, %v735_v13 }
  0xa4   : > { %v791_v44 = vmax.f32 %v789_v63, %v790_v33  ;;  %v828_v45 = vrot.slane %v827_v26, 2  ;;  %v847_v54 = vrot.slane %v846_v20, 4  ;;  %vm2875_vm13 = vcmask 30720  }
  0xa5   : > { %1641 = vst.msk [vmem:[%s2017_s23 + $0x10] sm:$0x7f] %vm2875_vm13, %v749_v43  ;;  %v810_v53 = vmax.f32 %v808_v3, %v809_v40  ;;  %v872_v18 = vmax.f32 %v870_v8, %v871_v41  ;;  %v891_v7 = vmax.f32 %v889_v30, %v890_v42  ;;  %v908_v21 = vsel %vm2834_vm7, %v2279_v57, -inf  ;;  %v2349_v40 = vld [vmem:[%s1773_s16 + $0xa0] sm:$0xff] }
  0xa6   : > { %v792_v29 = vrot.slane %v791_v44, 1  ;;  %v829_v36 = vmax.f32 %v827_v26, %v828_v45  ;;  %v848_v19 = vmax.f32 %v846_v20, %v847_v54  ;;  %v909_v17 = vrot.slane %v908_v21, 4  ;;  %v2353_v54 = vld [vmem:[%s1773_s16 + $0xa8] sm:$0xff] }
  0xa7   : > { %v785_v27 = vsel %vm779_vm3, %v2288_v15, %v774_v28  ;;  %v811_v34 = vrot.slane %v810_v53, 1  ;;  %v873_v47 = vrot.slane %v872_v18, 2  ;;  %v892_v39 = vrot.slane %v891_v7, 2 }
  0xa8   : > { %v2309_v48 = vmax.f32 %v791_v44, %v792_v29  ;;  %v830_v49 = vrot.slane %v829_v36, 1  ;;  %v849_v31 = vrot.slane %v848_v19, 2  ;;  %v910_v50 = vmax.f32 %v908_v21, %v909_v17 }
  0xa9   : > { %v2314_v10 = vsel %vm780_vm4, %v2291_v60, %v775_v55  ;;  %v2316_v51 = vmax.f32 %v810_v53, %v811_v34  ;;  %v874_v23 = vmax.f32 %v872_v18, %v873_v47  ;;  %v893_v52 = vmax.f32 %v891_v7, %v892_v39 }
  0xaa   : > { %vm794_vm3 = vcmp.eq.f32.partialorder %v2271_v9, %v2309_v48  ;;  %v2320_v22 = vmax.f32 %v829_v36, %v830_v49  ;;  %v850_v6 = vmax.f32 %v848_v19, %v849_v31  ;;  %v911_v12 = vrot.slane %v910_v50, 2 }
  0xab   : > { %v795_v11 = vsel %vm794_vm3, %v785_v27, 256  ;;  %vm813_vm10 = vcmp.eq.f32.partialorder %v2271_v9, %v2316_v51  ;;  %v875_v24 = vrot.slane %v874_v23, 1  ;;  %v894_v25 = vrot.slane %v893_v52, 1 }
  0xac   : > { %vm2876_vm11 = vcmask 26624   ;;  %v814_v5 = vsel %vm813_vm10, %v785_v27, 256  ;;  %vm832_vm4 = vcmp.eq.f32.partialorder %v2271_v9, %v2320_v22  ;;  %v851_v28 = vrot.slane %v850_v6, 1 }
  0xad   : > { %v796_v16 = vsel %vm2876_vm11, %v795_v11, 2147483647  ;;  %vm2877_vm9 = vcmask 28674   ;;  %v833_v58 = vsel %vm832_vm4, %v785_v27, 256  ;;  %v2328_v14 = vmax.f32 %v874_v23, %v875_v24 }
  0xae   : > { %v797_v35 = vrot.slane %v796_v16, 4  ;;  %v815_v55 = vsel %vm2877_vm9, %v814_v5, 2147483647  ;;  %vm2878_vm14 = vcmask 30724   ;;  %v2331_v32 = vmax.f32 %v850_v6, %v851_v28 }
  0xaf   : > { %v816_v38 = vrot.slane %v815_v55, 4  ;;  %v834_v59 = vsel %vm2878_vm14, %v833_v58, 2147483647  ;;  %v2333_v62 = vmax.f32 %v893_v52, %v894_v25  ;;  %vm877_vm5 = vcmp.eq.f32.partialorder %v2279_v57, %v2328_v14 }
  0xb0   : > { %vm798_vm12 = vcmp.lt.s32.totalorder %v796_v16, %v797_v35  ;;  %v835_v61 = vrot.slane %v834_v59, 4  ;;  %v912_v63 = vmax.f32 %v910_v50, %v911_v12  ;;  %vm853_vm3 = vcmp.eq.f32.partialorder %v2271_v9, %v2331_v32 }
  0xb1   : > { %v799_v0 = vsel %vm798_vm12, %v796_v16, %v797_v35  ;;  %vm817_vm13 = vcmp.lt.s32.totalorder %v815_v55, %v816_v38  ;;  %vm854_vm10 = vcmp.eq.f32.partialorder %v2279_v57, %v2331_v32  ;;  %v855_v46 = vsel %vm853_vm3, %v785_v27, 256 }
  0xb2   : > { %v800_v56 = vrot.slane %v799_v0, 2  ;;  %v818_v3 = vsel %vm817_vm13, %v815_v55, %v816_v38  ;;  %vm836_vm11 = vcmp.lt.s32.totalorder %v834_v59, %v835_v61  ;;  %v856_v33 = vsel %vm854_vm10, %v2314_v10, 256 }
  0xb3   : > { %v819_v8 = vrot.slane %v818_v3, 2  ;;  %v837_v30 = vsel %vm836_vm11, %v834_v59, %v835_v61  ;;  %vm2879_vm4 = vcmask 31750   ;;  %vm2880_vm14 = vcmask 25600  }
  0xb4   : > { %v857_v26 = vsel %vm2879_vm4, %v855_v46, 2147483647  ;;  %vm801_vm9 = vcmp.lt.s32.totalorder %v799_v0, %v800_v56  ;;  %v838_v20 = vrot.slane %v837_v30, 2  ;;  %v858_v13 = vsel %vm2880_vm14, %v856_v33, 2147483647  ;;  %v2399_v33 = vld [vmem:[%s1773_s16 + $0xb8] sm:$0xff] }
  0xb5   : > { %v878_v9 = vsel %vm877_vm5, %v2314_v10, 256  ;;  %v802_v41 = vsel %vm801_vm9, %v799_v0, %v800_v56  ;;  %vm820_vm12 = vcmp.lt.s32.totalorder %v818_v3, %v819_v8  ;;  %vm859_vm13 = vcmp.lt.s32.totalorder %v857_v26, %v858_v13 }
  0xb6   : > { %vm2881_vm3 = vcmask 27649   ;;  %v803_v43 = vrot.slane %v802_v41, 1  ;;  %v821_v44 = vsel %vm820_vm12, %v818_v3, %v819_v8  ;;  %vm839_vm10 = vcmp.lt.s32.totalorder %v837_v30, %v838_v20 }
  0xb7   : > { %v879_v42 = vsel %vm2881_vm3, %v878_v9, 2147483647  ;;  %v860_v45 = vsel %vm859_vm13, %v857_v26, %v858_v13  ;;  %v822_v53 = vrot.slane %v821_v44, 1  ;;  %v840_v18 = vsel %vm839_vm10, %v837_v30, %v838_v20  ;;  %v2396_v30 = vld [vmem:[%s1773_s16 + $0xb0] sm:$0xff] }
  0xb8   : > { %v861_v7 = vrot.slane %v860_v45, 4  ;;  %v880_v21 = vrot.slane %v879_v42, 4  ;;  %vm948_vm5 = vcmp.gt.f32.partialorder %v2349_v40, %v2258_v37  ;;  %vm804_vm11 = vcmp.lt.s32.totalorder %v802_v41, %v803_v43 }
  0xb9   : > { %v841_v29 = vrot.slane %v840_v18, 1  ;;  %vm896_vm4 = vcmp.eq.f32.partialorder %v2279_v57, %v2333_v62  ;;  %v913_v36 = vrot.slane %v912_v63, 1  ;;  %v805_v19 = vsel %vm804_vm11, %v802_v41, %v803_v43 }
  0xba   : > { %vm823_vm9 = vcmp.lt.s32.totalorder %v821_v44, %v822_v53  ;;  %vm862_vm14 = vcmp.lt.s32.totalorder %v860_v45, %v861_v7  ;;  %vm881_vm12 = vcmp.lt.s32.totalorder %v879_v42, %v880_v21  ;;  %vm949_vm13 = vcmp.gt.f32.partialorder %v2353_v54, %v2265_v4 }
  0xbb   : > { %v824_v17 = vsel %vm823_vm9, %v821_v44, %v822_v53  ;;  %vm842_vm3 = vcmp.lt.s32.totalorder %v840_v18, %v841_v29  ;;  %v863_v27 = vsel %vm862_vm14, %v860_v45, %v861_v7  ;;  %v882_v34 = vsel %vm881_vm12, %v879_v42, %v880_v21 }
  0xbc   : > { %v843_v47 = vsel %vm842_vm3, %v840_v18, %v841_v29  ;;  %v864_v39 = vrot.slane %v863_v27, 2  ;;  %v883_v49 = vrot.slane %v882_v34, 2  ;;  %v897_v31 = vsel %vm896_vm4, %v2314_v10, 256 }
  0xbd   : > { %v898_v50 = vsel %vm331_vm6, %v897_v31, 2147483647  ;;  %v914_v23 = vmax.f32 %v912_v63, %v913_v36  ;;  %v927_v52 = vsel %vm371_vm15, %v2309_v48, %v2316_v51  ;;  %v935_v6 = vsel %vm371_vm15, %v805_v19, %v824_v17 }
  0xbe   : > { %vm865_vm10 = vcmp.lt.s32.totalorder %v863_v27, %v864_v39  ;;  %vm884_vm11 = vcmp.lt.s32.totalorder %v882_v34, %v883_v49  ;;  %v899_v12 = vrot.slane %v898_v50, 4  ;;  %v928_v11 = vsel %vm373_vm2, %v927_v52, %v2320_v22 }
  0xbf   : > { %v866_v24 = vsel %vm865_vm10, %v863_v27, %v864_v39  ;;  %v885_v25 = vsel %vm884_vm11, %v882_v34, %v883_v49  ;;  %vm915_vm9 = vcmp.eq.f32.partialorder %v2279_v57, %v914_v23  ;;  %v929_v16 = vsel %vm375_vm1, %v928_v11, %v2331_v32 }
  0xc0   : > { %v867_v5 = vrot.slane %v866_v24, 1  ;;  %v886_v28 = vrot.slane %v885_v25, 1  ;;  %vm900_vm4 = vcmp.lt.s32.totalorder %v898_v50, %v899_v12  ;;  %v916_v48 = vsel %vm915_vm9, %v2314_v10, 256 }
  0xc1   : > { %v901_v51 = vsel %vm900_vm4, %v898_v50, %v899_v12  ;;  %v917_v35 = vsel %vm2834_vm7, %v916_v48, 2147483647  ;;  %vm2882_vm14 = vcmask 1043456   ;;  %v936_v22 = vsel %vm373_vm2, %v935_v6, %v843_v47 }
  0xc2   : > { %v930_v55 = vsel %vm2882_vm14, %v929_v16, %v2328_v14  ;;  %vm868_vm12 = vcmp.lt.s32.totalorder %v866_v24, %v867_v5  ;;  %vm887_vm3 = vcmp.lt.s32.totalorder %v885_v25, %v886_v28  ;;  %v902_v57 = vrot.slane %v901_v51, 2  ;;  %vm2884_vm4 = vmmov %vm2882_vm14 }
  0xc3   : > { %v918_v58 = vrot.slane %v917_v35, 4  ;;  %v869_v38 = vsel %vm868_vm12, %v866_v24, %v867_v5  ;;  %v888_v59 = vsel %vm887_vm3, %v885_v25, %v886_v28  ;;  %v931_v10 = vsel %vm379_vm8, %v930_v55, %v2333_v62  ;;  %v2450_v24 = vld [vmem:[%s1773_s16 + $0xc0] sm:$0xff] }
  0xc4   : > { %v950_v14 = vsel %vm948_vm5, %v2349_v40, %v2258_v37  ;;  %vm903_vm10 = vcmp.lt.s32.totalorder %v901_v51, %v902_v57  ;;  %v932_v32 = vsel %vm2832_vm0, %v931_v10, %v914_v23  ;;  %v937_v61 = vsel %vm375_vm1, %v936_v22, %v869_v38  ;;  %v2458_v22 = vld [vmem:[%s1773_s16 + $0xc8] sm:$0xff] }
  0xc5   : > { %vm919_vm11 = vcmp.lt.s32.totalorder %v917_v35, %v918_v58  ;;  %v904_v63 = vsel %vm903_vm10, %v901_v51, %v902_v57  ;;  %vm2883_vm9 = vcmask 30720   ;;  %v951_v62 = vsel %vm949_vm13, %v2353_v54, %v2265_v4 }
  0xc6   : > { %v920_v0 = vsel %vm919_vm11, %v917_v35, %v918_v58  ;;  %1650 = vst.msk [vmem:[%s1952_s20 + $0x18] sm:$0x7f] %vm2883_vm9, %v932_v32  ;;  %v905_v56 = vrot.slane %v904_v63, 1  ;;  %v952_v46 = vadd.s32 160, %v1763_v1  ;;  %v953_v8 = vadd.s32 160, %v1767_v2 }
  0xc7   : > { %v921_v3 = vrot.slane %v920_v0, 2  ;;  %v938_v26 = vsel %vm2884_vm4, %v937_v61, %v888_v59  ;;  %vm959_vm14 = vcmp.gt.f32.partialorder %v2396_v30, %v950_v14  ;;  %vm960_vm12 = vcmp.gt.f32.partialorder %v2399_v33, %v951_v62 }
  0xc8   : > { %v2405_v20 = vadd.s32 176, %v1763_v1  ;;  %vm906_vm3 = vcmp.lt.s32.totalorder %v904_v63, %v905_v56  ;;  %v954_v13 = vsel %vm948_vm5, %v952_v46, %v2288_v15  ;;  %v2412_v9 = vadd.s32 176, %v1767_v2 }
  0xc9   : > { %vm922_vm10 = vcmp.lt.s32.totalorder %v920_v0, %v921_v3  ;;  %v907_v41 = vsel %vm906_vm3, %v904_v63, %v905_v56  ;;  %v955_v43 = vsel %vm949_vm13, %v953_v8, %v2291_v60  ;;  %v2419_v44 = vsel %vm959_vm14, %v2396_v30, %v950_v14 }
  0xca   : > { %v923_v42 = vsel %vm922_vm10, %v920_v0, %v921_v3  ;;  %v939_v53 = vsel %vm379_vm8, %v938_v26, %v907_v41  ;;  %v2425_v37 = vsel %vm960_vm12, %v2399_v33, %v951_v62  ;;  %v2428_v15 = vsel %vm959_vm14, %v2405_v20, %v954_v13 }
  0xcb   : > { %v924_v45 = vrot.slane %v923_v42, 1  ;;  %vm2885_vm5 = vcmask 26624   ;;  %vm2886_vm11 = vcmask 28674   ;;  %vm2887_vm13 = vcmask 30724  }
  0xcc   : > { %v967_v40 = vsel %vm2885_vm5, %v2419_v44, -inf  ;;  %v986_v4 = vsel %vm2886_vm11, %v2419_v44, -inf  ;;  %v1005_v60 = vsel %vm2887_vm13, %v2419_v44, -inf  ;;  %vm2888_vm9 = vcmask 31750  }
  0xcd   : > { %v1024_v54 = vsel %vm2888_vm9, %v2419_v44, -inf  ;;  %vm925_vm4 = vcmp.lt.s32.totalorder %v923_v42, %v924_v45  ;;  %v968_v18 = vrot.slane %v967_v40, 4  ;;  %v987_v7 = vrot.slane %v986_v4, 4 }
  0xce   : > { %v1006_v21 = vrot.slane %v1005_v60, 4  ;;  %v926_v29 = vsel %vm925_vm4, %v923_v42, %v924_v45  ;;  %vm2889_vm14 = vcmask 25600   ;;  %vm2890_vm3 = vcmask 27649  }
  0xcf   : > { %v1025_v36 = vsel %vm2889_vm14, %v2425_v37, -inf  ;;  %v1050_v19 = vsel %vm2890_vm3, %v2425_v37, -inf  ;;  %v1069_v17 = vsel %vm331_vm6, %v2425_v37, -inf  ;;  %v940_v27 = vsel %vm2832_vm0, %v939_v53, %v926_v29 }
  0xd0   : > { %v969_v34 = vmax.f32 %v967_v40, %v968_v18  ;;  %v988_v47 = vmax.f32 %v986_v4, %v987_v7  ;;  %v1007_v39 = vmax.f32 %v1005_v60, %v1006_v21  ;;  %vm2891_vm10 = vcmask 30720  }
  0xd1   : > { %1651 = vst.msk [vmem:[%s2017_s23 + $0x18] sm:$0x7f] %vm2891_vm10, %v940_v27  ;;  %v1026_v49 = vmax.f32 %v1024_v54, %v1025_v36  ;;  %v1051_v31 = vrot.slane %v1050_v19, 4  ;;  %v1070_v50 = vrot.slane %v1069_v17, 4  ;;  %v1088_v23 = vsel %vm2834_vm7, %v2425_v37, -inf }
  0xd2   : > { %v970_v52 = vrot.slane %v969_v34, 2  ;;  %v989_v6 = vrot.slane %v988_v47, 2  ;;  %v1008_v12 = vrot.slane %v1007_v39, 2  ;;  %v1089_v11 = vrot.slane %v1088_v23, 4 }
  0xd3   : > { %v2455_v25 = vsel %vm960_vm12, %v2412_v9, %v955_v43  ;;  %v1027_v16 = vrot.slane %v1026_v49, 4  ;;  %v1052_v5 = vmax.f32 %v1050_v19, %v1051_v31  ;;  %v1071_v28 = vmax.f32 %v1069_v17, %v1070_v50 }
  0xd4   : > { %v971_v48 = vmax.f32 %v969_v34, %v970_v52  ;;  %v990_v51 = vmax.f32 %v988_v47, %v989_v6  ;;  %v1009_v35 = vmax.f32 %v1007_v39, %v1008_v12  ;;  %v1090_v55 = vmax.f32 %v1088_v23, %v1089_v11 }
  0xd5   : > { %v1028_v57 = vmax.f32 %v1026_v49, %v1027_v16  ;;  %v1053_v58 = vrot.slane %v1052_v5, 2  ;;  %v1072_v38 = vrot.slane %v1071_v28, 2  ;;  %vm2831_vm5 = vcmp.gt.f32.partialorder %v2450_v24, %v2396_v30 }
  0xd6   : > { %v972_v59 = vrot.slane %v971_v48, 1  ;;  %v991_v10 = vrot.slane %v990_v51, 1  ;;  %v1010_v14 = vrot.slane %v1009_v35, 1  ;;  %v1091_v32 = vrot.slane %v1090_v55, 2 }
  0xd7   : > { %v1029_v61 = vrot.slane %v1028_v57, 2  ;;  %v1054_v63 = vmax.f32 %v1052_v5, %v1053_v58  ;;  %v1073_v0 = vmax.f32 %v1071_v28, %v1072_v38  ;;  %vm2830_vm12 = vcmp.gt.f32.partialorder %v2458_v22, %v2399_v33 }
  0xd8   : > { %v2464_v62 = vmax.f32 %v971_v48, %v972_v59  ;;  %v2466_v56 = vmax.f32 %v990_v51, %v991_v10  ;;  %v2468_v3 = vmax.f32 %v1009_v35, %v1010_v14  ;;  %v1092_v46 = vmax.f32 %v1090_v55, %v1091_v32 }
  0xd9   : > { %v1030_v8 = vmax.f32 %v1028_v57, %v1029_v61  ;;  %v1055_v26 = vrot.slane %v1054_v63, 1  ;;  %v1074_v13 = vrot.slane %v1073_v0, 1  ;;  %v2475_v41 = vsel %vm2831_vm5, %v2450_v24, %v2396_v30 }
  0xda   : > { %vm974_vm11 = vcmp.eq.f32.partialorder %v2419_v44, %v2464_v62  ;;  %vm993_vm13 = vcmp.eq.f32.partialorder %v2419_v44, %v2466_v56  ;;  %vm1012_vm9 = vcmp.eq.f32.partialorder %v2419_v44, %v2468_v3  ;;  %v1093_v42 = vrot.slane %v1092_v46, 1 }
  0xdb   : > { %v975_v43 = vsel %vm974_vm11, %v2428_v15, 256  ;;  %v994_v45 = vsel %vm993_vm13, %v2428_v15, 256  ;;  %v1013_v53 = vsel %vm1012_vm9, %v2428_v15, 256  ;;  %v1031_v40 = vrot.slane %v1030_v8, 1 }
  0xdc   : > { %vm2892_vm4 = vcmask 26624   ;;  %vm2893_vm14 = vcmask 28674   ;;  %vm2894_vm3 = vcmask 30724   ;;  %v2489_v18 = vmax.f32 %v1054_v63, %v1055_v26 }
  0xdd   : > { %v976_v4 = vsel %vm2892_vm4, %v975_v43, 2147483647  ;;  %v995_v60 = vsel %vm2893_vm14, %v994_v45, 2147483647  ;;  %v1014_v54 = vsel %vm2894_vm3, %v1013_v53, 2147483647  ;;  %v1032_v36 = vmax.f32 %v1030_v8, %v1031_v40 }
  0xde   : > { %v977_v7 = vrot.slane %v976_v4, 4  ;;  %v996_v21 = vrot.slane %v995_v60, 4  ;;  %v1015_v29 = vrot.slane %v1014_v54, 4  ;;  %vm1057_vm10 = vcmp.eq.f32.partialorder %v2425_v37, %v2489_v18 }
  0xdf   : > { %v2493_v19 = vmax.f32 %v1073_v0, %v1074_v13  ;;  %v2495_v17 = vmax.f32 %v1092_v46, %v1093_v42  ;;  %v2502_v27 = vsel %vm2830_vm12, %v2458_v22, %v2399_v33  ;;  %vm1033_vm4 = vcmp.eq.f32.partialorder %v2419_v44, %v1032_v36 }
  0xe0   : > { %vm978_vm11 = vcmp.lt.s32.totalorder %v976_v4, %v977_v7  ;;  %vm997_vm13 = vcmp.lt.s32.totalorder %v995_v60, %v996_v21  ;;  %vm1016_vm9 = vcmp.lt.s32.totalorder %v1014_v54, %v1015_v29  ;;  %vm1034_vm14 = vcmp.eq.f32.partialorder %v2425_v37, %v1032_v36 }
  0xe1   : > { %v979_v34 = vsel %vm978_vm11, %v976_v4, %v977_v7  ;;  %v998_v47 = vsel %vm997_vm13, %v995_v60, %v996_v21  ;;  %v1017_v39 = vsel %vm1016_vm9, %v1014_v54, %v1015_v29  ;;  %v1035_v23 = vsel %vm1033_vm4, %v2428_v15, 256 }
  0xe2   : > { %v980_v49 = vrot.slane %v979_v34, 2  ;;  %v999_v31 = vrot.slane %v998_v47, 2  ;;  %v1018_v50 = vrot.slane %v1017_v39, 2  ;;  %v1036_v52 = vsel %vm1034_vm14, %v2455_v25, 256 }
  0xe3   : > { %vm2895_vm3 = vcmask 31750   ;;  %v1058_v12 = vsel %vm1057_vm10, %v2455_v25, 256  ;;  %vm1076_vm11 = vcmp.eq.f32.partialorder %v2425_v37, %v2493_v19  ;;  %vm2896_vm5 = vcmask 25600  }
  0xe4   : > { %v1037_v6 = vsel %vm2895_vm3, %v1035_v23, 2147483647  ;;  %vm981_vm13 = vcmp.lt.s32.totalorder %v979_v34, %v980_v49  ;;  %vm1000_vm9 = vcmp.lt.s32.totalorder %v998_v47, %v999_v31  ;;  %vm1019_vm12 = vcmp.lt.s32.totalorder %v1017_v39, %v1018_v50 }
  0xe5   : > { %v1038_v44 = vsel %vm2896_vm5, %v1036_v52, 2147483647  ;;  %v982_v11 = vsel %vm981_vm13, %v979_v34, %v980_v49  ;;  %v1001_v16 = vsel %vm1000_vm9, %v998_v47, %v999_v31  ;;  %v1020_v15 = vsel %vm1019_vm12, %v1017_v39, %v1018_v50  ;;  %v2546_v52 = vld [vmem:[%s1773_s16 + $0xd8] sm:$0xff] }
  0xe6   : > { %vm1039_vm4 = vcmp.lt.s32.totalorder %v1037_v6, %v1038_v44  ;;  %v983_v5 = vrot.slane %v982_v11, 1  ;;  %v1002_v28 = vrot.slane %v1001_v16, 1  ;;  %v1021_v48 = vrot.slane %v1020_v15, 1 }
  0xe7   : > { %v1040_v51 = vsel %vm1039_vm4, %v1037_v6, %v1038_v44  ;;  %vm2897_vm14 = vcmask 27649   ;;  %v1077_v57 = vsel %vm1076_vm11, %v2455_v25, 256  ;;  %vm1095_vm10 = vcmp.eq.f32.partialorder %v2425_v37, %v2495_v17 }
  0xe8   : > { %v1041_v35 = vrot.slane %v1040_v51, 4  ;;  %v1059_v55 = vsel %vm2897_vm14, %v1058_v12, 2147483647  ;;  %vm984_vm3 = vcmp.lt.s32.totalorder %v982_v11, %v983_v5  ;;  %vm1003_vm0 = vcmp.lt.s32.totalorder %v1001_v16, %v1002_v28 }
  0xe9   : > { %v1060_v58 = vrot.slane %v1059_v55, 4  ;;  %v1107_v38 = vsel %vm371_vm15, %v2464_v62, %v2466_v56  ;;  %v985_v59 = vsel %vm984_vm3, %v982_v11, %v983_v5  ;;  %v1004_v10 = vsel %vm1003_vm0, %v1001_v16, %v1002_v28 }
  0xea   : > { %vm1022_vm5 = vcmp.lt.s32.totalorder %v1020_v15, %v1021_v48  ;;  %vm1042_vm12 = vcmp.lt.s32.totalorder %v1040_v51, %v1041_v35  ;;  %v1078_v32 = vsel %vm331_vm6, %v1077_v57, 2147483647  ;;  %v1096_v61 = vsel %vm1095_vm10, %v2455_v25, 256 }
  0xeb   : > { %v1043_v14 = vsel %vm1042_vm12, %v1040_v51, %v1041_v35  ;;  %vm1061_vm13 = vcmp.lt.s32.totalorder %v1059_v55, %v1060_v58  ;;  %v1079_v37 = vrot.slane %v1078_v32, 4  ;;  %v1097_v46 = vsel %vm2834_vm7, %v1096_v61, 2147483647 }
  0xec   : > { %v1044_v63 = vrot.slane %v1043_v14, 2  ;;  %v1062_v0 = vsel %vm1061_vm13, %v1059_v55, %v1060_v58  ;;  %v1023_v8 = vsel %vm1022_vm5, %v1020_v15, %v1021_v48  ;;  %v1098_v13 = vrot.slane %v1097_v46, 4 }
  0xed   : > { %v1063_v26 = vrot.slane %v1062_v0, 2  ;;  %v1108_v62 = vsel %vm373_vm2, %v1107_v38, %v2468_v3  ;;  %vm1080_vm11 = vcmp.lt.s32.totalorder %v1078_v32, %v1079_v37  ;;  %v1115_v42 = vsel %vm371_vm15, %v985_v59, %v1004_v10 }
  0xee   : > { %vm1045_vm0 = vcmp.lt.s32.totalorder %v1043_v14, %v1044_v63  ;;  %v1109_v56 = vsel %vm375_vm1, %v1108_v62, %v1032_v36  ;;  %v1081_v25 = vsel %vm1080_vm11, %v1078_v32, %v1079_v37  ;;  %vm1099_vm4 = vcmp.lt.s32.totalorder %v1097_v46, %v1098_v13 }
  0xef   : > { %v1046_v43 = vsel %vm1045_vm0, %v1043_v14, %v1044_v63  ;;  %vm1064_vm9 = vcmp.lt.s32.totalorder %v1062_v0, %v1063_v26  ;;  %v1082_v40 = vrot.slane %v1081_v25, 2  ;;  %v1100_v4 = vsel %vm1099_vm4, %v1097_v46, %v1098_v13 }
  0xf0   : > { %v1047_v45 = vrot.slane %v1046_v43, 1  ;;  %v1065_v53 = vsel %vm1064_vm9, %v1062_v0, %v1063_v26  ;;  %v1101_v54 = vrot.slane %v1100_v4, 2  ;;  %vm2898_vm14 = vcmask 1043456  }
  0xf1   : > { %v1066_v60 = vrot.slane %v1065_v53, 1  ;;  %v1110_v3 = vsel %vm2898_vm14, %v1109_v56, %v2489_v18  ;;  %v1116_v7 = vsel %vm373_vm2, %v1115_v42, %v1023_v8  ;;  %vm1083_vm3 = vcmp.lt.s32.totalorder %v1081_v25, %v1082_v40  ;;  %vm2901_vm9 = vmmov %vm2898_vm14  ;;  %v2602_v8 = vld [vmem:[%s1773_s16 + $0xe0] sm:$0xff] }
  0xf2   : > { %vm1048_vm10 = vcmp.lt.s32.totalorder %v1046_v43, %v1047_v45  ;;  %v1111_v21 = vsel %vm379_vm8, %v1110_v3, %v2493_v19  ;;  %v1132_v29 = vadd.s32 192, %v1763_v1  ;;  %v1084_v34 = vsel %vm1083_vm3, %v1081_v25, %v1082_v40  ;;  %v2543_v19 = vld [vmem:[%s1773_s16 + $0xd0] sm:$0xff] }
  0xf3   : > { %v1049_v36 = vsel %vm1048_vm10, %v1046_v43, %v1047_v45  ;;  %vm1067_vm5 = vcmp.lt.s32.totalorder %v1065_v53, %v1066_v60  ;;  %vm1102_vm12 = vcmp.lt.s32.totalorder %v1100_v4, %v1101_v54  ;;  %v1085_v39 = vrot.slane %v1084_v34, 1 }
  0xf4   : > { %v1068_v47 = vsel %vm1067_vm5, %v1065_v53, %v1066_v60  ;;  %v1103_v49 = vsel %vm1102_vm12, %v1100_v4, %v1101_v54  ;;  %vm2899_vm13 = vcmask 1045504   ;;  %vm2900_vm0 = vcmask 30720  }
  0xf5   : > { %v1112_v18 = vsel %vm2899_vm13, %v1111_v21, %v2495_v17  ;;  %v1104_v31 = vrot.slane %v1103_v49, 1  ;;  %v1117_v50 = vsel %vm375_vm1, %v1116_v7, %v1049_v36  ;;  %v1133_v23 = vadd.s32 192, %v1767_v2  ;;  %vm2903_vm5 = vmmov %vm2899_vm13 }
  0xf6   : > { %1658 = vst.msk [vmem:[%s1952_s20 + $0x20] sm:$0x7f] %vm2900_vm0, %v1112_v18  ;;  %vm1086_vm11 = vcmp.lt.s32.totalorder %v1084_v34, %v1085_v39  ;;  %v1118_v6 = vsel %vm2901_vm9, %v1117_v50, %v1068_v47  ;;  %vm1139_vm4 = vcmp.gt.f32.partialorder %v2543_v19, %v2475_v41  ;;  %vm1140_vm14 = vcmp.gt.f32.partialorder %v2546_v52, %v2502_v27 }
  0xf7   : > { %v1087_v17 = vsel %vm1086_vm11, %v1084_v34, %v1085_v39  ;;  %vm1105_vm10 = vcmp.lt.s32.totalorder %v1103_v49, %v1104_v31  ;;  %vm2902_vm3 = vcmp.gt.f32.partialorder %v2450_v24, %v2396_v30  ;;  %v2563_v16 = vsel %vm1139_vm4, %v2543_v19, %v2475_v41 }
  0xf8   : > { %v1134_v12 = vsel %vm2902_vm3, %v1132_v29, %v2405_v20  ;;  %v1106_v44 = vsel %vm1105_vm10, %v1103_v49, %v1104_v31  ;;  %v1119_v11 = vsel %vm379_vm8, %v1118_v6, %v1087_v17  ;;  %v2570_v15 = vsel %vm1140_vm14, %v2546_v52, %v2502_v27 }
  0xf9   : > { %v1120_v30 = vsel %vm2903_vm5, %v1119_v11, %v1106_v44  ;;  %vm2904_vm12 = vcmask 26624   ;;  %vm2905_vm13 = vcmask 28674   ;;  %vm2906_vm0 = vcmask 30724  }
  0xfa   : > { %v1147_v20 = vsel %vm2904_vm12, %v2563_v16, -inf  ;;  %v1166_v24 = vsel %vm2905_vm13, %v2563_v16, -inf  ;;  %v1185_v5 = vsel %vm2906_vm0, %v2563_v16, -inf  ;;  %vm2907_vm11 = vcmask 30720  }
  0xfb   : > { %1659 = vst.msk [vmem:[%s2017_s23 + $0x20] sm:$0x7f] %vm2907_vm11, %v1120_v30  ;;  %vm2908_vm9 = vcmp.gt.f32.partialorder %v2458_v22, %v2399_v33  ;;  %v2586_v48 = vadd.s32 208, %v1763_v1  ;;  %v1148_v51 = vrot.slane %v1147_v20, 4  ;;  %v1167_v35 = vrot.slane %v1166_v24, 4 }
  0xfc   : > { %v1135_v28 = vsel %vm2908_vm9, %v1133_v23, %v2412_v9  ;;  %v1186_v55 = vrot.slane %v1185_v5, 4  ;;  %vm2909_vm10 = vcmask 31750   ;;  %vm2910_vm3 = vcmask 25600  }
  0xfd   : > { %v1204_v57 = vsel %vm2909_vm10, %v2563_v16, -inf  ;;  %v1205_v58 = vsel %vm2910_vm3, %v2570_v15, -inf  ;;  %vm2911_vm5 = vcmask 27649   ;;  %v1149_v59 = vmax.f32 %v1147_v20, %v1148_v51 }
  0xfe   : > { %v1230_v38 = vsel %vm2911_vm5, %v2570_v15, -inf  ;;  %v1168_v10 = vmax.f32 %v1166_v24, %v1167_v35  ;;  %v1206_v33 = vmax.f32 %v1204_v57, %v1205_v58  ;;  %v2595_v22 = vadd.s32 208, %v1767_v2 }
  0xff   : > { %v1231_v9 = vrot.slane %v1230_v38, 4  ;;  %v1187_v14 = vmax.f32 %v1185_v5, %v1186_v55  ;;  %v1249_v32 = vsel %vm331_vm6, %v2570_v15, -inf  ;;  %v1268_v61 = vsel %vm2834_vm7, %v2570_v15, -inf }
 0x100   : > { %v1150_v63 = vrot.slane %v1149_v59, 2  ;;  %v1169_v0 = vrot.slane %v1168_v10, 2  ;;  %v1207_v37 = vrot.slane %v1206_v33, 4  ;;  %v1145_v26 = vsel %vm1139_vm4, %v2586_v48, %v1134_v12 }
 0x101   : > { %v1232_v46 = vmax.f32 %v1230_v38, %v1231_v9  ;;  %v1188_v13 = vrot.slane %v1187_v14, 2  ;;  %v1250_v62 = vrot.slane %v1249_v32, 4  ;;  %v1269_v56 = vrot.slane %v1268_v61, 4 }
 0x102   : > { %v1151_v42 = vmax.f32 %v1149_v59, %v1150_v63  ;;  %v1170_v43 = vmax.f32 %v1168_v10, %v1169_v0  ;;  %v1208_v25 = vmax.f32 %v1206_v33, %v1207_v37  ;;  %vm2833_vm12 = vcmp.gt.f32.partialorder %v2602_v8, %v2543_v19  ;;  %v2656_v0 = vld [vmem:[%s1773_s16 + $0xe8] sm:$0xff] }
 0x103   : > { %v1233_v45 = vrot.slane %v1232_v46, 2  ;;  %v1189_v53 = vmax.f32 %v1187_v14, %v1188_v13  ;;  %v1251_v40 = vmax.f32 %v1249_v32, %v1250_v62  ;;  %v1270_v4 = vmax.f32 %v1268_v61, %v1269_v56 }
 0x104   : > { %v1152_v60 = vrot.slane %v1151_v42, 1  ;;  %v1171_v54 = vrot.slane %v1170_v43, 1  ;;  %v1209_v3 = vrot.slane %v1208_v25, 2  ;;  %v2614_v41 = vsel %vm1140_vm14, %v2595_v22, %v1135_v28 }
 0x105   : > { %v1234_v7 = vmax.f32 %v1232_v46, %v1233_v45  ;;  %v1190_v21 = vrot.slane %v1189_v53, 1  ;;  %v1252_v29 = vrot.slane %v1251_v40, 2  ;;  %v1271_v36 = vrot.slane %v1270_v4, 2 }
 0x106   : > { %v2616_v34 = vmax.f32 %v1151_v42, %v1152_v60  ;;  %v2618_v47 = vmax.f32 %v1170_v43, %v1171_v54  ;;  %v1210_v39 = vmax.f32 %v1208_v25, %v1209_v3  ;;  %v2629_v27 = vsel %vm2833_vm12, %v2602_v8, %v2543_v19 }
 0x107   : > { %v1235_v49 = vrot.slane %v1234_v7, 1  ;;  %v2620_v18 = vmax.f32 %v1189_v53, %v1190_v21  ;;  %v1253_v31 = vmax.f32 %v1251_v40, %v1252_v29  ;;  %v2622_v50 = vmax.f32 %v1270_v4, %v1271_v36 }
 0x108   : > { %vm1154_vm4 = vcmp.eq.f32.partialorder %v2563_v16, %v2616_v34  ;;  %vm1173_vm14 = vcmp.eq.f32.partialorder %v2563_v16, %v2618_v47  ;;  %v1211_v23 = vrot.slane %v1210_v39, 1  ;;  %vm2912_vm0 = vcmask 26624  }
 0x109   : > { %v2635_v6 = vmax.f32 %v1234_v7, %v1235_v49  ;;  %v1155_v17 = vsel %vm1154_vm4, %v1145_v26, 256  ;;  %v1174_v12 = vsel %vm1173_vm14, %v1145_v26, 256  ;;  %vm1192_vm13 = vcmp.eq.f32.partialorder %v2563_v16, %v2620_v18 }
 0x10a   : > { %v1254_v44 = vrot.slane %v1253_v31, 1  ;;  %v1156_v11 = vsel %vm2912_vm0, %v1155_v17, 2147483647  ;;  %vm2913_vm11 = vcmask 28674   ;;  %v1193_v20 = vsel %vm1192_vm13, %v1145_v26, 256 }
 0x10b   : > { %v1175_v30 = vsel %vm2913_vm11, %v1174_v12, 2147483647  ;;  %v2641_v24 = vmax.f32 %v1210_v39, %v1211_v23  ;;  %v1157_v5 = vrot.slane %v1156_v11, 4  ;;  %vm2914_vm9 = vcmask 30724  }
 0x10c   : > { %v1176_v28 = vrot.slane %v1175_v30, 4  ;;  %v1194_v51 = vsel %vm2914_vm9, %v1193_v20, 2147483647  ;;  %vm1237_vm10 = vcmp.eq.f32.partialorder %v2570_v15, %v2635_v6  ;;  %vm2915_vm0 = vcmask 31750  }
 0x10d   : > { %v1195_v35 = vrot.slane %v1194_v51, 4  ;;  %vm1213_vm3 = vcmp.eq.f32.partialorder %v2563_v16, %v2641_v24  ;;  %vm1214_vm5 = vcmp.eq.f32.partialorder %v2570_v15, %v2641_v24  ;;  %v1238_v55 = vsel %vm1237_vm10, %v2614_v41, 256 }
 0x10e   : > { %vm1158_vm4 = vcmp.lt.s32.totalorder %v1156_v11, %v1157_v5  ;;  %vm1177_vm14 = vcmp.lt.s32.totalorder %v1175_v30, %v1176_v28  ;;  %v1215_v57 = vsel %vm1213_vm3, %v1145_v26, 256  ;;  %v1216_v58 = vsel %vm1214_vm5, %v2614_v41, 256 }
 0x10f   : > { %v1159_v38 = vsel %vm1158_vm4, %v1156_v11, %v1157_v5  ;;  %v1178_v59 = vsel %vm1177_vm14, %v1175_v30, %v1176_v28  ;;  %vm1196_vm13 = vcmp.lt.s32.totalorder %v1194_v51, %v1195_v35  ;;  %v1217_v10 = vsel %vm2915_vm0, %v1215_v57, 2147483647  ;;  %v2693_v57 = vld [vmem:[%s1773_s16 + $0xf8] sm:$0xff] }
 0x110   : > { %v1160_v33 = vrot.slane %v1159_v38, 2  ;;  %v1179_v9 = vrot.slane %v1178_v59, 2  ;;  %v1197_v14 = vsel %vm1196_vm13, %v1194_v51, %v1195_v35  ;;  %vm2916_vm11 = vcmask 25600  }
 0x111   : > { %v1218_v16 = vsel %vm2916_vm11, %v1216_v58, 2147483647  ;;  %v1198_v32 = vrot.slane %v1197_v14, 2  ;;  %vm2917_vm12 = vcmask 27649   ;;  %v1255_v63 = vmax.f32 %v1253_v31, %v1254_v44 }
 0x112   : > { %vm1219_vm9 = vcmp.lt.s32.totalorder %v1217_v10, %v1218_v16  ;;  %v1239_v61 = vsel %vm2917_vm12, %v1238_v55, 2147483647  ;;  %vm1161_vm10 = vcmp.lt.s32.totalorder %v1159_v38, %v1160_v33  ;;  %vm1180_vm3 = vcmp.lt.s32.totalorder %v1178_v59, %v1179_v9 }
 0x113   : > { %v1220_v37 = vsel %vm1219_vm9, %v1217_v10, %v1218_v16  ;;  %v1240_v46 = vrot.slane %v1239_v61, 4  ;;  %v1162_v26 = vsel %vm1161_vm10, %v1159_v38, %v1160_v33  ;;  %v1181_v13 = vsel %vm1180_vm3, %v1178_v59, %v1179_v9 }
 0x114   : > { %vm1199_vm5 = vcmp.lt.s32.totalorder %v1197_v14, %v1198_v32  ;;  %v1221_v62 = vrot.slane %v1220_v37, 4  ;;  %v1163_v56 = vrot.slane %v1162_v26, 1  ;;  %v1182_v42 = vrot.slane %v1181_v13, 1 }
 0x115   : > { %v1200_v43 = vsel %vm1199_vm5, %v1197_v14, %v1198_v32  ;;  %vm1241_vm4 = vcmp.lt.s32.totalorder %v1239_v61, %v1240_v46  ;;  %vm1309_vm14 = vcmp.gt.f32.partialorder %v2656_v0, %v2546_v52  ;;  %vm1256_vm13 = vcmp.eq.f32.partialorder %v2570_v15, %v1255_v63 }
 0x116   : > { %v1201_v25 = vrot.slane %v1200_v43, 1  ;;  %vm1222_vm12 = vcmp.lt.s32.totalorder %v1220_v37, %v1221_v62  ;;  %v1242_v45 = vsel %vm1241_vm4, %v1239_v61, %v1240_v46  ;;  %vm1164_vm0 = vcmp.lt.s32.totalorder %v1162_v26, %v1163_v56 }
 0x117   : > { %vm1183_vm11 = vcmp.lt.s32.totalorder %v1181_v13, %v1182_v42  ;;  %v1223_v53 = vsel %vm1222_vm12, %v1220_v37, %v1221_v62  ;;  %v1243_v40 = vrot.slane %v1242_v45, 2  ;;  %v1165_v4 = vsel %vm1164_vm0, %v1162_v26, %v1163_v56 }
 0x118   : > { %v1184_v60 = vsel %vm1183_vm11, %v1181_v13, %v1182_v42  ;;  %v1224_v54 = vrot.slane %v1223_v53, 2  ;;  %v1312_v3 = vadd.s32 224, %v1763_v1  ;;  %vm1202_vm9 = vcmp.lt.s32.totalorder %v1200_v43, %v1201_v25 }
 0x119   : > { %vm1244_vm10 = vcmp.lt.s32.totalorder %v1242_v45, %v1243_v40  ;;  %v1257_v7 = vsel %vm1256_vm13, %v2614_v41, 256  ;;  %v1273_v21 = vrot.slane %v2622_v50, 1  ;;  %v1287_v39 = vsel %vm371_vm15, %v2616_v34, %v2618_v47 }
 0x11a   : > { %vm1225_vm3 = vcmp.lt.s32.totalorder %v1223_v53, %v1224_v54  ;;  %v1245_v29 = vsel %vm1244_vm10, %v1242_v45, %v1243_v40  ;;  %v1258_v36 = vsel %vm331_vm6, %v1257_v7, 2147483647  ;;  %v1203_v12 = vsel %vm1202_vm9, %v1200_v43, %v1201_v25 }
 0x11b   : > { %v1226_v49 = vsel %vm1225_vm3, %v1223_v53, %v1224_v54  ;;  %v1246_v31 = vrot.slane %v1245_v29, 1  ;;  %v1259_v23 = vrot.slane %v1258_v36, 4  ;;  %v1274_v17 = vmax.f32 %v2622_v50, %v1273_v21 }
 0x11c   : > { %v1227_v44 = vrot.slane %v1226_v49, 1  ;;  %v1288_v11 = vsel %vm373_vm2, %v1287_v39, %v2620_v18  ;;  %v1295_v30 = vsel %vm371_vm15, %v1165_v4, %v1184_v60  ;;  %v1313_v47 = vadd.s32 224, %v1767_v2 }
 0x11d   : > { %vm1260_vm5 = vcmp.lt.s32.totalorder %v1258_v36, %v1259_v23  ;;  %vm1275_vm4 = vcmp.eq.f32.partialorder %v2570_v15, %v1274_v17  ;;  %v1289_v34 = vsel %vm375_vm1, %v1288_v11, %v2641_v24  ;;  %vm1247_vm13 = vcmp.lt.s32.totalorder %v1245_v29, %v1246_v31  ;;  %v2681_v15 = vld [vmem:[%s1773_s16 + $0xf0] sm:$0xff] }
 0x11e   : > { %vm1228_vm12 = vcmp.lt.s32.totalorder %v1226_v49, %v1227_v44  ;;  %v1261_v50 = vsel %vm1260_vm5, %v1258_v36, %v1259_v23  ;;  %v1276_v20 = vsel %vm1275_vm4, %v2614_v41, 256  ;;  %vm2918_vm0 = vcmask 1043456  }
 0x11f   : > { %v1229_v5 = vsel %vm1228_vm12, %v1226_v49, %v1227_v44  ;;  %v1262_v28 = vrot.slane %v1261_v50, 2  ;;  %v1277_v18 = vsel %vm2834_vm7, %v1276_v20, 2147483647  ;;  %v1290_v51 = vsel %vm2918_vm0, %v1289_v34, %v2635_v6 }
 0x120   : > { %v1278_v35 = vrot.slane %v1277_v18, 4  ;;  %v1291_v24 = vsel %vm379_vm8, %v1290_v51, %v1255_v63  ;;  %v1296_v55 = vsel %vm373_vm2, %v1295_v30, %v1203_v12  ;;  %v2690_v41 = vsel %vm1309_vm14, %v2656_v0, %v2546_v52 }
 0x121   : > { %v1248_v58 = vsel %vm1247_vm13, %v1245_v29, %v1246_v31  ;;  %vm1263_vm11 = vcmp.lt.s32.totalorder %v1261_v50, %v1262_v28  ;;  %vm2919_vm9 = vcmask 1045504   ;;  %v1297_v38 = vsel %vm375_vm1, %v1296_v55, %v1229_v5  ;;  %vm2922_vm13 = vmmov %vm2918_vm0 }
 0x122   : > { %v1292_v6 = vsel %vm2919_vm9, %v1291_v24, %v1274_v17  ;;  %v1264_v59 = vsel %vm1263_vm11, %v1261_v50, %v1262_v28  ;;  %vm1279_vm10 = vcmp.lt.s32.totalorder %v1277_v18, %v1278_v35  ;;  %vm2920_vm3 = vcmask 30720  }
 0x123   : > { %1666 = vst.msk [vmem:[%s1952_s20 + $0x28] sm:$0x7f] %vm2920_vm3, %v1292_v6  ;;  %vm2921_vm5 = vcmp.gt.f32.partialorder %v2602_v8, %v2543_v19  ;;  %vm1319_vm4 = vcmp.gt.f32.partialorder %v2681_v15, %v2629_v27  ;;  %v1265_v33 = vrot.slane %v1264_v59, 1  ;;  %v1280_v9 = vsel %vm1279_vm10, %v1277_v18, %v1278_v35 }
 0x124   : > { %v1314_v10 = vsel %vm2921_vm5, %v1312_v3, %v2586_v48  ;;  %v1315_v14 = vsel %vm1309_vm14, %v1313_v47, %v2595_v22  ;;  %vm1320_vm12 = vcmp.gt.f32.partialorder %v2693_v57, %v2690_v41  ;;  %v1281_v16 = vrot.slane %v1280_v9, 2 }
 0x125   : > { %v1298_v32 = vsel %vm2922_vm13, %v1297_v38, %v1248_v58  ;;  %v2717_v19 = vsel %vm1319_vm4, %v2681_v15, %v2629_v27  ;;  %v2724_v52 = vsel %vm1320_vm12, %v2693_v57, %v2690_v41  ;;  %vm1266_vm14 = vcmp.lt.s32.totalorder %v1264_v59, %v1265_v33 }
 0x126   : > { %vm2923_vm0 = vcmask 26624   ;;  %vm2924_vm11 = vcmask 28674   ;;  %vm2925_vm9 = vcmask 30724   ;;  %v1267_v61 = vsel %vm1266_vm14, %v1264_v59, %v1265_v33 }
 0x127   : > { %v1327_v48 = vsel %vm2923_vm0, %v2717_v19, -inf  ;;  %v1346_v22 = vsel %vm2924_vm11, %v2717_v19, -inf  ;;  %v1365_v8 = vsel %vm2925_vm9, %v2717_v19, -inf  ;;  %vm1282_vm10 = vcmp.lt.s32.totalorder %v1280_v9, %v1281_v16 }
 0x128   : > { %v1323_v63 = vadd.s32 240, %v1763_v1  ;;  %v1324_v0 = vadd.s32 240, %v1767_v2  ;;  %v1283_v37 = vsel %vm1282_vm10, %v1280_v9, %v1281_v16  ;;  %v1299_v46 = vsel %vm379_vm8, %v1298_v32, %v1267_v61 }
 0x129   : > { %v1328_v26 = vrot.slane %v1327_v48, 4  ;;  %v1347_v13 = vrot.slane %v1346_v22, 4  ;;  %v1284_v62 = vrot.slane %v1283_v37, 1  ;;  %v1366_v56 = vrot.slane %v1365_v8, 4 }
 0x12a   : > { %vm2926_vm3 = vcmask 31750   ;;  %vm2927_vm5 = vcmask 25600   ;;  %vm2928_vm13 = vcmask 27649   ;;  %v1429_v4 = vsel %vm331_vm6, %v2724_v52, -inf }
 0x12b   : > { %v1384_v42 = vsel %vm2926_vm3, %v2717_v19, -inf  ;;  %v1385_v43 = vsel %vm2927_vm5, %v2724_v52, -inf  ;;  %v1329_v25 = vmax.f32 %v1327_v48, %v1328_v26  ;;  %v1348_v45 = vmax.f32 %v1346_v22, %v1347_v13 }
 0x12c   : > { %v1386_v53 = vmax.f32 %v1384_v42, %v1385_v43  ;;  %v1410_v1 = vsel %vm2928_vm13, %v2724_v52, -inf  ;;  %vm1285_vm14 = vcmp.lt.s32.totalorder %v1283_v37, %v1284_v62  ;;  %v1367_v2 = vmax.f32 %v1365_v8, %v1366_v56 }
 0x12d   : > { %v1411_v40 = vrot.slane %v1410_v1, 4  ;;  %v1286_v60 = vsel %vm1285_vm14, %v1283_v37, %v1284_v62  ;;  %v1330_v54 = vrot.slane %v1329_v25, 2  ;;  %v1349_v3 = vrot.slane %v1348_v45, 2 }
 0x12e   : > { %v1387_v7 = vrot.slane %v1386_v53, 4  ;;  %vm2929_vm0 = vcmask 1045504   ;;  %v1368_v29 = vrot.slane %v1367_v2, 2  ;;  %v1430_v39 = vrot.slane %v1429_v4, 4 }
 0x12f   : > { %v1300_v21 = vsel %vm2929_vm0, %v1299_v46, %v1286_v60  ;;  %v1412_v36 = vmax.f32 %v1410_v1, %v1411_v40  ;;  %vm2930_vm11 = vcmask 30720   ;;  %v1331_v49 = vmax.f32 %v1329_v25, %v1330_v54 }
 0x130   : > { %1667 = vst.msk [vmem:[%s2017_s23 + $0x28] sm:$0x7f] %vm2930_vm11, %v1300_v21  ;;  %v1350_v31 = vmax.f32 %v1348_v45, %v1349_v3  ;;  %v1388_v23 = vmax.f32 %v1386_v53, %v1387_v7  ;;  %v1448_v17 = vsel %vm2834_vm7, %v2724_v52, -inf  ;;  %v1369_v12 = vmax.f32 %v1367_v2, %v1368_v29 }
 0x131   : > { %v1413_v44 = vrot.slane %v1412_v36, 2  ;;  %v1431_v11 = vmax.f32 %v1429_v4, %v1430_v39  ;;  %v1449_v30 = vrot.slane %v1448_v17, 4  ;;  %v1325_v34 = vsel %vm1319_vm4, %v1323_v63, %v1314_v10 }
 0x132   : > { %v1332_v47 = vrot.slane %v1331_v49, 1  ;;  %v1351_v50 = vrot.slane %v1350_v31, 1  ;;  %v1389_v20 = vrot.slane %v1388_v23, 2  ;;  %v1370_v5 = vrot.slane %v1369_v12, 1 }
 0x133   : > { %v1414_v28 = vmax.f32 %v1412_v36, %v1413_v44  ;;  %v1432_v18 = vrot.slane %v1431_v11, 2  ;;  %v2751_v51 = vmax.f32 %v1448_v17, %v1449_v30  ;;  %v2756_v35 = vsel %vm1320_vm12, %v1324_v0, %v1315_v14 }
 0x134   : > { %v1333_v24 = vmax.f32 %v1331_v49, %v1332_v47  ;;  %v1352_v55 = vmax.f32 %v1350_v31, %v1351_v50  ;;  %v1390_v58 = vmax.f32 %v1388_v23, %v1389_v20  ;;  %v2758_v6 = vmax.f32 %v1369_v12, %v1370_v5 }
 0x135   : > { %v1415_v27 = vrot.slane %v1414_v28, 1  ;;  %v1433_v15 = vmax.f32 %v1431_v11, %v1432_v18  ;;  %v1451_v38 = vrot.slane %v2751_v51, 2  ;;  %vm2931_vm10 = vcmask 26624  }
 0x136   : > { %vm1334_vm4 = vcmp.eq.f32.partialorder %v2717_v19, %v1333_v24  ;;  %vm1353_vm9 = vcmp.eq.f32.partialorder %v2717_v19, %v1352_v55  ;;  %v1391_v59 = vrot.slane %v1390_v58, 1  ;;  %v2764_v10 = vsel %vm371_vm15, %v1333_v24, %v1352_v55 }
 0x137   : > { %v1335_v41 = vsel %vm1334_vm4, %v1325_v34, 256  ;;  %v1354_v57 = vsel %vm1353_vm9, %v1325_v34, 256  ;;  %vm1372_vm12 = vcmp.eq.f32.partialorder %v2717_v19, %v2758_v6  ;;  %v2768_v33 = vmax.f32 %v1414_v28, %v1415_v27 }
 0x138   : > { %v1336_v9 = vsel %vm2931_vm10, %v1335_v41, 2147483647  ;;  %vm2932_vm3 = vcmask 28674   ;;  %v1373_v16 = vsel %vm1372_vm12, %v1325_v34, 256  ;;  %v1392_v32 = vmax.f32 %v1390_v58, %v1391_v59 }
 0x139   : > { %v1355_v14 = vsel %vm2932_vm3, %v1354_v57, 2147483647  ;;  %v1337_v48 = vrot.slane %v1336_v9, 4  ;;  %vm2933_vm5 = vcmask 30724   ;;  %vm1417_vm13 = vcmp.eq.f32.partialorder %v2724_v52, %v2768_v33 }
 0x13a   : > { %v1356_v22 = vrot.slane %v1355_v14, 4  ;;  %v1374_v8 = vsel %vm2933_vm5, %v1373_v16, 2147483647  ;;  %vm1393_vm14 = vcmp.eq.f32.partialorder %v2717_v19, %v1392_v32  ;;  %vm1394_vm0 = vcmp.eq.f32.partialorder %v2724_v52, %v1392_v32 }
 0x13b   : > { %v1375_v61 = vrot.slane %v1374_v8, 4  ;;  %v1418_v63 = vsel %vm1417_vm13, %v2756_v35, 256  ;;  %vm1338_vm11 = vcmp.lt.s32.totalorder %v1336_v9, %v1337_v48  ;;  %v1395_v0 = vsel %vm1393_vm14, %v1325_v34, 256 }
 0x13c   : > { %vm1357_vm4 = vcmp.lt.s32.totalorder %v1355_v14, %v1356_v22  ;;  %v1396_v37 = vsel %vm1394_vm0, %v2756_v35, 256  ;;  %v1339_v46 = vsel %vm1338_vm11, %v1336_v9, %v1337_v48  ;;  %vm2934_vm12 = vcmask 31750  }
 0x13d   : > { %v1358_v26 = vsel %vm1357_vm4, %v1355_v14, %v1356_v22  ;;  %vm1376_vm9 = vcmp.lt.s32.totalorder %v1374_v8, %v1375_v61  ;;  %v1397_v13 = vsel %vm2934_vm12, %v1395_v0, 2147483647  ;;  %v1340_v62 = vrot.slane %v1339_v46, 2 }
 0x13e   : > { %v1359_v56 = vrot.slane %v1358_v26, 2  ;;  %v1377_v42 = vsel %vm1376_vm9, %v1374_v8, %v1375_v61  ;;  %vm2935_vm10 = vcmask 25600   ;;  %vm2936_vm5 = vcmask 27649  }
 0x13f   : > { %v1398_v43 = vsel %vm2935_vm10, %v1396_v37, 2147483647  ;;  %v1378_v19 = vrot.slane %v1377_v42, 2  ;;  %v1419_v25 = vsel %vm2936_vm5, %v1418_v63, 2147483647  ;;  %v1434_v45 = vrot.slane %v1433_v15, 1 }
 0x140   : > { %vm1399_vm3 = vcmp.lt.s32.totalorder %v1397_v13, %v1398_v43  ;;  %vm1341_vm13 = vcmp.lt.s32.totalorder %v1339_v46, %v1340_v62  ;;  %vm1360_vm7 = vcmp.lt.s32.totalorder %v1358_v26, %v1359_v56  ;;  %v1420_v1 = vrot.slane %v1419_v25, 4 }
 0x141   : > { %v1400_v53 = vsel %vm1399_vm3, %v1397_v13, %v1398_v43  ;;  %v1342_v2 = vsel %vm1341_vm13, %v1339_v46, %v1340_v62  ;;  %v1361_v40 = vsel %vm1360_vm7, %v1358_v26, %v1359_v56  ;;  %vm1379_vm14 = vcmp.lt.s32.totalorder %v1377_v42, %v1378_v19 }
 0x142   : > { %v1401_v4 = vrot.slane %v1400_v53, 4  ;;  %v1343_v60 = vrot.slane %v1342_v2, 1  ;;  %v1362_v54 = vrot.slane %v1361_v40, 1  ;;  %v1380_v3 = vsel %vm1379_vm14, %v1377_v42, %v1378_v19 }
 0x143   : > { %vm1421_vm0 = vcmp.lt.s32.totalorder %v1419_v25, %v1420_v1  ;;  %v1381_v7 = vrot.slane %v1380_v3, 1  ;;  %v1435_v29 = vmax.f32 %v1433_v15, %v1434_v45  ;;  %v1452_v17 = vmax.f32 %v2751_v51, %v1451_v38 }
 0x144   : > { %vm1402_vm11 = vcmp.lt.s32.totalorder %v1400_v53, %v1401_v4  ;;  %v1422_v21 = vsel %vm1421_vm0, %v1419_v25, %v1420_v1  ;;  %vm1344_vm4 = vcmp.lt.s32.totalorder %v1342_v2, %v1343_v60  ;;  %vm1363_vm9 = vcmp.lt.s32.totalorder %v1361_v40, %v1362_v54 }
 0x145   : > { %v1403_v36 = vsel %vm1402_vm11, %v1400_v53, %v1401_v4  ;;  %v1423_v39 = vrot.slane %v1422_v21, 2  ;;  %v1345_v49 = vsel %vm1344_vm4, %v1342_v2, %v1343_v60  ;;  %v1364_v23 = vsel %vm1363_vm9, %v1361_v40, %v1362_v54 }
 0x146   : > { %v1404_v31 = vrot.slane %v1403_v36, 2  ;;  %vm1436_vm7 = vcmp.eq.f32.partialorder %v2724_v52, %v1435_v29  ;;  %v1468_v11 = vsel %vm373_vm2, %v2764_v10, %v2758_v6  ;;  %vm1382_vm3 = vcmp.lt.s32.totalorder %v1380_v3, %v1381_v7 }
 0x147   : > { %vm1424_vm12 = vcmp.lt.s32.totalorder %v1422_v21, %v1423_v39  ;;  %v1437_v44 = vsel %vm1436_vm7, %v2756_v35, 256  ;;  %v1453_v47 = vrot.slane %v1452_v17, 1  ;;  %v1469_v5 = vsel %vm375_vm1, %v1468_v11, %v1392_v32 }
 0x148   : > { %vm1405_vm10 = vcmp.lt.s32.totalorder %v1403_v36, %v1404_v31  ;;  %v1425_v12 = vsel %vm1424_vm12, %v1422_v21, %v1423_v39  ;;  %v1438_v34 = vsel %vm331_vm6, %v1437_v44, 2147483647  ;;  %vm2937_vm5 = vcmask 1043456  }
 0x149   : > { %v1406_v30 = vsel %vm1405_vm10, %v1403_v36, %v1404_v31  ;;  %v1439_v20 = vrot.slane %v1438_v34, 4  ;;  %v1426_v28 = vrot.slane %v1425_v12, 1  ;;  %v1454_v18 = vmax.f32 %v1452_v17, %v1453_v47 }
 0x14a   : > { %v1407_v50 = vrot.slane %v1406_v30, 1  ;;  %v1470_v51 = vsel %vm2937_vm5, %v1469_v5, %v2768_v33  ;;  %v1383_v24 = vsel %vm1382_vm3, %v1380_v3, %v1381_v7  ;;  %v1475_v58 = vsel %vm371_vm15, %v1345_v49, %v1364_v23  ;;  %vm2941_vm3 = vmmov %vm2937_vm5 }
 0x14b   : > { %vm1440_vm13 = vcmp.lt.s32.totalorder %v1438_v34, %v1439_v20  ;;  %v1471_v55 = vsel %vm379_vm8, %v1470_v51, %v1435_v29  ;;  %vm1455_vm6 = vcmp.eq.f32.partialorder %v2724_v52, %v1454_v18  ;;  %vm2938_vm0 = vcmask 1045504  }
 0x14c   : > { %vm1408_vm14 = vcmp.lt.s32.totalorder %v1406_v30, %v1407_v50  ;;  %v1441_v6 = vsel %vm1440_vm13, %v1438_v34, %v1439_v20  ;;  %v1472_v27 = vsel %vm2938_vm0, %v1471_v55, %v1454_v18  ;;  %v1456_v38 = vsel %vm1455_vm6, %v2756_v35, 256 }
 0x14d   : > { %v1442_v15 = vrot.slane %v1441_v6, 2  ;;  %vm2939_vm11 = vcmask 30720   ;;  %vm1427_vm4 = vcmp.lt.s32.totalorder %v1425_v12, %v1426_v28  ;;  %vm2940_vm9 = vcmask 31749  }
 0x14e   : > { %1674 = vst.msk [vmem:[%s1952_s20 + $0x30] sm:$0x7f] %vm2939_vm11, %v1472_v27  ;;  %v1457_v59 = vsel %vm2940_vm9, %v1456_v38, 2147483647  ;;  %v1409_v10 = vsel %vm1408_vm14, %v1406_v30, %v1407_v50  ;;  %v1476_v57 = vsel %vm373_vm2, %v1475_v58, %v1383_v24  ;;  %v1428_v52 = vsel %vm1427_vm4, %v1425_v12, %v1426_v28  ;;  %vm2942_vm2 = vmmov %vm2938_vm0 }
 0x14f   : > { %vm1443_vm12 = vcmp.lt.s32.totalorder %v1441_v6, %v1442_v15  ;;  %v1458_v41 = vrot.slane %v1457_v59, 4  ;;  %v1477_v16 = vsel %vm375_vm1, %v1476_v57, %v1409_v10  ;;  %vm2943_vm13 = vmmov %vm2939_vm11 }
 0x150   : > { %v1444_v33 = vsel %vm1443_vm12, %v1441_v6, %v1442_v15  ;;  %v1478_v48 = vsel %vm2941_vm3, %v1477_v16, %v1428_v52 }
 0x151   : > { %v1445_v9 = vrot.slane %v1444_v33, 1  ;;  %vm1459_vm15 = vcmp.lt.s32.totalorder %v1457_v59, %v1458_v41 }
 0x152   : > { %v1460_v14 = vsel %vm1459_vm15, %v1457_v59, %v1458_v41 }
 0x153   : > { %vm1446_vm7 = vcmp.lt.s32.totalorder %v1444_v33, %v1445_v9  ;;  %v1461_v35 = vrot.slane %v1460_v14, 2 }
 0x154   : > { %v1447_v32 = vsel %vm1446_vm7, %v1444_v33, %v1445_v9 }
 0x155   : > { %vm1462_vm10 = vcmp.lt.s32.totalorder %v1460_v14, %v1461_v35  ;;  %v1479_v61 = vsel %vm379_vm8, %v1478_v48, %v1447_v32 }
 0x156   : > { %v1463_v22 = vsel %vm1462_vm10, %v1460_v14, %v1461_v35 }
 0x157   : > { %v1464_v8 = vrot.slane %v1463_v22, 1 }
 0x159   : > { %vm1465_vm5 = vcmp.lt.s32.totalorder %v1463_v22, %v1464_v8 }
 0x15a   : > { %v1466_v63 = vsel %vm1465_vm5, %v1463_v22, %v1464_v8 }
 0x15b   : > { %v1480_v0 = vsel %vm2942_vm2, %v1479_v61, %v1466_v63 }
 0x15c   : > { %1675 = vst.msk [vmem:[%s2017_s23 + $0x30] sm:$0x7f] %vm2943_vm13, %v1480_v0 }
 0x15d PF: > { %s13_s11 = sadd.s32 1, %s1726_s11   ;;  %s2944_s9 = smov %s1722_s10 }
 0x15e   : > { %p10_p5 = scmp.ge.s32.totalorder %s13_s11, 4   ;;  %s2945_s10 = smov %s2947_s12 }
 0x160   :  { %12 = sbr.rel (!%p10_p5) target bundleno = 2 (0x2), region = 93 }

</bundles_post_ra>
